<compile_context>
chip_gen: v6e
topology: v6e:2x2x1
jax: 0.10.0
libtpu: 0.0.40
codegen_flags: <defaults>
</compile_context>

<pallas_src>
import jax
import jax.numpy as jnp
from jax.experimental import pallas as pl
from jax.experimental.pallas import tpu as pltpu

# ---------------------------------------------------------------------------
# Original (PyTorch) layer layout.
ORIG_DIMS = [784, 400, 200, 50, 10, 2, 10, 50, 200, 400, 784]
ORIG_ACTS = ["relu", "relu", "relu", "relu", "none",
             "relu", "relu", "relu", "relu", "sigmoid"]
ORIG_NUM_LAYERS = len(ORIG_DIMS) - 1  # 10

# Kernel-side layout after fusing the 10->2->10 bottleneck into one 10->10
# layer and lane-padding every dim (including the 784 I/O dim) to a multiple
# of 128.
FUSED_DIMS = [784, 400, 200, 50, 10, 10, 50, 200, 400, 784]     # 9 layers
PADDED_DIMS = [896, 512, 256, 128, 128, 128, 128, 256, 512, 896]
KERNEL_ACTS = ["relu"] * 8 + ["sigmoid"]
NUM_LAYERS = len(PADDED_DIMS) - 1  # 9

D_IN = ORIG_DIMS[0]        # 784
D_IN_PAD = PADDED_DIMS[0]  # 896
D_OUT = ORIG_DIMS[-1]      # 784
D_OUT_PAD = PADDED_DIMS[-1]  # 896

# Static (128-lane aligned) offsets of each layer's bias inside the bias slab.
BIAS_OFFSETS = []
_off = 0
for _li in range(NUM_LAYERS):
    BIAS_OFFSETS.append(_off)
    _off += PADDED_DIMS[_li + 1]
BIAS_TOTAL = _off  # 2944


# ---------------------------------------------------------------------------
# Kernel: full 9-layer forward for one batch tile, entirely in VMEM.
def autoencoder_kernel(x_ref, *refs):
    """refs = (w0, ..., w8 [bf16], bias_slab [f32], out_ref)."""
    out_ref = refs[-1]
    bias_ref = refs[-2]
    w_refs = refs[:-2]

    h = x_ref[...]  # (tile_b, 896) bf16
    for li in range(NUM_LAYERS):
        out_p = PADDED_DIMS[li + 1]
        w = w_refs[li][...]                                          # bf16 (in_p, out_p)
        b = bias_ref[:, BIAS_OFFSETS[li]:BIAS_OFFSETS[li] + out_p]   # f32  (1, out_p)
        # bf16 operands on the MXU, f32 accumulation.
        z = jnp.dot(h, w, preferred_element_type=jnp.float32) + b    # f32
        if KERNEL_ACTS[li] == "relu":
            # bias add + ReLU in f32 on the VPU, carry activation as bf16.
            h = jnp.maximum(z, 0.0).astype(jnp.bfloat16)
        else:
            # Final layer: sigmoid = 1 / (1 + exp(-z)); exp and approximate
            # reciprocal both run on the EUP slot.
            e = jnp.exp(-z)
            out_ref[...] = pl.reciprocal(1.0 + e, approx=True).astype(out_ref.dtype)


# ---------------------------------------------------------------------------
# Host-side parameter preparation (call ONCE, reuse across forward calls).
def prepare_kernel_params(params):
    """Fuse Linear(10,2)->Linear(2,10), zero-pad all dims to lane multiples
    (784 -> 896 for I/O), cast weights to bf16, and concatenate all biases
    into one f32 slab."""
    w5, b5 = params[4]   # (10, 2), (1, 2)
    w6, b6 = params[5]   # (2, 10), (1, 10)
    fused_w = w5 @ w6            # (10, 10)
    fused_b = b5 @ w6 + b6       # (1, 10)
    fused = list(params[:4]) + [(fused_w, fused_b)] + list(params[6:])
    assert len(fused) == NUM_LAYERS

    weights = []
    biases = []
    for li, (w, b) in enumerate(fused):
        in_p, out_p = PADDED_DIMS[li], PADDED_DIMS[li + 1]
        wp = jnp.zeros((in_p, out_p), jnp.float32).at[:w.shape[0], :w.shape[1]].set(w)
        bp = jnp.zeros((1, out_p), jnp.float32).at[:, :b.shape[1]].set(b)
        weights.append(wp.astype(jnp.bfloat16))
        biases.append(bp)
    bias_slab = jnp.concatenate(biases, axis=1)  # (1, BIAS_TOTAL) f32
    return weights, bias_slab


def _round_up(x, m):
    return ((x + m - 1) // m) * m


def _choose_tile_b(B):
    """Adaptive batch tile.

    * tiny batches: pad only to the bf16 sublane pack (16 rows) -> no 32x
      redundant MXU/DMA work for e.g. B=8.
    * medium batches: split into two grid steps so v7x's second TensorCore
      has work (dimension_semantics=("parallel",)).
    * large batches: 512-row tiles amortize the ~0.35us per-grid-step
      overhead; grid stays >= 2.
    """
    if B <= 32:
        return _round_up(B, 16)
    if B <= 1024:
        return _round_up((B + 1) // 2, 16)
    return 512


def deep_autoencoder_forward(x, weights, bias_slab, *, tile_b=None):
    """x: (B, 784) float32/bfloat16.  weights/bias_slab: from
    prepare_kernel_params (call it once and reuse)."""
    B, d_in = x.shape
    assert d_in == D_IN

    if tile_b is None:
        tile_b = _choose_tile_b(B)
    assert tile_b % 16 == 0

    # Stream activations into the kernel as bf16 (halves x HBM bytes) and pad
    # both the batch (to a tile multiple) and the feature dim (784 -> 896,
    # lane-dense loads/stores).  Padded lanes/rows are zero.
    b_pad = _round_up(B, tile_b)
    x = jnp.pad(x.astype(jnp.bfloat16),
                ((0, b_pad - B), (0, D_IN_PAD - d_in)))

    grid = (b_pad // tile_b,)
    in_specs = [pl.BlockSpec((tile_b, D_IN_PAD), lambda i: (i, 0))]
    for w in weights:
        # Full-array, grid-invariant blocks (constant index_map -> DMA'd once,
        # VMEM-resident across the batch grid).
        in_specs.append(pl.BlockSpec(w.shape, lambda i: (0, 0)))
    in_specs.append(pl.BlockSpec(bias_slab.shape, lambda i: (0, 0)))
    out_spec = pl.BlockSpec((tile_b, D_OUT_PAD), lambda i: (i, 0))

    out = pl.pallas_call(
        autoencoder_kernel,
        out_shape=jax.ShapeDtypeStruct((b_pad, D_OUT_PAD), jnp.float32),
        grid_spec=pltpu.PrefetchScalarGridSpec(
            num_scalar_prefetch=0,
            grid=grid,
            in_specs=in_specs,
            out_specs=out_spec,
        ),
        compiler_params=pltpu.CompilerParams(
            dimension_semantics=("parallel",),     # shards batch tiles over v7x's 2 TCs
            vmem_limit_bytes=48 * 1024 * 1024,     # headroom below 64 MiB (v7x)
        ),
    )(x, *weights, bias_slab)
    return out[:B, :D_OUT]


# ---------------------------------------------------------------------------
# Init + pure-JAX f32 reference with the ORIGINAL (unfused, unpadded) layers.
def init_params(key):
    """PyTorch nn.Linear default init: U(-1/sqrt(fan_in), 1/sqrt(fan_in)).
    Weights stored transposed vs. PyTorch, i.e. (in_features, out_features)."""
    params = []
    for li in range(ORIG_NUM_LAYERS):
        fan_in, fan_out = ORIG_DIMS[li], ORIG_DIMS[li + 1]
        key, kw, kb = jax.random.split(key, 3)
        bound = 1.0 / jnp.sqrt(fan_in)
        w = jax.random.uniform(kw, (fan_in, fan_out), jnp.float32,
                               minval=-bound, maxval=bound)
        b = jax.random.uniform(kb, (1, fan_out), jnp.float32,
                               minval=-bound, maxval=bound)
        params.append((w, b))
    return params


def reference_forward(x, params):
    h = x
    for li in range(ORIG_NUM_LAYERS):
        w, b = params[li]
        h = h @ w + b
        if ORIG_ACTS[li] == "relu":
            h = jnp.maximum(h, 0.0)
        elif ORIG_ACTS[li] == "sigmoid":
            h = jax.nn.sigmoid(h)
    return h


if __name__ == "__main__":
    key = jax.random.PRNGKey(0)
    key, kx = jax.random.split(key)

    B = 8
    x = jax.random.normal(kx, (B, 784), jnp.float32)
    params = init_params(key)

    # Prepare the kernel-side weights ONCE; reuse for every forward call.
    kernel_weights, kernel_bias = prepare_kernel_params(params)
    kernel_weights = [jax.block_until_ready(w) for w in kernel_weights]
    kernel_bias = jax.block_until_ready(kernel_bias)

    out = deep_autoencoder_forward(x, kernel_weights, kernel_bias)
    out = jax.block_until_ready(out)

    ref = reference_forward(x, params)
    assert out.shape == (B, 784), out.shape
    # bf16 MXU operands / bf16 inter-layer activations + bottleneck fusion +
    # approx reciprocal sigmoid => small deviation from the pure-f32 reference.
    max_err = float(jnp.max(jnp.abs(out - ref)))
    assert jnp.allclose(out, ref, atol=2e-2, rtol=2e-2), max_err

    print("KERNEL_OK")
</pallas_src>

<mosaic_0001>
module attributes {stable_mosaic.version = 11 : i64} {
  func.func @autoencoder_kernel(%arg0: i32, %arg1: memref<16x896xbf16, #tpu.memory_space<vmem>>, %arg2: memref<896x512xbf16, #tpu.memory_space<vmem>>, %arg3: memref<512x256xbf16, #tpu.memory_space<vmem>>, %arg4: memref<256x128xbf16, #tpu.memory_space<vmem>>, %arg5: memref<128x128xbf16, #tpu.memory_space<vmem>>, %arg6: memref<128x128xbf16, #tpu.memory_space<vmem>>, %arg7: memref<128x128xbf16, #tpu.memory_space<vmem>>, %arg8: memref<128x256xbf16, #tpu.memory_space<vmem>>, %arg9: memref<256x512xbf16, #tpu.memory_space<vmem>>, %arg10: memref<512x896xbf16, #tpu.memory_space<vmem>>, %arg11: memref<1x2944xf32, #tpu.memory_space<vmem>>, %arg12: memref<16x896xf32, #tpu.memory_space<vmem>>) attributes {dimension_semantics = [#tpu.dimension_semantics<parallel>], iteration_bounds = array<i64: 1>, scalar_prefetch = 0 : i64, scratch_operands = 0 : i64, tpu.core_type = #tpu.core_type<tc>, window_params = [{transform_indices = @transform_0, window_bounds = array<i64: 16, 896>}, {pipeline_mode = #tpu.pipeline_mode<synchronous>, transform_indices = @transform_1, window_bounds = array<i64: 896, 512>}, {pipeline_mode = #tpu.pipeline_mode<synchronous>, transform_indices = @transform_2, window_bounds = array<i64: 512, 256>}, {pipeline_mode = #tpu.pipeline_mode<synchronous>, transform_indices = @transform_3, window_bounds = array<i64: 256, 128>}, {pipeline_mode = #tpu.pipeline_mode<synchronous>, transform_indices = @transform_4, window_bounds = array<i64: 128, 128>}, {pipeline_mode = #tpu.pipeline_mode<synchronous>, transform_indices = @transform_5, window_bounds = array<i64: 128, 128>}, {pipeline_mode = #tpu.pipeline_mode<synchronous>, transform_indices = @transform_6, window_bounds = array<i64: 128, 128>}, {pipeline_mode = #tpu.pipeline_mode<synchronous>, transform_indices = @transform_7, window_bounds = array<i64: 128, 256>}, {pipeline_mode = #tpu.pipeline_mode<synchronous>, transform_indices = @transform_8, window_bounds = array<i64: 256, 512>}, {pipeline_mode = #tpu.pipeline_mode<synchronous>, transform_indices = @transform_9, window_bounds = array<i64: 512, 896>}, {pipeline_mode = #tpu.pipeline_mode<synchronous>, transform_indices = @transform_10, window_bounds = array<i64: 1, 2944>}, {transform_indices = @transform_11, window_bounds = array<i64: 16, 896>}]} {
    %c0 = arith.constant 0 : index
    %c0_0 = arith.constant 0 : index
    %0 = vector.load %arg1[%c0, %c0_0] : memref<16x896xbf16, #tpu.memory_space<vmem>>, vector<16x896xbf16>
    %c0_1 = arith.constant 0 : index
    %c0_2 = arith.constant 0 : index
    %1 = vector.load %arg2[%c0_1, %c0_2] : memref<896x512xbf16, #tpu.memory_space<vmem>>, vector<896x512xbf16>
    %c0_3 = arith.constant 0 : index
    %c0_4 = arith.constant 0 : index
    %2 = vector.load %arg11[%c0_3, %c0_4] : memref<1x2944xf32, #tpu.memory_space<vmem>>, vector<1x512xf32>
    %cst = arith.constant dense<0.000000e+00> : vector<16x512xf32>
    %3 = tpu.matmul %0, %1, %cst {dimension_numbers = #tpu.dot_dimension_numbers<[1], [0], [0], [1], [0, 0, 1, 1], [], []>} : vector<16x896xbf16>, vector<896x512xbf16>, vector<16x512xf32> -> vector<16x512xf32>
    %4 = vector.broadcast %2 : vector<1x512xf32> to vector<16x512xf32>
    %5 = arith.addf %3, %4 : vector<16x512xf32>
    %cst_5 = arith.constant 0.000000e+00 : f32
    %6 = vector.broadcast %cst_5 : f32 to vector<16x512xf32>
    %7 = arith.maximumf %5, %6 : vector<16x512xf32>
    %8 = arith.truncf %7 : vector<16x512xf32> to vector<16x512xbf16>
    %c0_6 = arith.constant 0 : index
    %c0_7 = arith.constant 0 : index
    %9 = vector.load %arg3[%c0_6, %c0_7] : memref<512x256xbf16, #tpu.memory_space<vmem>>, vector<512x256xbf16>
    %c0_8 = arith.constant 0 : index
    %c512 = arith.constant 512 : index
    %10 = vector.load %arg11[%c0_8, %c512] : memref<1x2944xf32, #tpu.memory_space<vmem>>, vector<1x256xf32>
    %cst_9 = arith.constant dense<0.000000e+00> : vector<16x256xf32>
    %11 = tpu.matmul %8, %9, %cst_9 {dimension_numbers = #tpu.dot_dimension_numbers<[1], [0], [0], [1], [0, 0, 1, 1], [], []>} : vector<16x512xbf16>, vector<512x256xbf16>, vector<16x256xf32> -> vector<16x256xf32>
    %12 = vector.broadcast %10 : vector<1x256xf32> to vector<16x256xf32>
    %13 = arith.addf %11, %12 : vector<16x256xf32>
    %cst_10 = arith.constant 0.000000e+00 : f32
    %14 = vector.broadcast %cst_10 : f32 to vector<16x256xf32>
    %15 = arith.maximumf %13, %14 : vector<16x256xf32>
    %16 = arith.truncf %15 : vector<16x256xf32> to vector<16x256xbf16>
    %c0_11 = arith.constant 0 : index
    %c0_12 = arith.constant 0 : index
    %17 = vector.load %arg4[%c0_11, %c0_12] : memref<256x128xbf16, #tpu.memory_space<vmem>>, vector<256x128xbf16>
    %c0_13 = arith.constant 0 : index
    %c768 = arith.constant 768 : index
    %18 = vector.load %arg11[%c0_13, %c768] : memref<1x2944xf32, #tpu.memory_space<vmem>>, vector<1x128xf32>
    %cst_14 = arith.constant dense<0.000000e+00> : vector<16x128xf32>
    %19 = tpu.matmul %16, %17, %cst_14 {dimension_numbers = #tpu.dot_dimension_numbers<[1], [0], [0], [1], [0, 0, 1, 1], [], []>} : vector<16x256xbf16>, vector<256x128xbf16>, vector<16x128xf32> -> vector<16x128xf32>
    %20 = vector.broadcast %18 : vector<1x128xf32> to vector<16x128xf32>
    %21 = arith.addf %19, %20 : vector<16x128xf32>
    %cst_15 = arith.constant 0.000000e+00 : f32
    %22 = vector.broadcast %cst_15 : f32 to vector<16x128xf32>
    %23 = arith.maximumf %21, %22 : vector<16x128xf32>
    %24 = arith.truncf %23 : vector<16x128xf32> to vector<16x128xbf16>
    %c0_16 = arith.constant 0 : index
    %c0_17 = arith.constant 0 : index
    %25 = vector.load %arg5[%c0_16, %c0_17] : memref<128x128xbf16, #tpu.memory_space<vmem>>, vector<128x128xbf16>
    %c0_18 = arith.constant 0 : index
    %c896 = arith.constant 896 : index
    %26 = vector.load %arg11[%c0_18, %c896] : memref<1x2944xf32, #tpu.memory_space<vmem>>, vector<1x128xf32>
    %cst_19 = arith.constant dense<0.000000e+00> : vector<16x128xf32>
    %27 = tpu.matmul %24, %25, %cst_19 {dimension_numbers = #tpu.dot_dimension_numbers<[1], [0], [0], [1], [0, 0, 1, 1], [], []>} : vector<16x128xbf16>, vector<128x128xbf16>, vector<16x128xf32> -> vector<16x128xf32>
    %28 = vector.broadcast %26 : vector<1x128xf32> to vector<16x128xf32>
    %29 = arith.addf %27, %28 : vector<16x128xf32>
    %cst_20 = arith.constant 0.000000e+00 : f32
    %30 = vector.broadcast %cst_20 : f32 to vector<16x128xf32>
    %31 = arith.maximumf %29, %30 : vector<16x128xf32>
    %32 = arith.truncf %31 : vector<16x128xf32> to vector<16x128xbf16>
    %c0_21 = arith.constant 0 : index
    %c0_22 = arith.constant 0 : index
    %33 = vector.load %arg6[%c0_21, %c0_22] : memref<128x128xbf16, #tpu.memory_space<vmem>>, vector<128x128xbf16>
    %c0_23 = arith.constant 0 : index
    %c1024 = arith.constant 1024 : index
    %34 = vector.load %arg11[%c0_23, %c1024] : memref<1x2944xf32, #tpu.memory_space<vmem>>, vector<1x128xf32>
    %cst_24 = arith.constant dense<0.000000e+00> : vector<16x128xf32>
    %35 = tpu.matmul %32, %33, %cst_24 {dimension_numbers = #tpu.dot_dimension_numbers<[1], [0], [0], [1], [0, 0, 1, 1], [], []>} : vector<16x128xbf16>, vector<128x128xbf16>, vector<16x128xf32> -> vector<16x128xf32>
    %36 = vector.broadcast %34 : vector<1x128xf32> to vector<16x128xf32>
    %37 = arith.addf %35, %36 : vector<16x128xf32>
    %cst_25 = arith.constant 0.000000e+00 : f32
    %38 = vector.broadcast %cst_25 : f32 to vector<16x128xf32>
    %39 = arith.maximumf %37, %38 : vector<16x128xf32>
    %40 = arith.truncf %39 : vector<16x128xf32> to vector<16x128xbf16>
    %c0_26 = arith.constant 0 : index
    %c0_27 = arith.constant 0 : index
    %41 = vector.load %arg7[%c0_26, %c0_27] : memref<128x128xbf16, #tpu.memory_space<vmem>>, vector<128x128xbf16>
    %c0_28 = arith.constant 0 : index
    %c1152 = arith.constant 1152 : index
    %42 = vector.load %arg11[%c0_28, %c1152] : memref<1x2944xf32, #tpu.memory_space<vmem>>, vector<1x128xf32>
    %cst_29 = arith.constant dense<0.000000e+00> : vector<16x128xf32>
    %43 = tpu.matmul %40, %41, %cst_29 {dimension_numbers = #tpu.dot_dimension_numbers<[1], [0], [0], [1], [0, 0, 1, 1], [], []>} : vector<16x128xbf16>, vector<128x128xbf16>, vector<16x128xf32> -> vector<16x128xf32>
    %44 = vector.broadcast %42 : vector<1x128xf32> to vector<16x128xf32>
    %45 = arith.addf %43, %44 : vector<16x128xf32>
    %cst_30 = arith.constant 0.000000e+00 : f32
    %46 = vector.broadcast %cst_30 : f32 to vector<16x128xf32>
    %47 = arith.maximumf %45, %46 : vector<16x128xf32>
    %48 = arith.truncf %47 : vector<16x128xf32> to vector<16x128xbf16>
    %c0_31 = arith.constant 0 : index
    %c0_32 = arith.constant 0 : index
    %49 = vector.load %arg8[%c0_31, %c0_32] : memref<128x256xbf16, #tpu.memory_space<vmem>>, vector<128x256xbf16>
    %c0_33 = arith.constant 0 : index
    %c1280 = arith.constant 1280 : index
    %50 = vector.load %arg11[%c0_33, %c1280] : memref<1x2944xf32, #tpu.memory_space<vmem>>, vector<1x256xf32>
    %cst_34 = arith.constant dense<0.000000e+00> : vector<16x256xf32>
    %51 = tpu.matmul %48, %49, %cst_34 {dimension_numbers = #tpu.dot_dimension_numbers<[1], [0], [0], [1], [0, 0, 1, 1], [], []>} : vector<16x128xbf16>, vector<128x256xbf16>, vector<16x256xf32> -> vector<16x256xf32>
    %52 = vector.broadcast %50 : vector<1x256xf32> to vector<16x256xf32>
    %53 = arith.addf %51, %52 : vector<16x256xf32>
    %cst_35 = arith.constant 0.000000e+00 : f32
    %54 = vector.broadcast %cst_35 : f32 to vector<16x256xf32>
    %55 = arith.maximumf %53, %54 : vector<16x256xf32>
    %56 = arith.truncf %55 : vector<16x256xf32> to vector<16x256xbf16>
    %c0_36 = arith.constant 0 : index
    %c0_37 = arith.constant 0 : index
    %57 = vector.load %arg9[%c0_36, %c0_37] : memref<256x512xbf16, #tpu.memory_space<vmem>>, vector<256x512xbf16>
    %c0_38 = arith.constant 0 : index
    %c1536 = arith.constant 1536 : index
    %58 = vector.load %arg11[%c0_38, %c1536] : memref<1x2944xf32, #tpu.memory_space<vmem>>, vector<1x512xf32>
    %cst_39 = arith.constant dense<0.000000e+00> : vector<16x512xf32>
    %59 = tpu.matmul %56, %57, %cst_39 {dimension_numbers = #tpu.dot_dimension_numbers<[1], [0], [0], [1], [0, 0, 1, 1], [], []>} : vector<16x256xbf16>, vector<256x512xbf16>, vector<16x512xf32> -> vector<16x512xf32>
    %60 = vector.broadcast %58 : vector<1x512xf32> to vector<16x512xf32>
    %61 = arith.addf %59, %60 : vector<16x512xf32>
    %cst_40 = arith.constant 0.000000e+00 : f32
    %62 = vector.broadcast %cst_40 : f32 to vector<16x512xf32>
    %63 = arith.maximumf %61, %62 : vector<16x512xf32>
    %64 = arith.truncf %63 : vector<16x512xf32> to vector<16x512xbf16>
    %c0_41 = arith.constant 0 : index
    %c0_42 = arith.constant 0 : index
    %65 = vector.load %arg10[%c0_41, %c0_42] : memref<512x896xbf16, #tpu.memory_space<vmem>>, vector<512x896xbf16>
    %c0_43 = arith.constant 0 : index
    %c2048 = arith.constant 2048 : index
    %66 = vector.load %arg11[%c0_43, %c2048] : memref<1x2944xf32, #tpu.memory_space<vmem>>, vector<1x896xf32>
    %cst_44 = arith.constant dense<0.000000e+00> : vector<16x896xf32>
    %67 = tpu.matmul %64, %65, %cst_44 {dimension_numbers = #tpu.dot_dimension_numbers<[1], [0], [0], [1], [0, 0, 1, 1], [], []>} : vector<16x512xbf16>, vector<512x896xbf16>, vector<16x896xf32> -> vector<16x896xf32>
    %68 = vector.broadcast %66 : vector<1x896xf32> to vector<16x896xf32>
    %69 = arith.addf %67, %68 : vector<16x896xf32>
    %cst_45 = arith.constant 0.000000e+00 : f32
    %70 = vector.broadcast %cst_45 : f32 to vector<16x896xf32>
    %71 = arith.subf %70, %69 : vector<16x896xf32>
    %72 = math.exp %71 : vector<16x896xf32>
    %cst_46 = arith.constant 1.000000e+00 : f32
    %73 = vector.broadcast %cst_46 : f32 to vector<16x896xf32>
    %74 = arith.addf %73, %72 : vector<16x896xf32>
    %75 = tpu.reciprocal %74 {approx = true} : vector<16x896xf32> -> vector<16x896xf32>
    %c0_47 = arith.constant 0 : index
    %c0_48 = arith.constant 0 : index
    %76 = vector.load %arg12[%c0_47, %c0_48] : memref<16x896xf32, #tpu.memory_space<vmem>>, vector<16x896xf32>
    tpu.vector_store %arg12[%c0_47, %c0_48], %75 {strides = array<i32>} : memref<16x896xf32, #tpu.memory_space<vmem>>, vector<16x896xf32>,
    return
  }
  func.func @transform_0(%arg0: i32) -> (i32, i32) {
    %c0_i32 = arith.constant 0 : i32
    %c0_i32_0 = arith.constant 0 : i32
    return %arg0, %c0_i32 : i32, i32
  }
  func.func @transform_1(%arg0: i32) -> (i32, i32) {
    %c0_i32 = arith.constant 0 : i32
    %c0_i32_0 = arith.constant 0 : i32
    %c0_i32_1 = arith.constant 0 : i32
    return %c0_i32, %c0_i32_0 : i32, i32
  }
  func.func @transform_2(%arg0: i32) -> (i32, i32) {
    %c0_i32 = arith.constant 0 : i32
    %c0_i32_0 = arith.constant 0 : i32
    %c0_i32_1 = arith.constant 0 : i32
    return %c0_i32, %c0_i32_0 : i32, i32
  }
  func.func @transform_3(%arg0: i32) -> (i32, i32) {
    %c0_i32 = arith.constant 0 : i32
    %c0_i32_0 = arith.constant 0 : i32
    %c0_i32_1 = arith.constant 0 : i32
    return %c0_i32, %c0_i32_0 : i32, i32
  }
  func.func @transform_4(%arg0: i32) -> (i32, i32) {
    %c0_i32 = arith.constant 0 : i32
    %c0_i32_0 = arith.constant 0 : i32
    %c0_i32_1 = arith.constant 0 : i32
    return %c0_i32, %c0_i32_0 : i32, i32
  }
  func.func @transform_5(%arg0: i32) -> (i32, i32) {
    %c0_i32 = arith.constant 0 : i32
    %c0_i32_0 = arith.constant 0 : i32
    %c0_i32_1 = arith.constant 0 : i32
    return %c0_i32, %c0_i32_0 : i32, i32
  }
  func.func @transform_6(%arg0: i32) -> (i32, i32) {
    %c0_i32 = arith.constant 0 : i32
    %c0_i32_0 = arith.constant 0 : i32
    %c0_i32_1 = arith.constant 0 : i32
    return %c0_i32, %c0_i32_0 : i32, i32
  }
  func.func @transform_7(%arg0: i32) -> (i32, i32) {
    %c0_i32 = arith.constant 0 : i32
    %c0_i32_0 = arith.constant 0 : i32
    %c0_i32_1 = arith.constant 0 : i32
    return %c0_i32, %c0_i32_0 : i32, i32
  }
  func.func @transform_8(%arg0: i32) -> (i32, i32) {
    %c0_i32 = arith.constant 0 : i32
    %c0_i32_0 = arith.constant 0 : i32
    %c0_i32_1 = arith.constant 0 : i32
    return %c0_i32, %c0_i32_0 : i32, i32
  }
  func.func @transform_9(%arg0: i32) -> (i32, i32) {
    %c0_i32 = arith.constant 0 : i32
    %c0_i32_0 = arith.constant 0 : i32
    %c0_i32_1 = arith.constant 0 : i32
    return %c0_i32, %c0_i32_0 : i32, i32
  }
  func.func @transform_10(%arg0: i32) -> (i32, i32) {
    %c0_i32 = arith.constant 0 : i32
    %c0_i32_0 = arith.constant 0 : i32
    %c0_i32_1 = arith.constant 0 : i32
    return %c0_i32, %c0_i32_0 : i32, i32
  }
  func.func @transform_11(%arg0: i32) -> (i32, i32) {
    %c0_i32 = arith.constant 0 : i32
    %c0_i32_0 = arith.constant 0 : i32
    return %arg0, %c0_i32 : i32, i32
  }
}

</mosaic_0001>

<bundles_post_ra>
// kernel: tpu_custom_call.1
= control target key start
LH: loop header
LB: loop body
LE: loop exit
PB: predicated region body
PF: predicated region fallthrough
CT: control target
= control target key end

     0   :  { %16 = vsyncpa [#allocation3], 0  ;;  %s7836_s0 = inlined_call_operand.hbm [shape: bf16[16,896], index: 0, kind: input, shape index: {}]   ;;  %s7837_s1 = inlined_call_operand.hbm [shape: bf16[896,512], index: 1, kind: input, shape index: {}]   ;;  %s7838_s2 = inlined_call_operand.hbm [shape: bf16[512,256], index: 2, kind: input, shape index: {}]   ;;  %s7839_s3 = inlined_call_operand.hbm [shape: bf16[256,128], index: 3, kind: input, shape index: {}]   ;;  %s7840_s4 = inlined_call_operand.hbm [shape: bf16[128,128], index: 4, kind: input, shape index: {}]   ;;  %s7841_s5 = inlined_call_operand.hbm [shape: bf16[128,128], index: 5, kind: input, shape index: {}]   ;;  %s7842_s6 = inlined_call_operand.hbm [shape: bf16[128,128], index: 6, kind: input, shape index: {}]   ;;  %s7843_s7 = inlined_call_operand.hbm [shape: bf16[128,256], index: 7, kind: input, shape index: {}]   ;;  %s7844_s8 = inlined_call_operand.hbm [shape: bf16[256,512], index: 8, kind: input, shape index: {}]   ;;  %s7845_s9 = inlined_call_operand.hbm [shape: bf16[512,896], index: 9, kind: input, shape index: {}]   ;;  %s7846_s10 = inlined_call_operand.hbm [shape: f32[1,2944], index: 10, kind: input, shape index: {}]   ;;  %s7847_s11 = inlined_call_operand.hbm [shape: f32[16,896], index: 11, kind: output, shape index: {}]  }
   0x1   :  { %17 = vsyncpa [#allocation6], 0 }
   0x2   :  { %18 = vsyncpa [#allocation9], 0 }
   0x3   :  { %19 = vsyncpa [#allocation12], 0 }
   0x4   :  { %20 = vsyncpa [#allocation15], 0 }
   0x5   :  { %21 = vsyncpa [#allocation18], 0 }
   0x6   :  { %22 = vsyncpa [#allocation4], 0  ;;  %s7572_s17 = smov [#allocation5]  }
   0x7   :  { %s40_s18 = sshll.u32 %s7572_s17, 4  ;;  %s41_s18 = int_to_ptr.vmem [resolvable:$true] %s40_s18 }
   0x8   :  { %s7326_s19 = scalar_lea.vmem %s41_s18, 28672  ;;  %p7331_p1 = scmp.lt.s32.totalorder %s41_s18, %s41_s18 }
   0x9   :  { %p7327_p0 = scmp.ne.s32.totalorder %s41_s18, %s7326_s19  ;;  %p7332_p2 = scmp.lt.s32.totalorder %s7326_s19, %s7326_s19 }
   0xb   :  { %p7333_p3 = por %p7332_p2, %p7331_p1 }
   0xd   :  { %p7334_p4 = pnand %p7333_p3, %p7327_p0 }
   0xf   :  { %7337 = shalt.err (!%p7334_p4)
}
  0x10   :  { %s7573_s20 = smov 256   ;;  %s7574_s21 = smov 16  }
  0x11   :  { %46 = dma.hbm_to_vmem [thread:$0]  %s7837_s1, 28672, %s41_s18, [#allocation6], %s7573_s20, %s7573_s20, %s7574_s21  }
  0x12   :  { %s7575_s24 = smov [#allocation8]  }
  0x13   :  { %s64_s25 = sshll.u32 %s7575_s24, 4  ;;  %s65_s25 = int_to_ptr.vmem [resolvable:$true] %s64_s25 }
  0x14   :  { %s7346_s26 = scalar_lea.vmem %s65_s25, 2048  ;;  %p7351_p6 = scmp.lt.s32.totalorder %s65_s25, %s65_s25 }
  0x15   :  { %p7347_p5 = scmp.ne.s32.totalorder %s65_s25, %s7346_s26  ;;  %p7352_p7 = scmp.lt.s32.totalorder %s7346_s26, %s7346_s26 }
  0x17   :  { %p7353_p8 = por %p7352_p7, %p7351_p6 }
  0x19   :  { %p7354_p9 = pnand %p7353_p8, %p7347_p5 }
  0x1b   :  { %7357 = shalt.err (!%p7354_p9)
}
  0x1c   :  { %s7576_s27 = smov 64   ;;  %s7577_s28 = smov 4  }
  0x1d   :  { %70 = dma.hbm_to_vmem [thread:$0]  %s7839_s3, 2048, %s65_s25, [#allocation9], %s7576_s27, %s7576_s27, %s7577_s28  }
  0x1e   :  { %s7578_s1 = smov [#allocation11]  }
  0x1f   :  { %s88_s12 = sshll.u32 %s7578_s1, 4  ;;  %s89_s12 = int_to_ptr.vmem [resolvable:$true] %s88_s12 }
  0x20   :  { %s7366_s13 = scalar_lea.vmem %s89_s12, 1024  ;;  %p7371_p11 = scmp.lt.s32.totalorder %s89_s12, %s89_s12 }
  0x21   :  { %p7367_p10 = scmp.ne.s32.totalorder %s89_s12, %s7366_s13  ;;  %p7372_p12 = scmp.lt.s32.totalorder %s7366_s13, %s7366_s13 }
  0x23   :  { %p7373_p13 = por %p7372_p12, %p7371_p11 }
  0x25   :  { %p7374_p0 = pnand %p7373_p13, %p7367_p10 }
  0x27   :  { %7377 = shalt.err (!%p7374_p0)
}
  0x28   :  { %94 = dma.hbm_to_vmem [thread:$0]  %s7841_s5, 1024, %s89_s12, [#allocation12], %s7576_s27, %s7576_s27, %s7577_s28  }
  0x29   :  { %s7579_s16 = smov [#allocation14]  }
  0x2a   :  { %s112_s17 = sshll.u32 %s7579_s16, 4  ;;  %s113_s17 = int_to_ptr.vmem [resolvable:$true] %s112_s17 }
  0x2b   :  { %s7386_s3 = scalar_lea.vmem %s113_s17, 2048  ;;  %p7391_p2 = scmp.lt.s32.totalorder %s113_s17, %s113_s17 }
  0x2c   :  { %p7387_p1 = scmp.ne.s32.totalorder %s113_s17, %s7386_s3  ;;  %p7392_p3 = scmp.lt.s32.totalorder %s7386_s3, %s7386_s3 }
  0x2e   :  { %p7393_p4 = por %p7392_p3, %p7391_p2 }
  0x30   :  { %p7394_p5 = pnand %p7393_p4, %p7387_p1 }
  0x32   :  { %7397 = shalt.err (!%p7394_p5)
}
  0x33   :  { %s7580_s18 = smov 128   ;;  %s7581_s19 = smov 8  }
  0x34   :  { %118 = dma.hbm_to_vmem [thread:$0]  %s7843_s7, 2048, %s113_s17, [#allocation15], %s7580_s18, %s7580_s18, %s7581_s19  }
  0x35   :  { %s7582_s5 = smov [#allocation17]   ;;  %s7583_s25 = smov [#allocation2]  }
  0x36   :  { %s136_s24 = sshll.u32 %s7582_s5, 4  ;;  %s28_s26 = sshll.u32 %s7583_s25, 4  ;;  %s137_s24 = int_to_ptr.vmem [resolvable:$true] %s136_s24  ;;  %s29_s26 = int_to_ptr.vmem [resolvable:$true] %s28_s26 }
  0x37   :  { %s7406_s29 = scalar_lea.vmem %s137_s24, 28672  ;;  %p7411_p7 = scmp.lt.s32.totalorder %s137_s24, %s137_s24 }
  0x38   :  { %p7407_p6 = scmp.ne.s32.totalorder %s137_s24, %s7406_s29  ;;  %p7412_p8 = scmp.lt.s32.totalorder %s7406_s29, %s7406_s29 }
  0x3a   :  { %p7413_p9 = por %p7412_p8, %p7411_p7 }
  0x3c   :  { %p7414_p10 = pnand %p7413_p9, %p7407_p6 }
  0x3e   :  { %7417 = shalt.err (!%p7414_p10)
}
  0x3f   :  { %s7584_s30 = smov 448   ;;  %s7585_s1 = smov 28  }
  0x40   :  { %142 = dma.hbm_to_vmem [thread:$0]  %s7845_s9, 28672, %s137_s24, [#allocation18], %s7584_s30, %s7584_s30, %s7585_s1  }
  0x41   :  { %s7426_s7 = scalar_lea.vmem %s29_s26, 896  ;;  %p7431_p12 = scmp.lt.s32.totalorder %s29_s26, %s29_s26 }
  0x42   :  { %p7427_p11 = scmp.ne.s32.totalorder %s29_s26, %s7426_s7  ;;  %p7432_p13 = scmp.lt.s32.totalorder %s7426_s7, %s7426_s7 }
  0x44   :  { %p7433_p0 = por %p7432_p13, %p7431_p12 }
  0x46   :  { %p7434_p1 = pnand %p7433_p0, %p7427_p11 }
  0x48   :  { %7437 = shalt.err (!%p7434_p1)
}
  0x49   :  { %34 = dma.hbm_to_vmem [thread:$0]  %s7836_s0, 896, %s29_s26, [#allocation3], %s7584_s30, %s7584_s30, %s7585_s1  }
  0x4a   :  { %s7586_s16 = smov [#allocation7]   ;;  %s7587_s3 = smov [#allocation10]  }
  0x4b   :  { %s52_s17 = sshll.u32 %s7586_s16, 4  ;;  %s76_s22 = sshll.u32 %s7587_s3, 4  ;;  %s53_s17 = int_to_ptr.vmem [resolvable:$true] %s52_s17  ;;  %s77_s22 = int_to_ptr.vmem [resolvable:$true] %s76_s22 }
  0x4c   :  { %s7446_s23 = scalar_lea.vmem %s53_s17, 8192  ;;  %p7451_p3 = scmp.lt.s32.totalorder %s53_s17, %s53_s17 }
  0x4d   :  { %p7447_p2 = scmp.ne.s32.totalorder %s53_s17, %s7446_s23  ;;  %p7452_p4 = scmp.lt.s32.totalorder %s7446_s23, %s7446_s23 }
  0x4f   :  { %p7453_p5 = por %p7452_p4, %p7451_p3 }
  0x51   :  { %p7454_p6 = pnand %p7453_p5, %p7447_p2 }
  0x53   :  { %7457 = shalt.err (!%p7454_p6)
}
  0x54   :  { %58 = dma.hbm_to_vmem [thread:$0]  %s7838_s2, 8192, %s53_s17, [#allocation6], %s7580_s18, %s7580_s18, %s7581_s19  }
  0x55   :  { %s7466_s0 = scalar_lea.vmem %s77_s22, 1024  ;;  %p7471_p8 = scmp.lt.s32.totalorder %s77_s22, %s77_s22 }
  0x56   :  { %p7467_p7 = scmp.ne.s32.totalorder %s77_s22, %s7466_s0  ;;  %p7472_p9 = scmp.lt.s32.totalorder %s7466_s0, %s7466_s0 }
  0x58   :  { %p7473_p10 = por %p7472_p9, %p7471_p8 }
  0x5a   :  { %p7474_p11 = pnand %p7473_p10, %p7467_p7 }
  0x5c   :  { %7477 = shalt.err (!%p7474_p11)
}
  0x5d   :  { %82 = dma.hbm_to_vmem [thread:$0]  %s7840_s4, 1024, %s77_s22, [#allocation9], %s7576_s27, %s7576_s27, %s7577_s28  }
  0x5e   :  { %s7588_s26 = smov [#allocation13]   ;;  %s7589_s30 = smov [#allocation16]  }
  0x5f   :  { %s100_s29 = sshll.u32 %s7588_s26, 4  ;;  %s124_s1 = sshll.u32 %s7589_s30, 4  ;;  %s101_s29 = int_to_ptr.vmem [resolvable:$true] %s100_s29  ;;  %s125_s1 = int_to_ptr.vmem [resolvable:$true] %s124_s1 }
  0x60   :  { %s7486_s2 = scalar_lea.vmem %s101_s29, 1024  ;;  %p7491_p13 = scmp.lt.s32.totalorder %s101_s29, %s101_s29 }
  0x61   :  { %p7487_p12 = scmp.ne.s32.totalorder %s101_s29, %s7486_s2  ;;  %p7492_p0 = scmp.lt.s32.totalorder %s7486_s2, %s7486_s2 }
  0x63   :  { %p7493_p1 = por %p7492_p0, %p7491_p13 }
  0x65   :  { %p7494_p2 = pnand %p7493_p1, %p7487_p12 }
  0x67   :  { %7497 = shalt.err (!%p7494_p2)
}
  0x68   :  { %106 = dma.hbm_to_vmem [thread:$0]  %s7842_s6, 1024, %s101_s29, [#allocation12], %s7576_s27, %s7576_s27, %s7577_s28  }
  0x69   :  { %s7506_s4 = scalar_lea.vmem %s125_s1, 8192  ;;  %p7511_p4 = scmp.lt.s32.totalorder %s125_s1, %s125_s1 }
  0x6a   :  { %p7507_p3 = scmp.ne.s32.totalorder %s125_s1, %s7506_s4  ;;  %p7512_p5 = scmp.lt.s32.totalorder %s7506_s4, %s7506_s4 }
  0x6c   :  { %p7513_p6 = por %p7512_p5, %p7511_p4 }
  0x6e   :  { %p7514_p7 = pnand %p7513_p6, %p7507_p3 }
  0x70   :  { %7517 = shalt.err (!%p7514_p7)
}
  0x71   :  { %130 = dma.hbm_to_vmem [thread:$0]  %s7844_s8, 8192, %s125_s1, [#allocation15], %s7573_s20, %s7573_s20, %s7574_s21  }
  0x72   :  { %s7590_s7 = smov [#allocation19]  }
  0x73   :  { %s149_s14 = sshll.u32 %s7590_s7, 4  ;;  %s150_s14 = int_to_ptr.vmem [resolvable:$true] %s149_s14 }
  0x74   :  { %s7526_s15 = scalar_lea.vmem %s150_s14, 368  ;;  %s7530_s6 = scalar_lea.vmem %s150_s14, 384 }
  0x75   :  { %p7527_p8 = scmp.ne.s32.totalorder %s150_s14, %s7526_s15  ;;  %p7531_p9 = scmp.lt.s32.totalorder %s150_s14, %s150_s14 }
  0x76   :  { %p7532_p10 = scmp.lt.s32.totalorder %s7530_s6, %s7526_s15 }
  0x78   :  { %p7533_p11 = por %p7532_p10, %p7531_p9 }
  0x7a   :  { %p7534_p12 = pnand %p7533_p11, %p7527_p8 }
  0x7c   :  { %7537 = shalt.err (!%p7534_p12)
}
  0x7d   :  { %152 = dma.hbm_to_vmem [thread:$0]  %s7846_s10, 368, %s150_s14, [#allocation18]  }
  0x7e   :  { %7558 = dma.done.wait [#allocation3], 896  }
  0x7f   :  { %7559 = vsyncadd [#allocation3], 4294966400 }
  0x80   :  { %7560 = dma.done.wait [#allocation6], 36864  }
  0x81   :  { %7561 = vsyncadd [#allocation6], 4294930432 }
  0x82   :  { %7562 = dma.done.wait [#allocation9], 3072  }
  0x83   :  { %7563 = vsyncadd [#allocation9], 4294964224 }
  0x84   :  { %7564 = dma.done.wait [#allocation12], 2048  }
  0x85   :  { %7565 = vsyncadd [#allocation12], 4294965248 }
  0x86   :  { %7566 = dma.done.wait [#allocation15], 10240  }
  0x87   :  { %7567 = vsyncadd [#allocation15], 4294957056 }
  0x88   :  { %7568 = dma.done.wait [#allocation18], 29040  }
  0x89   :  { %7569 = vsyncadd [#allocation18], 4294938256  ;;  %v6338_v0 = vld [vmem:[#allocation5 + $0xe4] ss:$16 sps:$4 sm:$0xff]   ;;  %v6342_v2 = vld [vmem:[#allocation5 + $0xe0] ss:$16 sps:$4 sm:$0xff]  }
  0x8a   :  { %v6340_v1 = vld [vmem:[#allocation5 + $0x2e4] ss:$16 sps:$4 sm:$0xff]   ;;  %1597 = vmatprep.subr.bf16.mxu0 %v6338_v0  ;;  %v6343_v3 = vld [vmem:[#allocation5 + $0x2e0] ss:$16 sps:$4 sm:$0xff]   ;;  %v7714_v49 = vld [vmem:[#allocation2 + $0x4] ss:$28 sps:$4 sm:$0xff]  }
  0x8b   :  { %1640 = vmatprep.subr.bf16.mxu1 %v6340_v1  ;;  %v6344_v4 = vld [vmem:[#allocation5 + $0xc4] ss:$16 sps:$4 sm:$0xff]   ;;  %1598 = vmatpush1.bf16.msra.mxu0 %v6342_v2  ;;  %v6348_v6 = vld [vmem:[#allocation5 + $0xc0] ss:$16 sps:$4 sm:$0xff]   ;;  %vm7593_vm0 = vmmov 0   ;;  %s7594_s8 = smov [#allocation20]  }
  0x8c   :  { %1641 = vmatpush1.bf16.msra.mxu1 %v6343_v3  ;;  %v6346_v5 = vld [vmem:[#allocation5 + $0x2c4] ss:$16 sps:$4 sm:$0xff]   ;;  %1599 = vmatprep.subr.bf16.mxu0 %v6344_v4  ;;  %v6349_v7 = vld [vmem:[#allocation5 + $0x2c0] ss:$16 sps:$4 sm:$0xff]   ;;  %s5500_s10 = sshll.u32 %s7594_s8, 4  ;;  %s5501_s10 = int_to_ptr.vmem [resolvable:$true] %s5500_s10 }
  0x8d   :  { %1642 = vmatprep.subr.bf16.mxu1 %v6346_v5  ;;  %v6350_v8 = vld [vmem:[#allocation5 + $0xa4] ss:$16 sps:$4 sm:$0xff]   ;;  %v6354_v10 = vld [vmem:[#allocation5 + $0xa0] ss:$16 sps:$4 sm:$0xff]   ;;  %1629 = vmatprep.mubr.bf16.mxu0 %v7714_v49  ;;  %s7538_s20 = scalar_lea.vmem %s5501_s10, 1792  ;;  %p7543_p0 = scmp.lt.s32.totalorder %s5501_s10, %s5501_s10 }
  0x8e   :  { %v6352_v9 = vld [vmem:[#allocation5 + $0x2a4] ss:$16 sps:$4 sm:$0xff]   ;;  %v6355_v11 = vld [vmem:[#allocation5 + $0x2a0] ss:$16 sps:$4 sm:$0xff]   ;;  %p7539_p13 = scmp.ne.s32.totalorder %s5501_s10, %s7538_s20  ;;  %p7544_p1 = scmp.lt.s32.totalorder %s7538_s20, %s7538_s20 }
  0x8f   :  { %1600 = vmatpush1.bf16.msra.mxu0 %v6348_v6  ;;  %v6356_v12 = vld [vmem:[#allocation5 + $0x84] ss:$16 sps:$4 sm:$0xff]   ;;  %v6360_v14 = vld [vmem:[#allocation5 + $0x80] ss:$16 sps:$4 sm:$0xff]  }
  0x90   :  { %1643 = vmatpush1.bf16.msra.mxu1 %v6349_v7  ;;  %1601 = vmatprep.subr.bf16.mxu0 %v6350_v8  ;;  %v6358_v13 = vld [vmem:[#allocation5 + $0x284] ss:$16 sps:$4 sm:$0xff]   ;;  %v6361_v15 = vld [vmem:[#allocation5 + $0x280] ss:$16 sps:$4 sm:$0xff]   ;;  %p7545_p2 = por %p7544_p1, %p7543_p0 }
  0x91   :  { %1644 = vmatprep.subr.bf16.mxu1 %v6352_v9  ;;  %v6362_v16 = vld [vmem:[#allocation5 + $0x64] ss:$16 sps:$4 sm:$0xff]   ;;  %v6366_v18 = vld [vmem:[#allocation5 + $0x60] ss:$16 sps:$4 sm:$0xff]  }
  0x92   :  { %v6364_v17 = vld [vmem:[#allocation5 + $0x264] ss:$16 sps:$4 sm:$0xff]   ;;  %v6367_v19 = vld [vmem:[#allocation5 + $0x260] ss:$16 sps:$4 sm:$0xff]   ;;  %p7546_p3 = pnand %p7545_p2, %p7539_p13 }
  0x93   :  { %1602 = vmatpush1.bf16.msra.mxu0 %v6354_v10  ;;  %v6368_v20 = vld [vmem:[#allocation5 + $0x44] ss:$16 sps:$4 sm:$0xff]   ;;  %v6372_v22 = vld [vmem:[#allocation5 + $0x40] ss:$16 sps:$4 sm:$0xff]  }
  0x94   :  { %1645 = vmatpush1.bf16.msra.mxu1 %v6355_v11  ;;  %1603 = vmatprep.subr.bf16.mxu0 %v6356_v12  ;;  %v6370_v21 = vld [vmem:[#allocation5 + $0x244] ss:$16 sps:$4 sm:$0xff]   ;;  %v6373_v23 = vld [vmem:[#allocation5 + $0x240] ss:$16 sps:$4 sm:$0xff]  }
  0x95   :  { %1646 = vmatprep.subr.bf16.mxu1 %v6358_v13  ;;  %v6374_v24 = vld [vmem:[#allocation5 + $0x24] ss:$16 sps:$4 sm:$0xff]   ;;  %v6378_v26 = vld [vmem:[#allocation5 + $0x20] ss:$16 sps:$4 sm:$0xff]  }
  0x96   :  { %v6376_v25 = vld [vmem:[#allocation5 + $0x224] ss:$16 sps:$4 sm:$0xff]   ;;  %v6379_v27 = vld [vmem:[#allocation5 + $0x220] ss:$16 sps:$4 sm:$0xff]  }
  0x97   :  { %1604 = vmatpush1.bf16.msra.mxu0 %v6360_v14  ;;  %v6380_v28 = vld [vmem:[#allocation5 + $0x4] ss:$16 sps:$4 sm:$0xff]   ;;  %v6384_v30 = vld [vmem:[#allocation5] ss:$16 sps:$4 sm:$0xff]   ;;  %v7591_v14 = vmov 0  }
  0x98   :  { %1647 = vmatpush1.bf16.msra.mxu1 %v6361_v15  ;;  %1605 = vmatprep.subr.bf16.mxu0 %v6362_v16  ;;  %v6382_v29 = vld [vmem:[#allocation5 + $0x204] ss:$16 sps:$4 sm:$0xff]   ;;  %v6385_v31 = vld [vmem:[#allocation5 + $0x200] ss:$16 sps:$4 sm:$0xff]  }
  0x99   :  { %1648 = vmatprep.subr.bf16.mxu1 %v6364_v17  ;;  %v6386_v32 = vld [vmem:[#allocation5 + $0x1e4] ss:$16 sps:$4 sm:$0xff]   ;;  %v6390_v34 = vld [vmem:[#allocation5 + $0x1e0] ss:$16 sps:$4 sm:$0xff]  }
  0x9a   :  { %v6388_v33 = vld [vmem:[#allocation5 + $0x3e4] ss:$16 sps:$4 sm:$0xff]   ;;  %v6391_v35 = vld [vmem:[#allocation5 + $0x3e0] ss:$16 sps:$4 sm:$0xff]  }
  0x9b   :  { %1606 = vmatpush1.bf16.msra.mxu0 %v6366_v18  ;;  %v6392_v36 = vld [vmem:[#allocation5 + $0x1c4] ss:$16 sps:$4 sm:$0xff]   ;;  %v6396_v38 = vld [vmem:[#allocation5 + $0x1c0] ss:$16 sps:$4 sm:$0xff]  }
  0x9c   :  { %1649 = vmatpush1.bf16.msra.mxu1 %v6367_v19  ;;  %1607 = vmatprep.subr.bf16.mxu0 %v6368_v20  ;;  %v6394_v37 = vld [vmem:[#allocation5 + $0x3c4] ss:$16 sps:$4 sm:$0xff]   ;;  %v6397_v39 = vld [vmem:[#allocation5 + $0x3c0] ss:$16 sps:$4 sm:$0xff]  }
  0x9d   :  { %1650 = vmatprep.subr.bf16.mxu1 %v6370_v21  ;;  %v6398_v40 = vld [vmem:[#allocation5 + $0x1a4] ss:$16 sps:$4 sm:$0xff]   ;;  %v6402_v42 = vld [vmem:[#allocation5 + $0x1a0] ss:$16 sps:$4 sm:$0xff]  }
  0x9e   :  { %v6400_v41 = vld [vmem:[#allocation5 + $0x3a4] ss:$16 sps:$4 sm:$0xff]   ;;  %v6403_v43 = vld [vmem:[#allocation5 + $0x3a0] ss:$16 sps:$4 sm:$0xff]  }
  0x9f   :  { %1608 = vmatpush1.bf16.msra.mxu0 %v6372_v22  ;;  %v6404_v44 = vld [vmem:[#allocation5 + $0x184] ss:$16 sps:$4 sm:$0xff]   ;;  %v6408_v46 = vld [vmem:[#allocation5 + $0x180] ss:$16 sps:$4 sm:$0xff]  }
  0xa0   :  { %1651 = vmatpush1.bf16.msra.mxu1 %v6373_v23  ;;  %1609 = vmatprep.subr.bf16.mxu0 %v6374_v24  ;;  %v6406_v45 = vld [vmem:[#allocation5 + $0x384] ss:$16 sps:$4 sm:$0xff]   ;;  %v6409_v47 = vld [vmem:[#allocation5 + $0x380] ss:$16 sps:$4 sm:$0xff]  }
  0xa1   :  { %1652 = vmatprep.subr.bf16.mxu1 %v6376_v25  ;;  %v6410_v48 = vld [vmem:[#allocation5 + $0x164] ss:$16 sps:$4 sm:$0xff]   ;;  %v6414_v52 = vld [vmem:[#allocation5 + $0x160] ss:$16 sps:$4 sm:$0xff]  }
  0xa2   :  { %v6412_v50 = vld [vmem:[#allocation5 + $0x364] ss:$16 sps:$4 sm:$0xff]   ;;  %v6415_v53 = vld [vmem:[#allocation5 + $0x360] ss:$16 sps:$4 sm:$0xff]  }
  0xa3   :  { %1610 = vmatpush1.bf16.msra.mxu0 %v6378_v26  ;;  %v7716_v51 = vld [vmem:[#allocation2 + $0xc] ss:$28 sps:$4 sm:$0xff]   ;;  %v7720_v4 = vld [vmem:[#allocation2] ss:$28 sps:$4 sm:$0xff]  }
  0xa4   :  { %1653 = vmatpush1.bf16.msra.mxu1 %v6379_v27  ;;  %1611 = vmatprep.subr.bf16.mxu0 %v6380_v28  ;;  %v6416_v54 = vld [vmem:[#allocation5 + $0x144] ss:$16 sps:$4 sm:$0xff]   ;;  %v6420_v56 = vld [vmem:[#allocation5 + $0x140] ss:$16 sps:$4 sm:$0xff]  }
  0xa5   :  { %1654 = vmatprep.subr.bf16.mxu1 %v6382_v29  ;;  %1672 = vmatprep.mubr.bf16.mxu1 %v7716_v51  ;;  %v6418_v55 = vld [vmem:[#allocation5 + $0x344] ss:$16 sps:$4 sm:$0xff]   ;;  %v6421_v57 = vld [vmem:[#allocation5 + $0x340] ss:$16 sps:$4 sm:$0xff]  }
  0xa6   :  { %v6422_v58 = vld [vmem:[#allocation5 + $0x124] ss:$16 sps:$4 sm:$0xff]   ;;  %v6426_v60 = vld [vmem:[#allocation5 + $0x120] ss:$16 sps:$4 sm:$0xff]  }
  0xa7   :  { %1612 = vmatpush1.bf16.msra.mxu0 %v6384_v30  ;;  %v6424_v59 = vld [vmem:[#allocation5 + $0x324] ss:$16 sps:$4 sm:$0xff]   ;;  %v6427_v61 = vld [vmem:[#allocation5 + $0x320] ss:$16 sps:$4 sm:$0xff]  }
  0xa8   :  { %1655 = vmatpush1.bf16.msra.mxu1 %v6385_v31  ;;  %1613 = vmatprep.subr.bf16.mxu0 %v6386_v32  ;;  %v6428_v62 = vld [vmem:[#allocation5 + $0x104] ss:$16 sps:$4 sm:$0xff]   ;;  %v6432_v0 = vld [vmem:[#allocation5 + $0x100] ss:$16 sps:$4 sm:$0xff]  }
  0xa9   :  { %1656 = vmatprep.subr.bf16.mxu1 %v6388_v33  ;;  %v6430_v63 = vld [vmem:[#allocation5 + $0x304] ss:$16 sps:$4 sm:$0xff]   ;;  %v6433_v1 = vld [vmem:[#allocation5 + $0x300] ss:$16 sps:$4 sm:$0xff]  }
  0xaa   :  { %v6442_v2 = vld [vmem:[#allocation5 + $0x4e4] ss:$16 sps:$4 sm:$0xff]   ;;  %v6437_v5 = vld [vmem:[#allocation2 + $0x8] ss:$28 sps:$4 sm:$0xff]  }
  0xab   :  { %1614 = vmatpush2.bf16.msra.mxu0 %v6390_v34  ;;  %v6445_v3 = vld [vmem:[#allocation5 + $0x6e4] ss:$16 sps:$4 sm:$0xff]   ;;  %v6440_v6 = vld [vmem:[#allocation5 + $0x4e0] ss:$16 sps:$4 sm:$0xff]  }
  0xac   :  { %1657 = vmatpush2.bf16.msra.mxu1 %v6391_v35  ;;  %1615 = vmatprep.subr.bf16.mxu0 %v6392_v36  ;;  %v6443_v7 = vld [vmem:[#allocation5 + $0x6e0] ss:$16 sps:$4 sm:$0xff]   ;;  %v6448_v8 = vld [vmem:[#allocation5 + $0x4c4] ss:$16 sps:$4 sm:$0xff]   ;;  %v7724_v35 = vld [vmem:[#allocation2 + $0x14] ss:$28 sps:$4 sm:$0xff]  }
  0xad   :  { %1658 = vmatprep.subr.bf16.mxu1 %v6394_v37  ;;  %v6451_v9 = vld [vmem:[#allocation5 + $0x6c4] ss:$16 sps:$4 sm:$0xff]   ;;  %v6446_v10 = vld [vmem:[#allocation5 + $0x4c0] ss:$16 sps:$4 sm:$0xff]  }
  0xae   :  { %v6449_v11 = vld [vmem:[#allocation5 + $0x6c0] ss:$16 sps:$4 sm:$0xff]   ;;  %v6454_v12 = vld [vmem:[#allocation5 + $0x4a4] ss:$16 sps:$4 sm:$0xff]  }
  0xaf   :  { %1616 = vmatpush2.bf16.msra.mxu0 %v6396_v38  ;;  %v6457_v13 = vld [vmem:[#allocation5 + $0x6a4] ss:$16 sps:$4 sm:$0xff]   ;;  %v6452_v15 = vld [vmem:[#allocation5 + $0x4a0] ss:$16 sps:$4 sm:$0xff]  }
  0xb0   :  { %1659 = vmatpush2.bf16.msra.mxu1 %v6397_v39  ;;  %1617 = vmatprep.subr.bf16.mxu0 %v6398_v40  ;;  %v6455_v16 = vld [vmem:[#allocation5 + $0x6a0] ss:$16 sps:$4 sm:$0xff]   ;;  %v6460_v17 = vld [vmem:[#allocation5 + $0x484] ss:$16 sps:$4 sm:$0xff]   ;;  %v6494_v39 = vld [vmem:[#allocation5 + $0xec] ss:$16 sps:$4 sm:$0xff]  }
  0xb1   :  { %1660 = vmatprep.subr.bf16.mxu1 %v6400_v41  ;;  %v6463_v18 = vld [vmem:[#allocation5 + $0x684] ss:$16 sps:$4 sm:$0xff]   ;;  %v6458_v19 = vld [vmem:[#allocation5 + $0x480] ss:$16 sps:$4 sm:$0xff]  }
  0xb2   :  { %v6461_v20 = vld [vmem:[#allocation5 + $0x680] ss:$16 sps:$4 sm:$0xff]   ;;  %v6466_v21 = vld [vmem:[#allocation5 + $0x464] ss:$16 sps:$4 sm:$0xff]  }
  0xb3   :  { %1618 = vmatpush2.bf16.msra.mxu0 %v6402_v42  ;;  %v6469_v22 = vld [vmem:[#allocation5 + $0x664] ss:$16 sps:$4 sm:$0xff]   ;;  %v6464_v23 = vld [vmem:[#allocation5 + $0x460] ss:$16 sps:$4 sm:$0xff]   ;;  %v6492_v42 = vld [vmem:[#allocation5 + $0xe8] ss:$16 sps:$4 sm:$0xff]  }
  0xb4   :  { %1661 = vmatpush2.bf16.msra.mxu1 %v6403_v43  ;;  %1619 = vmatprep.subr.bf16.mxu0 %v6404_v44  ;;  %v6467_v24 = vld [vmem:[#allocation5 + $0x660] ss:$16 sps:$4 sm:$0xff]   ;;  %v6472_v25 = vld [vmem:[#allocation5 + $0x444] ss:$16 sps:$4 sm:$0xff]   ;;  %v6500_v44 = vld [vmem:[#allocation5 + $0xcc] ss:$16 sps:$4 sm:$0xff]  }
  0xb5   :  { %1662 = vmatprep.subr.bf16.mxu1 %v6406_v45  ;;  %v6475_v26 = vld [vmem:[#allocation5 + $0x644] ss:$16 sps:$4 sm:$0xff]   ;;  %v6470_v27 = vld [vmem:[#allocation5 + $0x440] ss:$16 sps:$4 sm:$0xff]  }
  0xb6   :  { %v6473_v28 = vld [vmem:[#allocation5 + $0x640] ss:$16 sps:$4 sm:$0xff]   ;;  %v6478_v29 = vld [vmem:[#allocation5 + $0x424] ss:$16 sps:$4 sm:$0xff]  }
  0xb7   :  { %1620 = vmatpush2.bf16.msra.mxu0 %v6408_v46  ;;  %v6481_v30 = vld [vmem:[#allocation5 + $0x624] ss:$16 sps:$4 sm:$0xff]   ;;  %v6476_v31 = vld [vmem:[#allocation5 + $0x420] ss:$16 sps:$4 sm:$0xff]   ;;  %v6498_v46 = vld [vmem:[#allocation5 + $0xc8] ss:$16 sps:$4 sm:$0xff]  }
  0xb8   :  { %1663 = vmatpush2.bf16.msra.mxu1 %v6409_v47  ;;  %1621 = vmatprep.subr.bf16.mxu0 %v6410_v48  ;;  %v6479_v32 = vld [vmem:[#allocation5 + $0x620] ss:$16 sps:$4 sm:$0xff]   ;;  %v6484_v33 = vld [vmem:[#allocation5 + $0x404] ss:$16 sps:$4 sm:$0xff]   ;;  %v6506_v48 = vld [vmem:[#allocation5 + $0xac] ss:$16 sps:$4 sm:$0xff]  }
  0xb9   :  { %1664 = vmatprep.subr.bf16.mxu1 %v6412_v50  ;;  %v6487_v34 = vld [vmem:[#allocation5 + $0x604] ss:$16 sps:$4 sm:$0xff]   ;;  %v6482_v36 = vld [vmem:[#allocation5 + $0x400] ss:$16 sps:$4 sm:$0xff]  }
  0xba   :  { %v6485_v37 = vld [vmem:[#allocation5 + $0x600] ss:$16 sps:$4 sm:$0xff]   ;;  %v6490_v38 = vld [vmem:[#allocation5 + $0x5e4] ss:$16 sps:$4 sm:$0xff]  }
  0xbb   :  { %1622 = vmatpush2.bf16.msra.mxu0 %v6414_v52  ;;  %v6488_v40 = vld [vmem:[#allocation5 + $0x5e0] ss:$16 sps:$4 sm:$0xff]   ;;  %v6497_v43 = vld [vmem:[#allocation5 + $0x5c4] ss:$16 sps:$4 sm:$0xff]   ;;  %v6504_v52 = vld [vmem:[#allocation5 + $0xa8] ss:$16 sps:$4 sm:$0xff]  }
  0xbc   :  { %1665 = vmatpush2.bf16.msra.mxu1 %v6415_v53  ;;  %1623 = vmatprep.subr.bf16.mxu0 %v6416_v54  ;;  %v6491_v41 = vld [vmem:[#allocation2 + $0x18] ss:$28 sps:$4 sm:$0xff]   ;;  %v6503_v47 = vld [vmem:[#allocation5 + $0x5a4] ss:$16 sps:$4 sm:$0xff]  }
  0xbd   :  { %1666 = vmatprep.subr.bf16.mxu1 %v6418_v55  ;;  %v6495_v45 = vld [vmem:[#allocation5 + $0x5c0] ss:$16 sps:$4 sm:$0xff]   ;;  %v6509_v53 = vld [vmem:[#allocation5 + $0x584] ss:$16 sps:$4 sm:$0xff]   ;;  %v6512_v54 = vld [vmem:[#allocation5 + $0x8c] ss:$16 sps:$4 sm:$0xff]  }
  0xbe   :  { %v6501_v50 = vld [vmem:[#allocation5 + $0x5a0] ss:$16 sps:$4 sm:$0xff]  }
  0xbf   :  { %1624 = vmatpush2.bf16.msra.mxu0 %v6420_v56  ;;  %v6507_v55 = vld [vmem:[#allocation5 + $0x580] ss:$16 sps:$4 sm:$0xff]   ;;  %v6510_v56 = vld [vmem:[#allocation5 + $0x88] ss:$16 sps:$4 sm:$0xff]  }
  0xc0   :  { %1667 = vmatpush2.bf16.msra.mxu1 %v6421_v57  ;;  %1625 = vmatprep.subr.bf16.mxu0 %v6422_v58  ;;  %v6515_v57 = vld [vmem:[#allocation5 + $0x564] ss:$16 sps:$4 sm:$0xff]   ;;  %v6518_v58 = vld [vmem:[#allocation5 + $0x6c] ss:$16 sps:$4 sm:$0xff]  }
  0xc1   :  { %1668 = vmatprep.subr.bf16.mxu1 %v6424_v59  ;;  %v6513_v59 = vld [vmem:[#allocation5 + $0x560] ss:$16 sps:$4 sm:$0xff]  }
  0xc3   :  { %1626 = vmatpush2.bf16.msra.mxu0 %v6426_v60  ;;  %v6521_v60 = vld [vmem:[#allocation5 + $0x544] ss:$16 sps:$4 sm:$0xff]  }
  0xc4   :  { %1669 = vmatpush2.bf16.msra.mxu1 %v6427_v61  ;;  %1627 = vmatprep.subr.bf16.mxu0 %v6428_v62  ;;  %v6524_v61 = vld [vmem:[#allocation5 + $0x4c] ss:$16 sps:$4 sm:$0xff]   ;;  %v6519_v62 = vld [vmem:[#allocation5 + $0x540] ss:$16 sps:$4 sm:$0xff]  }
  0xc5   :  { %1670 = vmatprep.subr.bf16.mxu1 %v6430_v63  ;;  %v6522_v63 = vld [vmem:[#allocation5 + $0x48] ss:$16 sps:$4 sm:$0xff]  }
  0xc7   :  { %1628 = vmatpush2.bf16.msra.mxu0 %v6432_v0  ;;  %v6527_v0 = vld [vmem:[#allocation5 + $0x524] ss:$16 sps:$4 sm:$0xff]  }
  0xc8   :  { %1671 = vmatpush2.bf16.msra.mxu1 %v6433_v1  ;;  %1683 = vmatprep.subr.bf16.mxu0 %v6442_v2  ;;  %v6530_v1 = vld [vmem:[#allocation5 + $0x2c] ss:$16 sps:$4 sm:$0xff]   ;;  %v6525_v2 = vld [vmem:[#allocation5 + $0x520] ss:$16 sps:$4 sm:$0xff]  }
  0xc9   :  { %1726 = vmatprep.subr.bf16.mxu1 %v6445_v3  ;;  %v6528_v3 = vld [vmem:[#allocation5 + $0x28] ss:$16 sps:$4 sm:$0xff]  }
  0xca   :  { %1630 = vmatmul.mubr.bf16.vlgmr.msra.gmra.mxu0 %v7720_v4 }
  0xcb   :  { %1673 = vmatmul.mubr.bf16.vlgmr.msra.gmra.mxu1 %v6437_v5  ;;  %1684 = vmatpush1.bf16.msra.mxu0 %v6440_v6  ;;  %v6533_v5 = vld [vmem:[#allocation5 + $0x504] ss:$16 sps:$4 sm:$0xff]   ;;  %v6536_v6 = vld [vmem:[#allocation5 + $0xc] ss:$16 sps:$4 sm:$0xff]  }
  0xcc   :  { %1727 = vmatpush1.bf16.msra.mxu1 %v6443_v7  ;;  %1685 = vmatprep.subr.bf16.mxu0 %v6448_v8  ;;  %v6531_v7 = vld [vmem:[#allocation5 + $0x500] ss:$16 sps:$4 sm:$0xff]   ;;  %v6534_v8 = vld [vmem:[#allocation5 + $0x8] ss:$16 sps:$4 sm:$0xff]  }
  0xcd   :  { %1728 = vmatprep.subr.bf16.mxu1 %v6451_v9  ;;  %1758 = vmatprep.mubr.bf16.mxu1 %v7591_v14  ;;  %v6542_v9 = vld [vmem:[#allocation5 + $0x1ec] ss:$16 sps:$4 sm:$0xff]  }
  0xce   :  { %1715 = vmatprep.mubr.bf16.mxu0 %v7724_v35 }
  0xcf   :  { %1686 = vmatpush1.bf16.msra.mxu0 %v6446_v10  ;;  %v6545_v10 = vld [vmem:[#allocation5 + $0x2ec] ss:$16 sps:$4 sm:$0xff]  }
  0xd0   :  { %1729 = vmatpush1.bf16.msra.mxu1 %v6449_v11  ;;  %1687 = vmatprep.subr.bf16.mxu0 %v6454_v12  ;;  %v7728_v11 = vld [vmem:[#allocation2 + $0x10] ss:$28 sps:$4 sm:$0xff]  }
  0xd1   :  { %1730 = vmatprep.subr.bf16.mxu1 %v6457_v13  ;;  %v6540_v12 = vld [vmem:[#allocation5 + $0x1e8] ss:$16 sps:$4 sm:$0xff]  }
  0xd2   :  { %v6543_v13 = vld [vmem:[#allocation5 + $0x2e8] ss:$16 sps:$4 sm:$0xff]  }
  0xd3   :  { %1688 = vmatpush1.bf16.msra.mxu0 %v6452_v15  ;;  %v6548_v15 = vld [vmem:[#allocation5 + $0x1cc] ss:$16 sps:$4 sm:$0xff]  }
  0xd4   :  { %1731 = vmatpush1.bf16.msra.mxu1 %v6455_v16  ;;  %1689 = vmatprep.subr.bf16.mxu0 %v6460_v17  ;;  %v6551_v16 = vld [vmem:[#allocation5 + $0x2cc] ss:$16 sps:$4 sm:$0xff]   ;;  %v6546_v17 = vld [vmem:[#allocation5 + $0x1c8] ss:$16 sps:$4 sm:$0xff]  }
  0xd5   :  { %1732 = vmatprep.subr.bf16.mxu1 %v6463_v18  ;;  %v6549_v18 = vld [vmem:[#allocation5 + $0x2c8] ss:$16 sps:$4 sm:$0xff]  }
  0xd7   :  { %1690 = vmatpush1.bf16.msra.mxu0 %v6458_v19  ;;  %v6554_v19 = vld [vmem:[#allocation5 + $0x1ac] ss:$16 sps:$4 sm:$0xff]  }
  0xd8   :  { %1733 = vmatpush1.bf16.msra.mxu1 %v6461_v20  ;;  %1691 = vmatprep.subr.bf16.mxu0 %v6466_v21  ;;  %v6557_v20 = vld [vmem:[#allocation5 + $0x2ac] ss:$16 sps:$4 sm:$0xff]   ;;  %v6552_v21 = vld [vmem:[#allocation5 + $0x1a8] ss:$16 sps:$4 sm:$0xff]  }
  0xd9   :  { %1734 = vmatprep.subr.bf16.mxu1 %v6469_v22  ;;  %v6555_v22 = vld [vmem:[#allocation5 + $0x2a8] ss:$16 sps:$4 sm:$0xff]  }
  0xdb   :  { %1692 = vmatpush1.bf16.msra.mxu0 %v6464_v23  ;;  %v6560_v23 = vld [vmem:[#allocation5 + $0x18c] ss:$16 sps:$4 sm:$0xff]  }
  0xdc   :  { %1735 = vmatpush1.bf16.msra.mxu1 %v6467_v24  ;;  %1693 = vmatprep.subr.bf16.mxu0 %v6472_v25  ;;  %v6563_v24 = vld [vmem:[#allocation5 + $0x28c] ss:$16 sps:$4 sm:$0xff]   ;;  %v6558_v25 = vld [vmem:[#allocation5 + $0x188] ss:$16 sps:$4 sm:$0xff]  }
  0xdd   :  { %1736 = vmatprep.subr.bf16.mxu1 %v6475_v26  ;;  %v6561_v26 = vld [vmem:[#allocation5 + $0x288] ss:$16 sps:$4 sm:$0xff]  }
  0xdf   :  { %1694 = vmatpush1.bf16.msra.mxu0 %v6470_v27  ;;  %v6566_v27 = vld [vmem:[#allocation5 + $0x16c] ss:$16 sps:$4 sm:$0xff]  }
  0xe0   :  { %1737 = vmatpush1.bf16.msra.mxu1 %v6473_v28  ;;  %1695 = vmatprep.subr.bf16.mxu0 %v6478_v29  ;;  %v6569_v28 = vld [vmem:[#allocation5 + $0x26c] ss:$16 sps:$4 sm:$0xff]   ;;  %v6564_v29 = vld [vmem:[#allocation5 + $0x168] ss:$16 sps:$4 sm:$0xff]  }
  0xe1   :  { %1738 = vmatprep.subr.bf16.mxu1 %v6481_v30  ;;  %v6572_v30 = vld [vmem:[#allocation5 + $0x14c] ss:$16 sps:$4 sm:$0xff]  }
  0xe3   :  { %1696 = vmatpush1.bf16.msra.mxu0 %v6476_v31  ;;  %v6575_v31 = vld [vmem:[#allocation5 + $0x24c] ss:$16 sps:$4 sm:$0xff]  }
  0xe4   :  { %1739 = vmatpush1.bf16.msra.mxu1 %v6479_v32  ;;  %1697 = vmatprep.subr.bf16.mxu0 %v6484_v33  ;;  %v6570_v32 = vld [vmem:[#allocation5 + $0x148] ss:$16 sps:$4 sm:$0xff]  }
  0xe5   :  { %1740 = vmatprep.subr.bf16.mxu1 %v6487_v34  ;;  %v6573_v33 = vld [vmem:[#allocation5 + $0x248] ss:$16 sps:$4 sm:$0xff]   ;;  %v6578_v34 = vld [vmem:[#allocation5 + $0x12c] ss:$16 sps:$4 sm:$0xff]  }
  0xe7   :  { %1698 = vmatpush1.bf16.msra.mxu0 %v6482_v36  ;;  %v6581_v36 = vld [vmem:[#allocation5 + $0x22c] ss:$16 sps:$4 sm:$0xff]  }
  0xe8   :  { %1741 = vmatpush1.bf16.msra.mxu1 %v6485_v37  ;;  %1699 = vmatprep.subr.bf16.mxu0 %v6490_v38  ;;  %v6576_v37 = vld [vmem:[#allocation5 + $0x128] ss:$16 sps:$4 sm:$0xff]  }
  0xe9   :  { %1769 = vmatprep.subr.bf16.mxu1 %v6494_v39  ;;  %v6579_v38 = vld [vmem:[#allocation5 + $0x228] ss:$16 sps:$4 sm:$0xff]   ;;  %v6584_v39 = vld [vmem:[#allocation5 + $0x10c] ss:$16 sps:$4 sm:$0xff]  }
  0xeb   :  { %1759 = vmatmul.mubr.bf16.vlgmr.msra.gmra.mxu1 %v6491_v41  ;;  %1700 = vmatpush2.bf16.msra.mxu0 %v6488_v40  ;;  %v6587_v40 = vld [vmem:[#allocation5 + $0x20c] ss:$16 sps:$4 sm:$0xff]   ;;  %v6582_v41 = vld [vmem:[#allocation5 + $0x108] ss:$16 sps:$4 sm:$0xff]  }
  0xec   :  { %1770 = vmatpush1.bf16.msra.mxu1 %v6492_v42  ;;  %1701 = vmatprep.subr.bf16.mxu0 %v6497_v43  ;;  %v6585_v42 = vld [vmem:[#allocation5 + $0x208] ss:$16 sps:$4 sm:$0xff]   ;;  %v6590_v43 = vld [vmem:[#allocation5 + $0x3ec] ss:$16 sps:$4 sm:$0xff]  }
  0xed   :  { %1771 = vmatprep.subr.bf16.mxu1 %v6500_v44  ;;  %1801 = vmatprep.mubr.bf16.mxu1 %v7714_v49  ;;  %v6516_v49 = vld [vmem:[#allocation5 + $0x68] ss:$16 sps:$4 sm:$0xff]   ;;  %v6593_v44 = vld [vmem:[#allocation5 + $0x4ec] ss:$16 sps:$4 sm:$0xff]  }
  0xef   :  { %1702 = vmatpush2.bf16.msra.mxu0 %v6495_v45  ;;  %v6588_v45 = vld [vmem:[#allocation5 + $0x3e8] ss:$16 sps:$4 sm:$0xff]  }
  0xf0   :  { %1772 = vmatpush1.bf16.msra.mxu1 %v6498_v46  ;;  %1703 = vmatprep.subr.bf16.mxu0 %v6503_v47  ;;  %v6591_v46 = vld [vmem:[#allocation5 + $0x4e8] ss:$16 sps:$4 sm:$0xff]   ;;  %v6596_v47 = vld [vmem:[#allocation5 + $0x3cc] ss:$16 sps:$4 sm:$0xff]  }
  0xf1   :  { %1773 = vmatprep.subr.bf16.mxu1 %v6506_v48  ;;  %v6599_v48 = vld [vmem:[#allocation5 + $0x4cc] ss:$16 sps:$4 sm:$0xff]  }
  0xf3   :  { %1704 = vmatpush2.bf16.msra.mxu0 %v6501_v50  ;;  %v6594_v50 = vld [vmem:[#allocation5 + $0x3c8] ss:$16 sps:$4 sm:$0xff]  }
  0xf4   :  { %1774 = vmatpush1.bf16.msra.mxu1 %v6504_v52  ;;  %1705 = vmatprep.subr.bf16.mxu0 %v6509_v53  ;;  %v6597_v52 = vld [vmem:[#allocation5 + $0x4c8] ss:$16 sps:$4 sm:$0xff]   ;;  %v6602_v53 = vld [vmem:[#allocation5 + $0x3ac] ss:$16 sps:$4 sm:$0xff]  }
  0xf5   :  { %1775 = vmatprep.subr.bf16.mxu1 %v6512_v54  ;;  %v6605_v54 = vld [vmem:[#allocation5 + $0x4ac] ss:$16 sps:$4 sm:$0xff]  }
  0xf7   :  { %1706 = vmatpush2.bf16.msra.mxu0 %v6507_v55  ;;  %v6600_v55 = vld [vmem:[#allocation5 + $0x3a8] ss:$16 sps:$4 sm:$0xff]  }
  0xf8   :  { %1776 = vmatpush1.bf16.msra.mxu1 %v6510_v56  ;;  %1707 = vmatprep.subr.bf16.mxu0 %v6515_v57  ;;  %v6603_v56 = vld [vmem:[#allocation5 + $0x4a8] ss:$16 sps:$4 sm:$0xff]   ;;  %v6608_v57 = vld [vmem:[#allocation5 + $0x38c] ss:$16 sps:$4 sm:$0xff]  }
  0xf9   :  { %1777 = vmatprep.subr.bf16.mxu1 %v6518_v58  ;;  %v6611_v58 = vld [vmem:[#allocation5 + $0x48c] ss:$16 sps:$4 sm:$0xff]  }
  0xfb   :  { %1708 = vmatpush2.bf16.msra.mxu0 %v6513_v59  ;;  %v6606_v59 = vld [vmem:[#allocation5 + $0x388] ss:$16 sps:$4 sm:$0xff]  }
  0xfc   :  { %1778 = vmatpush1.bf16.msra.mxu1 %v6516_v49  ;;  %1709 = vmatprep.subr.bf16.mxu0 %v6521_v60  ;;  %v6614_v49 = vld [vmem:[#allocation5 + $0x36c] ss:$16 sps:$4 sm:$0xff]  }
  0xfd   :  { %1779 = vmatprep.subr.bf16.mxu1 %v6524_v61  ;;  %v6617_v60 = vld [vmem:[#allocation5 + $0x46c] ss:$16 sps:$4 sm:$0xff]   ;;  %v6612_v61 = vld [vmem:[#allocation5 + $0x368] ss:$16 sps:$4 sm:$0xff]  }
  0xff   :  { %1710 = vmatpush2.bf16.msra.mxu0 %v6519_v62  ;;  %v6615_v62 = vld [vmem:[#allocation5 + $0x468] ss:$16 sps:$4 sm:$0xff]  }
 0x100   :  { %1780 = vmatpush1.bf16.msra.mxu1 %v6522_v63  ;;  %1711 = vmatprep.subr.bf16.mxu0 %v6527_v0  ;;  %v6620_v63 = vld [vmem:[#allocation5 + $0x34c] ss:$16 sps:$4 sm:$0xff]  }
 0x101   :  { %1781 = vmatprep.subr.bf16.mxu1 %v6530_v1  ;;  %v6623_v0 = vld [vmem:[#allocation5 + $0x44c] ss:$16 sps:$4 sm:$0xff]   ;;  %v6621_v1 = vld [vmem:[#allocation5 + $0x448] ss:$16 sps:$4 sm:$0xff]  }
 0x103   :  { %1712 = vmatpush2.bf16.msra.mxu0 %v6525_v2  ;;  %v6626_v2 = vld [vmem:[#allocation5 + $0x32c] ss:$16 sps:$4 sm:$0xff]  }
 0x104   :  { %1782 = vmatpush1.bf16.msra.mxu1 %v6528_v3  ;;  %1713 = vmatprep.subr.bf16.mxu0 %v6533_v5  ;;  %v6629_v3 = vld [vmem:[#allocation5 + $0x42c] ss:$16 sps:$4 sm:$0xff]   ;;  %v6624_v5 = vld [vmem:[#allocation5 + $0x328] ss:$16 sps:$4 sm:$0xff]  }
 0x105   :  { %1783 = vmatprep.subr.bf16.mxu1 %v6536_v6  ;;  %v6627_v6 = vld [vmem:[#allocation5 + $0x428] ss:$16 sps:$4 sm:$0xff]  }
 0x107   :  { %1714 = vmatpush2.bf16.msra.mxu0 %v6531_v7  ;;  %v6632_v7 = vld [vmem:[#allocation5 + $0x30c] ss:$16 sps:$4 sm:$0xff]  }
 0x108   :  { %1784 = vmatpush1.bf16.msra.mxu1 %v6534_v8  ;;  %1812 = vmatprep.subr.bf16.mxu0 %v6545_v10  ;;  %v6635_v8 = vld [vmem:[#allocation5 + $0x40c] ss:$16 sps:$4 sm:$0xff]   ;;  %v6633_v10 = vld [vmem:[#allocation5 + $0x408] ss:$16 sps:$4 sm:$0xff]  }
 0x109   :  { %1785 = vmatprep.subr.bf16.mxu1 %v6542_v9  ;;  %v6630_v9 = vld [vmem:[#allocation5 + $0x308] ss:$16 sps:$4 sm:$0xff]  }
 0x10a   :  { %1716 = vmatmul.mubr.bf16.vlgmr.msra.gmra.mxu0 %v7728_v11 }
 0x10b   :  { %1813 = vmatpush1.bf16.msra.mxu0 %v6543_v13  ;;  %1844 = vmatprep.mubr.bf16.mxu0 %v7716_v51  ;;  %v6567_v51 = vld [vmem:[#allocation5 + $0x268] ss:$16 sps:$4 sm:$0xff]   ;;  %v6641_v13 = vld [vmem:[#allocation5 + $0x6ec] ss:$16 sps:$4 sm:$0xff]  }
 0x10c   :  { %1786 = vmatpush2.bf16.msra.mxu1 %v6540_v12  ;;  %1814 = vmatprep.subr.bf16.mxu0 %v6551_v16  ;;  %v6638_v12 = vld [vmem:[#allocation5 + $0x5ec] ss:$16 sps:$4 sm:$0xff]   ;;  %v6639_v16 = vld [vmem:[#allocation5 + $0x6e8] ss:$16 sps:$4 sm:$0xff]  }
 0x10d   :  { %1787 = vmatprep.subr.bf16.mxu1 %v6548_v15  ;;  %v6636_v15 = vld [vmem:[#allocation5 + $0x5e8] ss:$16 sps:$4 sm:$0xff]  }
 0x10f   :  { %1815 = vmatpush1.bf16.msra.mxu0 %v6549_v18  ;;  %v6647_v18 = vld [vmem:[#allocation5 + $0x6cc] ss:$16 sps:$4 sm:$0xff]  }
 0x110   :  { %1788 = vmatpush2.bf16.msra.mxu1 %v6546_v17  ;;  %1816 = vmatprep.subr.bf16.mxu0 %v6557_v20  ;;  %v6644_v17 = vld [vmem:[#allocation5 + $0x5cc] ss:$16 sps:$4 sm:$0xff]   ;;  %v6645_v20 = vld [vmem:[#allocation5 + $0x6c8] ss:$16 sps:$4 sm:$0xff]  }
 0x111   :  { %1789 = vmatprep.subr.bf16.mxu1 %v6554_v19  ;;  %v6642_v19 = vld [vmem:[#allocation5 + $0x5c8] ss:$16 sps:$4 sm:$0xff]  }
 0x113   :  { %1817 = vmatpush1.bf16.msra.mxu0 %v6555_v22  ;;  %v6650_v22 = vld [vmem:[#allocation5 + $0x5ac] ss:$16 sps:$4 sm:$0xff]  }
 0x114   :  { %1790 = vmatpush2.bf16.msra.mxu1 %v6552_v21  ;;  %1818 = vmatprep.subr.bf16.mxu0 %v6563_v24  ;;  %v7316_v21 = vld [vmem:[#allocation2 + $0x8] ss:$28 sps:$4 sm:$0xff]   ;;  %v6648_v24 = vld [vmem:[#allocation5 + $0x5a8] ss:$16 sps:$4 sm:$0xff]  }
 0x115   :  { %1791 = vmatprep.subr.bf16.mxu1 %v6560_v23  ;;  %v6653_v23 = vld [vmem:[#allocation5 + $0x6ac] ss:$16 sps:$4 sm:$0xff]  }
 0x117   :  { %1819 = vmatpush1.bf16.msra.mxu0 %v6561_v26  ;;  %v6656_v26 = vld [vmem:[#allocation5 + $0x58c] ss:$16 sps:$4 sm:$0xff]  }
 0x118   :  { %1792 = vmatpush2.bf16.msra.mxu1 %v6558_v25  ;;  %1820 = vmatprep.subr.bf16.mxu0 %v6569_v28  ;;  %v6651_v25 = vld [vmem:[#allocation5 + $0x6a8] ss:$16 sps:$4 sm:$0xff]  }
 0x119   :  { %1793 = vmatprep.subr.bf16.mxu1 %v6566_v27  ;;  %v6659_v27 = vld [vmem:[#allocation5 + $0x68c] ss:$16 sps:$4 sm:$0xff]   ;;  %v6654_v28 = vld [vmem:[#allocation5 + $0x588] ss:$16 sps:$4 sm:$0xff]  }
 0x11b   :  { %1821 = vmatpush1.bf16.msra.mxu0 %v6567_v51  ;;  %v6662_v51 = vld [vmem:[#allocation5 + $0x56c] ss:$16 sps:$4 sm:$0xff]  }
 0x11c   :  { %1794 = vmatpush2.bf16.msra.mxu1 %v6564_v29  ;;  %1822 = vmatprep.subr.bf16.mxu0 %v6575_v31  ;;  %v6657_v29 = vld [vmem:[#allocation5 + $0x688] ss:$16 sps:$4 sm:$0xff]  }
 0x11d   :  { %1795 = vmatprep.subr.bf16.mxu1 %v6572_v30  ;;  %v6665_v30 = vld [vmem:[#allocation5 + $0x66c] ss:$16 sps:$4 sm:$0xff]   ;;  %v6660_v31 = vld [vmem:[#allocation5 + $0x568] ss:$16 sps:$4 sm:$0xff]  }
 0x11f   :  { %1823 = vmatpush1.bf16.msra.mxu0 %v6573_v33  ;;  %v6668_v33 = vld [vmem:[#allocation5 + $0x54c] ss:$16 sps:$4 sm:$0xff]  }
 0x120   :  { %1796 = vmatpush2.bf16.msra.mxu1 %v6570_v32  ;;  %1824 = vmatprep.subr.bf16.mxu0 %v6581_v36  ;;  %v6663_v32 = vld [vmem:[#allocation5 + $0x668] ss:$16 sps:$4 sm:$0xff]  }
 0x121   :  { %1797 = vmatprep.subr.bf16.mxu1 %v6578_v34  ;;  %v6671_v34 = vld [vmem:[#allocation5 + $0x64c] ss:$16 sps:$4 sm:$0xff]   ;;  %v6666_v36 = vld [vmem:[#allocation5 + $0x548] ss:$16 sps:$4 sm:$0xff]  }
 0x123   :  { %1825 = vmatpush1.bf16.msra.mxu0 %v6579_v38  ;;  %v6674_v38 = vld [vmem:[#allocation5 + $0x52c] ss:$16 sps:$4 sm:$0xff]  }
 0x124   :  { %1798 = vmatpush2.bf16.msra.mxu1 %v6576_v37  ;;  %1826 = vmatprep.subr.bf16.mxu0 %v6587_v40  ;;  %v6669_v37 = vld [vmem:[#allocation5 + $0x648] ss:$16 sps:$4 sm:$0xff]  }
 0x125   :  { %1799 = vmatprep.subr.bf16.mxu1 %v6584_v39  ;;  %v6677_v39 = vld [vmem:[#allocation5 + $0x62c] ss:$16 sps:$4 sm:$0xff]   ;;  %v6672_v40 = vld [vmem:[#allocation5 + $0x528] ss:$16 sps:$4 sm:$0xff]  }
 0x127   :  { %1827 = vmatpush1.bf16.msra.mxu0 %v6585_v42  ;;  %v6680_v42 = vld [vmem:[#allocation5 + $0x50c] ss:$16 sps:$4 sm:$0xff]  }
 0x128   :  { %1800 = vmatpush2.bf16.msra.mxu1 %v6582_v41  ;;  %1828 = vmatprep.subr.bf16.mxu0 %v6590_v43  ;;  %v6675_v41 = vld [vmem:[#allocation5 + $0x628] ss:$16 sps:$4 sm:$0xff]   ;;  %v6683_v43 = vld [vmem:[#allocation5 + $0x60c] ss:$16 sps:$4 sm:$0xff]  }
 0x129   :  { %1855 = vmatprep.subr.bf16.mxu1 %v6593_v44  ;;  %v6678_v44 = vld [vmem:[#allocation5 + $0x508] ss:$16 sps:$4 sm:$0xff]  }
 0x12b   :  { %1802 = vmatmul.mubr.bf16.vlgmr.msra.gmra.mxu1 %v7720_v4  ;;  %1829 = vmatpush2.bf16.msra.mxu0 %v6588_v45  ;;  %v6609_v4 = vld [vmem:[#allocation5 + $0x488] ss:$16 sps:$4 sm:$0xff]  }
 0x12c   :  { %1856 = vmatpush1.bf16.msra.mxu1 %v6591_v46  ;;  %1830 = vmatprep.subr.bf16.mxu0 %v6596_v47  ;;  %v6681_v45 = vld [vmem:[#allocation5 + $0x608] ss:$16 sps:$4 sm:$0xff]   ;;  %v6686_v46 = vld [vmem:[#allocation7 + $0x74] ss:$8 sps:$4 sm:$0xff]  }
 0x12d   :  { %1857 = vmatprep.subr.bf16.mxu1 %v6599_v48  ;;  %1887 = vmatprep.mubr.bf16.mxu1 %v7724_v35  ;;  %v6618_v35 = vld [vmem:[#allocation5 + $0x348] ss:$16 sps:$4 sm:$0xff]   ;;  %v6689_v48 = vld [vmem:[#allocation7 + $0x64] ss:$8 sps:$4 sm:$0xff]  }
 0x12e   :  { %v6684_v47 = vld [vmem:[#allocation7 + $0x70] ss:$8 sps:$4 sm:$0xff]  }
 0x12f   :  { %1831 = vmatpush2.bf16.msra.mxu0 %v6594_v50  ;;  %v6687_v50 = vld [vmem:[#allocation7 + $0x60] ss:$8 sps:$4 sm:$0xff]  }
 0x130   :  { %1858 = vmatpush1.bf16.msra.mxu1 %v6597_v52  ;;  %1832 = vmatprep.subr.bf16.mxu0 %v6602_v53  ;;  %v7317_v52 = vld [vmem:[#allocation2 + $0x18] ss:$28 sps:$4 sm:$0xff]  }
 0x131   :  { %1859 = vmatprep.subr.bf16.mxu1 %v6605_v54  ;;  %v6692_v53 = vld [vmem:[#allocation7 + $0x54] ss:$8 sps:$4 sm:$0xff]   ;;  %v6690_v54 = vld [vmem:[#allocation7 + $0x50] ss:$8 sps:$4 sm:$0xff]  }
 0x133   :  { %1833 = vmatpush2.bf16.msra.mxu0 %v6600_v55  ;;  %v6695_v55 = vld [vmem:[#allocation7 + $0x44] ss:$8 sps:$4 sm:$0xff]  }
 0x134   :  { %1860 = vmatpush1.bf16.msra.mxu1 %v6603_v56  ;;  %1834 = vmatprep.subr.bf16.mxu0 %v6608_v57  ;;  %v6732_v56 = vld [vmem:[#allocation7 + $0x170] ss:$8 sps:$4 sm:$0xff]   ;;  %v6734_v57 = vld [vmem:[#allocation7 + $0x174] ss:$8 sps:$4 sm:$0xff]  }
 0x135   :  { %1861 = vmatprep.subr.bf16.mxu1 %v6611_v58  ;;  %v6693_v58 = vld [vmem:[#allocation7 + $0x40] ss:$8 sps:$4 sm:$0xff]  }
 0x137   :  { %1835 = vmatpush2.bf16.msra.mxu0 %v6606_v59  ;;  %v6698_v59 = vld [vmem:[#allocation7 + $0x34] ss:$8 sps:$4 sm:$0xff]  }
 0x138   :  { %1862 = vmatpush1.bf16.msra.mxu1 %v6609_v4  ;;  %1836 = vmatprep.subr.bf16.mxu0 %v6614_v49  ;;  %v6737_v4 = vld [vmem:[#allocation7 + $0x164] ss:$8 sps:$4 sm:$0xff]   ;;  %v6735_v49 = vld [vmem:[#allocation7 + $0x160] ss:$8 sps:$4 sm:$0xff]  }
 0x139   :  { %1863 = vmatprep.subr.bf16.mxu1 %v6617_v60  ;;  %v6740_v60 = vld [vmem:[#allocation7 + $0x154] ss:$8 sps:$4 sm:$0xff]  }
 0x13b   :  { %1837 = vmatpush2.bf16.msra.mxu0 %v6612_v61  ;;  %v6701_v61 = vld [vmem:[#allocation7 + $0x24] ss:$8 sps:$4 sm:$0xff]  }
 0x13c   :  { %1864 = vmatpush1.bf16.msra.mxu1 %v6615_v62  ;;  %1838 = vmatprep.subr.bf16.mxu0 %v6620_v63  ;;  %v6738_v62 = vld [vmem:[#allocation7 + $0x150] ss:$8 sps:$4 sm:$0xff]   ;;  %v6743_v63 = vld [vmem:[#allocation7 + $0x144] ss:$8 sps:$4 sm:$0xff]  }
 0x13d   :  { %1865 = vmatprep.subr.bf16.mxu1 %v6623_v0  ;;  %v6699_v0 = vld [vmem:[#allocation7 + $0x20] ss:$8 sps:$4 sm:$0xff]  }
 0x13f   :  { %1839 = vmatpush2.bf16.msra.mxu0 %v6618_v35  ;;  %v6704_v35 = vld [vmem:[#allocation7 + $0x14] ss:$8 sps:$4 sm:$0xff]  }
 0x140   :  { %1866 = vmatpush1.bf16.msra.mxu1 %v6621_v1  ;;  %1840 = vmatprep.subr.bf16.mxu0 %v6626_v2  ;;  %v6741_v1 = vld [vmem:[#allocation7 + $0x140] ss:$8 sps:$4 sm:$0xff]   ;;  %v6702_v2 = vld [vmem:[#allocation7 + $0x10] ss:$8 sps:$4 sm:$0xff]  }
 0x141   :  { %1867 = vmatprep.subr.bf16.mxu1 %v6629_v3  ;;  %v6707_v3 = vld [vmem:[#allocation7 + $0x4] ss:$8 sps:$4 sm:$0xff]  }
 0x143   :  { %1841 = vmatpush2.bf16.msra.mxu0 %v6624_v5  ;;  %v6705_v5 = vld [vmem:[#allocation7] ss:$8 sps:$4 sm:$0xff]  }
 0x144   :  { %1868 = vmatpush1.bf16.msra.mxu1 %v6627_v6  ;;  %1842 = vmatprep.subr.bf16.mxu0 %v6632_v7  ;;  %v6710_v6 = vld [vmem:[#allocation7 + $0xf4] ss:$8 sps:$4 sm:$0xff]   ;;  %v6708_v7 = vld [vmem:[#allocation7 + $0xf0] ss:$8 sps:$4 sm:$0xff]  }
 0x145   :  { %1869 = vmatprep.subr.bf16.mxu1 %v6635_v8  ;;  %v6713_v8 = vld [vmem:[#allocation7 + $0xe4] ss:$8 sps:$4 sm:$0xff]  }
 0x147   :  { %1843 = vmatpush2.bf16.msra.mxu0 %v6630_v9  ;;  %v6746_v9 = vld [vmem:[#allocation7 + $0x134] ss:$8 sps:$4 sm:$0xff]  }
 0x148   :  { %1870 = vmatpush1.bf16.msra.mxu1 %v6633_v10  ;;  %1898 = vmatprep.subr.bf16.mxu0 %v6641_v13  ;;  %v6711_v10 = vld [vmem:[#allocation7 + $0xe0] ss:$8 sps:$4 sm:$0xff]   ;;  %v6716_v13 = vld [vmem:[#allocation7 + $0xd4] ss:$8 sps:$4 sm:$0xff]  }
 0x149   :  { %1871 = vmatprep.subr.bf16.mxu1 %v6638_v12  ;;  %v6744_v12 = vld [vmem:[#allocation7 + $0x130] ss:$8 sps:$4 sm:$0xff]  }
 0x14a   :  { %1845 = vmatmul.mubr.bf16.vlgmr.msra.gmra.mxu0 %v7316_v21  ;;  %v6755_v21 = vld [vmem:[#allocation7 + $0x104] ss:$8 sps:$4 sm:$0xff]  }
 0x14b   :  { %1899 = vmatpush1.bf16.msra.mxu0 %v6639_v16  ;;  %1930 = vmatprep.mubr.bf16.mxu0 %v7591_v14  ;;  %v6714_v16 = vld [vmem:[#allocation7 + $0xd0] ss:$8 sps:$4 sm:$0xff]  }
 0x14c   :  { %1872 = vmatpush2.bf16.msra.mxu1 %v6636_v15  ;;  %1900 = vmatprep.subr.bf16.mxu0 %v6647_v18  ;;  %v6749_v15 = vld [vmem:[#allocation7 + $0x124] ss:$8 sps:$4 sm:$0xff]  }
 0x14d   :  { %1873 = vmatprep.subr.bf16.mxu1 %v6644_v17  ;;  %v6747_v17 = vld [vmem:[#allocation7 + $0x120] ss:$8 sps:$4 sm:$0xff]   ;;  %v6719_v18 = vld [vmem:[#allocation7 + $0xc4] ss:$8 sps:$4 sm:$0xff]  }
 0x14f   :  { %1901 = vmatpush1.bf16.msra.mxu0 %v6645_v20  ;;  %v6750_v20 = vld [vmem:[#allocation7 + $0x110] ss:$8 sps:$4 sm:$0xff]  }
 0x150   :  { %1874 = vmatpush2.bf16.msra.mxu1 %v6642_v19  ;;  %1902 = vmatprep.subr.bf16.mxu0 %v6653_v23  ;;  %v6752_v19 = vld [vmem:[#allocation7 + $0x114] ss:$8 sps:$4 sm:$0xff]   ;;  %v6753_v23 = vld [vmem:[#allocation7 + $0x100] ss:$8 sps:$4 sm:$0xff]  }
 0x151   :  { %1875 = vmatprep.subr.bf16.mxu1 %v6650_v22  ;;  %v6717_v22 = vld [vmem:[#allocation7 + $0xc0] ss:$8 sps:$4 sm:$0xff]  }
 0x153   :  { %1903 = vmatpush1.bf16.msra.mxu0 %v6651_v25  ;;  %v6758_v25 = vld [vmem:[#allocation7 + $0x1f4] ss:$8 sps:$4 sm:$0xff]  }
 0x154   :  { %1876 = vmatpush2.bf16.msra.mxu1 %v6648_v24  ;;  %1904 = vmatprep.subr.bf16.mxu0 %v6659_v27  ;;  %v6722_v24 = vld [vmem:[#allocation7 + $0xb4] ss:$8 sps:$4 sm:$0xff]   ;;  %v6756_v27 = vld [vmem:[#allocation7 + $0x1f0] ss:$8 sps:$4 sm:$0xff]  }
 0x155   :  { %1877 = vmatprep.subr.bf16.mxu1 %v6656_v26  ;;  %v6720_v26 = vld [vmem:[#allocation7 + $0xb0] ss:$8 sps:$4 sm:$0xff]  }
 0x157   :  { %1905 = vmatpush1.bf16.msra.mxu0 %v6657_v29  ;;  %v6761_v29 = vld [vmem:[#allocation7 + $0x1e4] ss:$8 sps:$4 sm:$0xff]  }
 0x158   :  { %1878 = vmatpush2.bf16.msra.mxu1 %v6654_v28  ;;  %1906 = vmatprep.subr.bf16.mxu0 %v6665_v30  ;;  %v6725_v28 = vld [vmem:[#allocation7 + $0xa4] ss:$8 sps:$4 sm:$0xff]   ;;  %v6759_v30 = vld [vmem:[#allocation7 + $0x1e0] ss:$8 sps:$4 sm:$0xff]  }
 0x159   :  { %1879 = vmatprep.subr.bf16.mxu1 %v6662_v51  ;;  %v6723_v51 = vld [vmem:[#allocation7 + $0xa0] ss:$8 sps:$4 sm:$0xff]  }
 0x15b   :  { %1907 = vmatpush1.bf16.msra.mxu0 %v6663_v32  ;;  %v6764_v32 = vld [vmem:[#allocation7 + $0x1d4] ss:$8 sps:$4 sm:$0xff]  }
 0x15c   :  { %1880 = vmatpush2.bf16.msra.mxu1 %v6660_v31  ;;  %1908 = vmatprep.subr.bf16.mxu0 %v6671_v34  ;;  %v6728_v31 = vld [vmem:[#allocation7 + $0x94] ss:$8 sps:$4 sm:$0xff]   ;;  %v6762_v34 = vld [vmem:[#allocation7 + $0x1d0] ss:$8 sps:$4 sm:$0xff]  }
 0x15d   :  { %1881 = vmatprep.subr.bf16.mxu1 %v6668_v33  ;;  %v6726_v33 = vld [vmem:[#allocation7 + $0x90] ss:$8 sps:$4 sm:$0xff]  }
 0x15f   :  { %1909 = vmatpush1.bf16.msra.mxu0 %v6669_v37  ;;  %v6767_v37 = vld [vmem:[#allocation7 + $0x1c4] ss:$8 sps:$4 sm:$0xff]  }
 0x160   :  { %1882 = vmatpush2.bf16.msra.mxu1 %v6666_v36  ;;  %1910 = vmatprep.subr.bf16.mxu0 %v6677_v39  ;;  %v6731_v36 = vld [vmem:[#allocation7 + $0x84] ss:$8 sps:$4 sm:$0xff]   ;;  %v6765_v39 = vld [vmem:[#allocation7 + $0x1c0] ss:$8 sps:$4 sm:$0xff]  }
 0x161   :  { %1883 = vmatprep.subr.bf16.mxu1 %v6674_v38  ;;  %v6729_v38 = vld [vmem:[#allocation7 + $0x80] ss:$8 sps:$4 sm:$0xff]  }
 0x163   :  { %1911 = vmatpush1.bf16.msra.mxu0 %v6675_v41  ;;  %v6768_v41 = vld [vmem:[#allocation7 + $0x1b0] ss:$8 sps:$4 sm:$0xff]  }
 0x164   :  { %1884 = vmatpush2.bf16.msra.mxu1 %v6672_v40  ;;  %1912 = vmatprep.subr.bf16.mxu0 %v6683_v43  ;;  %v6770_v40 = vld [vmem:[#allocation7 + $0x1b4] ss:$8 sps:$4 sm:$0xff]   ;;  %v6771_v43 = vld [vmem:[#allocation7 + $0x1a0] ss:$8 sps:$4 sm:$0xff]  }
 0x165   :  { %1885 = vmatprep.subr.bf16.mxu1 %v6680_v42  ;;  %v6773_v42 = vld [vmem:[#allocation7 + $0x1a4] ss:$8 sps:$4 sm:$0xff]  }
 0x167   :  { %1913 = vmatpush1.bf16.msra.mxu0 %v6681_v45  ;;  %v6774_v45 = vld [vmem:[#allocation7 + $0x190] ss:$8 sps:$4 sm:$0xff]  }
 0x168   :  { %1886 = vmatpush2.bf16.msra.mxu1 %v6678_v44  ;;  %2349 = vmatprep.subr.bf16.mxu0 %v6686_v46  ;;  %v6776_v44 = vld [vmem:[#allocation7 + $0x194] ss:$8 sps:$4 sm:$0xff]   ;;  %v6779_v46 = vld [vmem:[#allocation7 + $0x184] ss:$8 sps:$4 sm:$0xff]  }
 0x169   :  { %2392 = vmatprep.subr.bf16.mxu1 %v6734_v57 }
 0x16a   :  { %1931 = vmatmul.mubr.bf16.vlgmr.msra.gmra.mxu0 %v7317_v52 }
 0x16b   :  { %1888 = vmatmul.mubr.bf16.vlgmr.msra.gmra.mxu1 %v7728_v11  ;;  %2350 = vmatpush1.bf16.msra.mxu0 %v6684_v47  ;;  %v6696_v11 = vld [vmem:[#allocation7 + $0x30] ss:$8 sps:$4 sm:$0xff]   ;;  %v421_v47 = vlaneseq }
 0x16c   :  { %2351 = vmatprep.subr.bf16.mxu0 %v6689_v48  ;;  %2393 = vmatpush1.bf16.msra.mxu1 %v6732_v56  ;;  %v6777_v48 = vld [vmem:[#allocation7 + $0x180] ss:$8 sps:$4 sm:$0xff]  }
 0x16d   :  { %2394 = vmatprep.subr.bf16.mxu1 %v6737_v4  ;;  %v7736_v52 = vshrl.u32 %v421_v47, 7  ;;  %v6785_v47 = vld [vmem:[#allocation8 + $0x28] sm:$0xff]  }
 0x16f   :  { %2352 = vmatpush1.bf16.msra.mxu0 %v6687_v50  ;;  %v7739_v56 = vsub.s32 0, %v7736_v52  ;;  %v7742_v57 = vsub.s32 1, %v7736_v52 }
 0x170   :  { %2353 = vmatprep.subr.bf16.mxu0 %v6692_v53  ;;  %2395 = vmatpush1.bf16.msra.mxu1 %v6735_v49  ;;  %v419_v53 = vld [vmem:[#allocation19] sm:$0xf] }
 0x171   :  { %2396 = vmatprep.subr.bf16.mxu1 %v6740_v60  ;;  %v424_v4 = vrot.slane %v419_v53, %v7739_v56  ;;  %v428_v49 = vrot.slane %v419_v53, %v7742_v57 }
 0x173   :  { %2354 = vmatpush1.bf16.msra.mxu0 %v6690_v54 }
 0x174   :  { %2355 = vmatprep.subr.bf16.mxu0 %v6695_v55  ;;  %2397 = vmatpush1.bf16.msra.mxu1 %v6738_v62 }
 0x175   :  { %2398 = vmatprep.subr.bf16.mxu1 %v6743_v63 }
 0x177   :  { %2356 = vmatpush1.bf16.msra.mxu0 %v6693_v58 }
 0x178   :  { %2357 = vmatprep.subr.bf16.mxu0 %v6698_v59  ;;  %2399 = vmatpush1.bf16.msra.mxu1 %v6741_v1 }
 0x179   :  { %2400 = vmatprep.subr.bf16.mxu1 %v6746_v9 }
 0x17b   :  { %2358 = vmatpush1.bf16.msra.mxu0 %v6696_v11 }
 0x17c   :  { %2359 = vmatprep.subr.bf16.mxu0 %v6701_v61  ;;  %2401 = vmatpush1.bf16.msra.mxu1 %v6744_v12 }
 0x17d   :  { %2402 = vmatprep.subr.bf16.mxu1 %v6749_v15 }
 0x17f   :  { %2360 = vmatpush1.bf16.msra.mxu0 %v6699_v0 }
 0x180   :  { %2361 = vmatprep.subr.bf16.mxu0 %v6704_v35  ;;  %2403 = vmatpush1.bf16.msra.mxu1 %v6747_v17 }
 0x181   :  { %2404 = vmatprep.subr.bf16.mxu1 %v6752_v19 }
 0x183   :  { %2362 = vmatpush1.bf16.msra.mxu0 %v6702_v2 }
 0x184   :  { %2363 = vmatprep.subr.bf16.mxu0 %v6707_v3  ;;  %2405 = vmatpush1.bf16.msra.mxu1 %v6750_v20 }
 0x185   :  { %2406 = vmatprep.subr.bf16.mxu1 %v6755_v21 }
 0x187   :  { %2364 = vmatpush1.bf16.msra.mxu0 %v6705_v5 }
 0x188   :  { %2365 = vmatprep.subr.bf16.mxu0 %v6710_v6  ;;  %2407 = vmatpush1.bf16.msra.mxu1 %v6753_v23 }
 0x189   :  { %2408 = vmatprep.subr.bf16.mxu1 %v6758_v25 }
 0x18a   :  { %v1631_v54 = vpop.f32.mrf.mxu0 }
 0x18b   :  { %2366 = vmatpush2.bf16.msra.mxu0 %v6708_v7  ;;  %v1674_v50 = vpop.f32.mrf.mxu1  ;;  %v1632_v61 = vadd.f32 %v1631_v54, %v424_v4 }
 0x18c   :  { %2367 = vmatprep.subr.bf16.mxu0 %v6713_v8  ;;  %2409 = vmatpush2.bf16.msra.mxu1 %v6756_v27  ;;  %v1633_v58 = vpop.f32.mrf.mxu0 }
 0x18d   :  { %2410 = vmatprep.subr.bf16.mxu1 %v6761_v29  ;;  %v1676_v55 = vpop.f32.mrf.mxu1  ;;  %v1634_v63 = vadd.f32 %v1633_v58, %v428_v49  ;;  %v1675_v35 = vadd.f32 %v1674_v50, %v1632_v61  ;;  %v6786_v50 = vld [vmem:[#allocation8 + $0x60] sm:$0xff]  }
 0x18e   :  { %v1635_v60 = vpop.f32.mrf.mxu0  ;;  %v6787_v61 = vld [vmem:[#allocation8 + $0x20] sm:$0xff]  }
 0x18f   :  { %2368 = vmatpush2.bf16.msra.mxu0 %v6711_v10  ;;  %v1678_v59 = vpop.f32.mrf.mxu1  ;;  %v1636_v1 = vadd.f32 %v1635_v60, %v424_v4  ;;  %v1677_v5 = vadd.f32 %v1676_v55, %v1634_v63 }
 0x190   :  { %2369 = vmatprep.subr.bf16.mxu0 %v6716_v13  ;;  %2411 = vmatpush2.bf16.msra.mxu1 %v6759_v30  ;;  %v1637_v0 = vpop.f32.mrf.mxu0 }
 0x191   :  { %2412 = vmatprep.subr.bf16.mxu1 %v6764_v32  ;;  %v1680_v11 = vpop.f32.mrf.mxu1  ;;  %v1638_v6 = vadd.f32 %v1637_v0, %v428_v49  ;;  %v1679_v9 = vadd.f32 %v1678_v59, %v1636_v1  ;;  %v6788_v0 = vld [vmem:[#allocation8 + $0x58] sm:$0xff]  }
 0x193   :  { %2370 = vmatpush2.bf16.msra.mxu0 %v6714_v16  ;;  %v1681_v15 = vadd.f32 %v1680_v11, %v1638_v6 }
 0x194   :  { %2371 = vmatprep.subr.bf16.mxu0 %v6719_v18  ;;  %2413 = vmatpush2.bf16.msra.mxu1 %v6762_v34  ;;  %v6780_v34 = vld [vmem:[#allocation8 + $0x78] sm:$0xff]  }
 0x195   :  { %2414 = vmatprep.subr.bf16.mxu1 %v6767_v37  ;;  %v6782_v37 = vld [vmem:[#allocation8 + $0x70] sm:$0xff]  }
 0x197   :  { %2372 = vmatpush2.bf16.msra.mxu0 %v6717_v22 }
 0x198   :  { %2373 = vmatprep.subr.bf16.mxu0 %v6722_v24  ;;  %2415 = vmatpush2.bf16.msra.mxu1 %v6765_v39 }
 0x199   :  { %2416 = vmatprep.subr.bf16.mxu1 %v6770_v40 }
 0x19b   :  { %2374 = vmatpush2.bf16.msra.mxu0 %v6720_v26 }
 0x19c   :  { %2375 = vmatprep.subr.bf16.mxu0 %v6725_v28  ;;  %2417 = vmatpush2.bf16.msra.mxu1 %v6768_v41  ;;  %v6783_v41 = vld [vmem:[#allocation8 + $0x30] sm:$0xff]  }
 0x19d   :  { %2418 = vmatprep.subr.bf16.mxu1 %v6773_v42 }
 0x19f   :  { %2376 = vmatpush2.bf16.msra.mxu0 %v6723_v51 }
 0x1a0   :  { %2377 = vmatprep.subr.bf16.mxu0 %v6728_v31  ;;  %2419 = vmatpush2.bf16.msra.mxu1 %v6771_v43  ;;  %v6784_v43 = vld [vmem:[#allocation8 + $0x68] sm:$0xff]  }
 0x1a1   :  { %2420 = vmatprep.subr.bf16.mxu1 %v6776_v44 }
 0x1a3   :  { %2378 = vmatpush2.bf16.msra.mxu0 %v6726_v33  ;;  %v7747_v33 = vsub.s32 3, %v7736_v52 }
 0x1a4   :  { %2379 = vmatprep.subr.bf16.mxu0 %v6731_v36  ;;  %2421 = vmatpush2.bf16.msra.mxu1 %v6774_v45  ;;  %v6781_v36 = vld [vmem:[#allocation8 + $0x38] sm:$0xff]  }
 0x1a5   :  { %2422 = vmatprep.subr.bf16.mxu1 %v6779_v46  ;;  %v436_v42 = vrot.slane %v419_v53, %v7747_v33 }
 0x1a7   :  { %2380 = vmatpush2.bf16.msra.mxu0 %v6729_v38  ;;  %v7750_v38 = vsub.s32 2, %v7736_v52 }
 0x1a8   :  { %2423 = vmatpush2.bf16.msra.mxu1 %v6777_v48  ;;  %6160 = vmatprep.subr.bf16.mxu0 %v6780_v34 }
 0x1a9   :  { %v432_v44 = vrot.slane %v419_v53, %v7750_v38 }
 0x1ab   :  { %v1760_v62 = vpop.f32.mrf.mxu1 }
 0x1ad   :  { %v1762_v2 = vpop.f32.mrf.mxu1 }
 0x1af   :  { %v1764_v12 = vpop.f32.mrf.mxu1 }
 0x1b1   :  { %v1766_v22 = vpop.f32.mrf.mxu1 }
 0x1ca   :  { %v1717_v3 = vpop.f32.mrf.mxu0 }
 0x1cb   :  { %v1718_v7 = vadd.f32 %v1717_v3, %v1675_v35 }
 0x1cc   :  { %v1719_v8 = vpop.f32.mrf.mxu0 }
 0x1cd   :  { %v1720_v10 = vadd.f32 %v1719_v8, %v1677_v5  ;;  %v1761_v16 = vadd.f32 %v1760_v62, %v1718_v7  ;;  %v6789_v7 = vld [vmem:[#allocation8 + $0x18] sm:$0xff]  }
 0x1ce   :  { %v1721_v13 = vpop.f32.mrf.mxu0 }
 0x1cf   :  { %v1722_v17 = vadd.f32 %v1721_v13, %v1679_v9  ;;  %v1763_v19 = vadd.f32 %v1762_v2, %v1720_v10  ;;  %v1941_v23 = vmax.f32 %v1761_v16, 0.0 }
 0x1d0   :  { %v1723_v18 = vpop.f32.mrf.mxu0 }
 0x1d1   :  { %v1765_v20 = vadd.f32 %v1764_v12, %v1722_v17  ;;  %v1724_v21 = vadd.f32 %v1723_v18, %v1681_v15  ;;  %v1942_v26 = vmax.f32 %v1763_v19, 0.0 }
 0x1d3   :  { %v1945_v24 = vmax.f32 %v1765_v20, 0.0  ;;  %v1767_v25 = vadd.f32 %v1766_v22, %v1724_v21  ;;  %v6790_v22 = vld [vmem:[#allocation8 + $0x50] sm:$0xff]  }
 0x1d5   :  { %v1946_v27 = vmax.f32 %v1767_v25, 0.0  ;;  %v1949_v29 = vpack.c.bf16 %v1945_v24, %v1941_v23  ;;  %v6791_v23 = vld [vmem:[#allocation8 + $0x10] sm:$0xff]   ;;  %v6792_v24 = vld [vmem:[#allocation8 + $0x48] sm:$0xff]  }
 0x1d6   :  { %v6793_v25 = vld [vmem:[#allocation8 + $0x8] sm:$0xff]  }
 0x1d7   :  { %v1950_v28 = vpack.c.bf16 %v1946_v27, %v1942_v26  ;;  %v6794_v26 = vld [vmem:[#allocation8 + $0x40] sm:$0xff]  }
 0x1d8   :  { %v6795_v27 = vld [vmem:[#allocation8] sm:$0xff]  }
 0x1d9   :  { %2381 = vmatprep.mubr.bf16.mxu0 %v1950_v28  ;;  %v6796_v28 = vld [vmem:[#allocation10 + $0x38] sm:$0xff]  }
 0x1da   :  { %2382 = vmatmul.mubr.bf16.vlgmr.msra.gmra.mxu0 %v1949_v29  ;;  %v7592_v29 = vmov 0.0  }
 0x1db   :  { %6161 = vmatpush3.bf16.msra.mxu0 %v6781_v36  ;;  %6253 = vmatprep.subr.bf16.mxu1 %v7592_v29  ;;  %v2017_v36 = vld [vmem:[#allocation19 + $0x4] sm:$0x3] }
 0x1dc   :  { %6162 = vmatprep.subr.bf16.mxu0 %v6782_v37 }
 0x1df   :  { %6163 = vmatpush3.bf16.msra.mxu0 %v6783_v41 }
 0x1e0   :  { %6164 = vmatprep.subr.bf16.mxu0 %v6784_v43 }
 0x1e3   :  { %6165 = vmatpush3.bf16.msra.mxu0 %v6785_v47 }
 0x1e4   :  { %6166 = vmatprep.subr.bf16.mxu0 %v6786_v50 }
 0x1e7   :  { %6167 = vmatpush3.bf16.msra.mxu0 %v6787_v61 }
 0x1e8   :  { %6168 = vmatprep.subr.bf16.mxu0 %v6788_v0  ;;  %v6802_v0 = vld [vmem:[#allocation10 + $0x8] sm:$0xff]  }
 0x1eb   :  { %v1803_v51 = vpop.f32.mrf.mxu1  ;;  %6169 = vmatpush3.bf16.msra.mxu0 %v6789_v7 }
 0x1ec   :  { %v1804_v54 = vadd.f32 %v1803_v51, %v432_v44  ;;  %6170 = vmatprep.subr.bf16.mxu0 %v6790_v22  ;;  %v6797_v51 = vld [vmem:[#allocation10 + $0x30] sm:$0xff]   ;;  %v6810_v22 = vld [vmem:[#allocation11 + $0x8] sm:$0xff]  }
 0x1ed   :  { %v1805_v31 = vpop.f32.mrf.mxu1 }
 0x1ee   :  { %v1806_v48 = vadd.f32 %v1805_v31, %v436_v42  ;;  %v6799_v31 = vld [vmem:[#allocation10 + $0x20] sm:$0xff]  }
 0x1ef   :  { %v1807_v39 = vpop.f32.mrf.mxu1  ;;  %6171 = vmatpush3.bf16.msra.mxu0 %v6791_v23  ;;  %v6811_v23 = vld [vmem:[#allocation11] sm:$0xff]  }
 0x1f0   :  { %v1808_v59 = vadd.f32 %v1807_v39, %v432_v44  ;;  %6172 = vmatprep.subr.bf16.mxu0 %v6792_v24  ;;  %v2026_v39 = vrot.slane %v2017_v36, %v7742_v57  ;;  %v6812_v24 = vld [vmem:[#allocation13 + $0x38] sm:$0xff]  }
 0x1f1   :  { %v1809_v45 = vpop.f32.mrf.mxu1 }
 0x1f2   :  { %v1810_v62 = vadd.f32 %v1809_v45, %v436_v42 }
 0x1f3   :  { %6173 = vmatpush3.bf16.msra.mxu0 %v6793_v25  ;;  %v6813_v25 = vld [vmem:[#allocation13 + $0x30] sm:$0xff]  }
 0x1f4   :  { %6174 = vmatprep.subr.bf16.mxu0 %v6794_v26  ;;  %v6814_v26 = vld [vmem:[#allocation13 + $0x28] sm:$0xff]  }
 0x1f7   :  { %6175 = vmatpush3.bf16.msra.mxu0 %v6795_v27  ;;  %v6815_v27 = vld [vmem:[#allocation13 + $0x20] sm:$0xff]  }
 0x1f8   :  { %6273 = vmatprep.subr.bf16.mxu0 %v7592_v29 }
 0x20a   :  { %v1846_v30 = vpop.f32.mrf.mxu0 }
 0x20b   :  { %v1847_v49 = vadd.f32 %v1846_v30, %v1804_v54  ;;  %v6798_v30 = vld [vmem:[#allocation10 + $0x28] sm:$0xff]  }
 0x20c   :  { %v1848_v32 = vpop.f32.mrf.mxu0 }
 0x20d   :  { %v1849_v4 = vadd.f32 %v1848_v32, %v1806_v48 }
 0x20e   :  { %v1850_v40 = vpop.f32.mrf.mxu0 }
 0x20f   :  { %v1851_v63 = vadd.f32 %v1850_v40, %v1808_v59  ;;  %v2022_v40 = vrot.slane %v2017_v36, %v7739_v56 }
 0x210   :  { %v1852_v46 = vpop.f32.mrf.mxu0 }
 0x211   :  { %v1853_v3 = vadd.f32 %v1852_v46, %v1810_v62 }
 0x22a   :  { %v1932_v58 = vpop.f32.mrf.mxu0 }
 0x22b   :  { %v1889_v55 = vpop.f32.mrf.mxu1 }
 0x22c   :  { %v1934_v11 = vpop.f32.mrf.mxu0  ;;  %v1890_v35 = vadd.f32 %v1889_v55, %v1847_v49 }
 0x22d   :  { %v1891_v60 = vpop.f32.mrf.mxu1 }
 0x22e   :  { %v1892_v53 = vadd.f32 %v1891_v60, %v1849_v4  ;;  %v1936_v2 = vpop.f32.mrf.mxu0  ;;  %v1933_v12 = vadd.f32 %v1932_v58, %v1890_v35  ;;  %v6803_v35 = vld [vmem:[#allocation10] sm:$0xff]  }
 0x22f   :  { %v1893_v1 = vpop.f32.mrf.mxu1 }
 0x230   :  { %v1894_v5 = vadd.f32 %v1893_v1, %v1851_v63  ;;  %v1935_v8 = vadd.f32 %v1934_v11, %v1892_v53  ;;  %v1938_v13 = vpop.f32.mrf.mxu0  ;;  %v1943_v19 = vmax.f32 %v1933_v12, 0.0  ;;  %v6800_v63 = vld [vmem:[#allocation10 + $0x18] sm:$0xff]   ;;  %v6801_v53 = vld [vmem:[#allocation10 + $0x10] sm:$0xff]  }
 0x231   :  { %v1895_v6 = vpop.f32.mrf.mxu1  ;;  %v6804_v1 = vld [vmem:[#allocation11 + $0x38] sm:$0xff]  }
 0x232   :  { %v1937_v9 = vadd.f32 %v1936_v2, %v1894_v5  ;;  %v1896_v10 = vadd.f32 %v1895_v6, %v1853_v3  ;;  %v1944_v17 = vmax.f32 %v1935_v8, 0.0  ;;  %v6805_v2 = vld [vmem:[#allocation11 + $0x30] sm:$0xff]   ;;  %v6806_v3 = vld [vmem:[#allocation11 + $0x28] sm:$0xff]   ;;  %v6807_v5 = vld [vmem:[#allocation11 + $0x20] sm:$0xff]  }
 0x233   :  { %v6808_v6 = vld [vmem:[#allocation11 + $0x18] sm:$0xff]  }
 0x234   :  { %v1939_v15 = vadd.f32 %v1938_v13, %v1896_v10  ;;  %v1947_v16 = vmax.f32 %v1937_v9, 0.0  ;;  %v5812_v10 = vld [vmem:[#allocation19 + $0x6] ss:$0 sm:$0xff] }
 0x236   :  { %v1948_v18 = vmax.f32 %v1939_v15, 0.0  ;;  %v1951_v21 = vpack.c.bf16 %v1947_v16, %v1943_v19 }
 0x238   :  { %v1952_v20 = vpack.c.bf16 %v1948_v18, %v1944_v17 }
 0x23a   :  { %2424 = vmatprep.mubr.bf16.mxu1 %v1952_v20 }
 0x23b   :  { %2425 = vmatmul.mubr.bf16.vlgmr.msra.gmra.mxu1 %v1951_v21  ;;  %v6809_v21 = vld [vmem:[#allocation11 + $0x10] sm:$0xff]  }
 0x23c   :  { %6254 = vmatpush3.bf16.msra.mxu1 %v6796_v28  ;;  %6269 = vmatprep.mubr.msk.bf16.mxu1 %vm7593_vm0, %v7592_v29  ;;  %v6816_v28 = vld [vmem:[#allocation13 + $0x18] sm:$0xff]  }
 0x23d   :  { %6255 = vmatprep.subr.bf16.mxu1 %v7592_v29 }
 0x240   :  { %6256 = vmatpush3.bf16.msra.mxu1 %v6797_v51  ;;  %v5829_v51 = vld [vmem:[#allocation19 + $0x7] ss:$0 sm:$0xff] }
 0x241   :  { %6257 = vmatprep.subr.bf16.mxu1 %v7592_v29 }
 0x244   :  { %6258 = vmatpush3.bf16.msra.mxu1 %v6798_v30 }
 0x245   :  { %6259 = vmatprep.subr.bf16.mxu1 %v7592_v29 }
 0x248   :  { %6260 = vmatpush3.bf16.msra.mxu1 %v6799_v31 }
 0x249   :  { %6261 = vmatprep.subr.bf16.mxu1 %v7592_v29 }
 0x24c   :  { %6262 = vmatpush3.bf16.msra.mxu1 %v6800_v63 }
 0x24d   :  { %6263 = vmatprep.subr.bf16.mxu1 %v7592_v29 }
 0x250   :  { %6264 = vmatpush3.bf16.msra.mxu1 %v6801_v53 }
 0x251   :  { %6265 = vmatprep.subr.bf16.mxu1 %v7592_v29 }
 0x254   :  { %6266 = vmatpush3.bf16.msra.mxu1 %v6802_v0 }
 0x255   :  { %6267 = vmatprep.subr.bf16.mxu1 %v7592_v29 }
 0x258   :  { %6268 = vmatpush3.bf16.msra.mxu1 %v6803_v35 }
 0x259   :  { %6293 = vmatprep.subr.bf16.mxu1 %v7592_v29 }
 0x29a   :  { %v2383_v32 = vpop.f32.mrf.mxu0 }
 0x29b   :  { %v2384_v46 = vadd.f32 %v2383_v32, %v2022_v40 }
 0x29c   :  { %v2385_v34 = vpop.f32.mrf.mxu0 }
 0x29d   :  { %v2386_v44 = vadd.f32 %v2385_v34, %v2026_v39 }
 0x29e   :  { %v2387_v37 = vpop.f32.mrf.mxu0 }
 0x29f   :  { %v2388_v45 = vadd.f32 %v2387_v37, %v2022_v40 }
 0x2a0   :  { %v2389_v42 = vpop.f32.mrf.mxu0 }
 0x2a1   :  { %v2390_v48 = vadd.f32 %v2389_v42, %v2026_v39  ;;  %v6817_v42 = vld [vmem:[#allocation13 + $0x10] sm:$0xff]  }
 0x2fb   :  { %v2426_v41 = vpop.f32.mrf.mxu1 }
 0x2fc   :  { %v2427_v55 = vadd.f32 %v2426_v41, %v2384_v46  ;;  %v6822_v46 = vld [vmem:[#allocation14 + $0x74] ss:$8 sps:$4 sm:$0xff]  }
 0x2fd   :  { %v2428_v43 = vpop.f32.mrf.mxu1 }
 0x2fe   :  { %v2429_v50 = vadd.f32 %v2428_v43, %v2386_v44  ;;  %v2435_v11 = vmax.f32 %v2427_v55, 0.0  ;;  %v6818_v43 = vld [vmem:[#allocation13 + $0x8] sm:$0xff]   ;;  %v6819_v44 = vld [vmem:[#allocation13] sm:$0xff]  }
 0x2ff   :  { %v2430_v47 = vpop.f32.mrf.mxu1  ;;  %v6829_v55 = vld [vmem:[#allocation14 + $0x40] ss:$8 sps:$4 sm:$0xff]  }
 0x300   :  { %v2431_v54 = vadd.f32 %v2430_v47, %v2388_v45  ;;  %v2436_v49 = vmax.f32 %v2429_v50, 0.0  ;;  %v6820_v45 = vld [vmem:[#allocation14 + $0x70] ss:$8 sps:$4 sm:$0xff]   ;;  %v6825_v47 = vld [vmem:[#allocation14 + $0x64] ss:$8 sps:$4 sm:$0xff]  }
 0x301   :  { %v2432_v58 = vpop.f32.mrf.mxu1  ;;  %v6828_v50 = vld [vmem:[#allocation14 + $0x54] ss:$8 sps:$4 sm:$0xff]  }
 0x302   :  { %v2433_v59 = vadd.f32 %v2432_v58, %v2390_v48  ;;  %v2437_v4 = vmax.f32 %v2431_v54, 0.0  ;;  %v6823_v48 = vld [vmem:[#allocation14 + $0x60] ss:$8 sps:$4 sm:$0xff]   ;;  %v6831_v54 = vld [vmem:[#allocation14 + $0x44] ss:$8 sps:$4 sm:$0xff]  }
 0x303   :  { %v6834_v58 = vld [vmem:[#allocation14 + $0x34] ss:$8 sps:$4 sm:$0xff]  }
 0x304   :  { %v2438_v60 = vmax.f32 %v2433_v59, 0.0  ;;  %v2439_v62 = vpack.c.bf16 %v2437_v4, %v2435_v11  ;;  %v6837_v59 = vld [vmem:[#allocation14 + $0x24] ss:$8 sps:$4 sm:$0xff]   ;;  %v6835_v4 = vld [vmem:[#allocation14 + $0x20] ss:$8 sps:$4 sm:$0xff]  }
 0x306   :  { %v2440_v61 = vpack.c.bf16 %v2438_v60, %v2436_v49  ;;  %v5838_v49 = vld [vmem:[#allocation19 + $0x8] ss:$0 sm:$0xff] }
 0x308   :  { %2608 = vmatprep.mubr.bf16.mxu0 %v2440_v61 }
 0x309   :  { %2609 = vmatmul.mubr.bf16.vlgmr.msra.gmra.mxu0 %v2439_v62 }
 0x30a   :  { %6289 = vmatprep.mubr.msk.bf16.mxu0 %vm7593_vm0, %v7592_v29  ;;  %6274 = vmatpush3.bf16.msra.mxu0 %v6804_v1 }
 0x30b   :  { %6275 = vmatprep.subr.bf16.mxu0 %v7592_v29 }
 0x30e   :  { %6276 = vmatpush3.bf16.msra.mxu0 %v6805_v2  ;;  %v6840_v2 = vld [vmem:[#allocation14 + $0x14] ss:$8 sps:$4 sm:$0xff]  }
 0x30f   :  { %6277 = vmatprep.subr.bf16.mxu0 %v7592_v29 }
 0x312   :  { %6278 = vmatpush3.bf16.msra.mxu0 %v6806_v3  ;;  %v6838_v3 = vld [vmem:[#allocation14 + $0x10] ss:$8 sps:$4 sm:$0xff]  }
 0x313   :  { %6279 = vmatprep.subr.bf16.mxu0 %v7592_v29 }
 0x316   :  { %6280 = vmatpush3.bf16.msra.mxu0 %v6807_v5  ;;  %v6843_v5 = vld [vmem:[#allocation14 + $0x4] ss:$8 sps:$4 sm:$0xff]  }
 0x317   :  { %6281 = vmatprep.subr.bf16.mxu0 %v7592_v29 }
 0x31a   :  { %6282 = vmatpush3.bf16.msra.mxu0 %v6808_v6  ;;  %v6841_v6 = vld [vmem:[#allocation14] ss:$8 sps:$4 sm:$0xff]  }
 0x31b   :  { %6283 = vmatprep.subr.bf16.mxu0 %v7592_v29 }
 0x31e   :  { %6284 = vmatpush3.bf16.msra.mxu0 %v6809_v21  ;;  %v6874_v21 = vld [vmem:[#allocation16 + $0x40] ss:$16 sps:$4 sm:$0xff]  }
 0x31f   :  { %6285 = vmatprep.subr.bf16.mxu0 %v7592_v29 }
 0x322   :  { %6286 = vmatpush3.bf16.msra.mxu0 %v6810_v22  ;;  %v6882_v22 = vld [vmem:[#allocation16 + $0x24] ss:$16 sps:$4 sm:$0xff]  }
 0x323   :  { %6287 = vmatprep.subr.bf16.mxu0 %v7592_v29 }
 0x326   :  { %6288 = vmatpush3.bf16.msra.mxu0 %v6811_v23  ;;  %v6880_v23 = vld [vmem:[#allocation16 + $0x20] ss:$16 sps:$4 sm:$0xff]  }
 0x327   :  { %3073 = vmatprep.subr.bf16.mxu0 %v6822_v46 }
 0x3c9   :  { %v6176_v7 = vpop.f32.mrf.mxu0 }
 0x3cb   :  { %v6177_v8 = vpop.f32.mrf.mxu0 }
 0x3cc   :  { %v6178_v9 = vadd.f32 %v6177_v8, %v6176_v7  ;;  %v6844_v7 = vld [vmem:[#allocation16 + $0xe0] ss:$16 sps:$4 sm:$0xff]   ;;  %v6846_v8 = vld [vmem:[#allocation16 + $0xe4] ss:$16 sps:$4 sm:$0xff]  }
 0x3cd   :  { %v6179_v12 = vpop.f32.mrf.mxu0 }
 0x3ce   :  { %v2611_v15 = vadd.f32 %v6178_v9, %v5812_v10  ;;  %v6849_v9 = vld [vmem:[#allocation16 + $0xec] ss:$16 sps:$4 sm:$0xff]  }
 0x3cf   :  { %v6180_v13 = vpop.f32.mrf.mxu0 }
 0x3d0   :  { %v6181_v16 = vadd.f32 %v6180_v13, %v6179_v12  ;;  %v2617_v18 = vmax.f32 %v2611_v15, 0.0  ;;  %v6850_v12 = vld [vmem:[#allocation16 + $0xc0] ss:$16 sps:$4 sm:$0xff]   ;;  %v6858_v13 = vld [vmem:[#allocation16 + $0xa4] ss:$16 sps:$4 sm:$0xff]  }
 0x3d1   :  { %v6856_v15 = vld [vmem:[#allocation16 + $0xa0] ss:$16 sps:$4 sm:$0xff]  }
 0x3d2   :  { %v2614_v17 = vadd.f32 %v6181_v16, %v5812_v10  ;;  %v6852_v10 = vld [vmem:[#allocation16 + $0xc4] ss:$16 sps:$4 sm:$0xff]  }
 0x3d3   :  { %v6864_v16 = vld [vmem:[#allocation16 + $0x84] ss:$16 sps:$4 sm:$0xff]  }
 0x3d4   :  { %v2618_v19 = vmax.f32 %v2614_v17, 0.0  ;;  %v6862_v17 = vld [vmem:[#allocation16 + $0x80] ss:$16 sps:$4 sm:$0xff]  }
 0x3d6   :  { %v2619_v20 = vpack.c.bf16 %v2618_v19, %v2617_v18  ;;  %v6870_v18 = vld [vmem:[#allocation16 + $0x64] ss:$16 sps:$4 sm:$0xff]   ;;  %v6868_v19 = vld [vmem:[#allocation16 + $0x60] ss:$16 sps:$4 sm:$0xff]  }
 0x3d8   :  { %6270 = vmatmul.mubr.bf16.vlgmr.msra.gmra.mxu1 %v2619_v20  ;;  %v6876_v20 = vld [vmem:[#allocation16 + $0x44] ss:$16 sps:$4 sm:$0xff]  }
 0x3d9   :  { %6309 = vmatprep.mubr.msk.bf16.mxu1 %vm7593_vm0, %v7592_v29  ;;  %6294 = vmatpush3.bf16.msra.mxu1 %v6812_v24  ;;  %v6888_v24 = vld [vmem:[#allocation16 + $0x4] ss:$16 sps:$4 sm:$0xff]  }
 0x3da   :  { %6295 = vmatprep.subr.bf16.mxu1 %v7592_v29 }
 0x3dd   :  { %6296 = vmatpush3.bf16.msra.mxu1 %v6813_v25  ;;  %v6886_v25 = vld [vmem:[#allocation16] ss:$16 sps:$4 sm:$0xff]  }
 0x3de   :  { %6297 = vmatprep.subr.bf16.mxu1 %v7592_v29 }
 0x3e1   :  { %6298 = vmatpush3.bf16.msra.mxu1 %v6814_v26  ;;  %v6894_v26 = vld [vmem:[#allocation16 + $0x1e4] ss:$16 sps:$4 sm:$0xff]  }
 0x3e2   :  { %6299 = vmatprep.subr.bf16.mxu1 %v7592_v29 }
 0x3e5   :  { %6300 = vmatpush3.bf16.msra.mxu1 %v6815_v27  ;;  %v6892_v27 = vld [vmem:[#allocation16 + $0x1e0] ss:$16 sps:$4 sm:$0xff]  }
 0x3e6   :  { %6301 = vmatprep.subr.bf16.mxu1 %v7592_v29 }
 0x3e9   :  { %6302 = vmatpush3.bf16.msra.mxu1 %v6816_v28  ;;  %v6900_v28 = vld [vmem:[#allocation16 + $0x1c4] ss:$16 sps:$4 sm:$0xff]  }
 0x3ea   :  { %6303 = vmatprep.subr.bf16.mxu1 %v7592_v29 }
 0x3ed   :  { %6304 = vmatpush3.bf16.msra.mxu1 %v6817_v42 }
 0x3ee   :  { %6305 = vmatprep.subr.bf16.mxu1 %v7592_v29 }
 0x3f1   :  { %6306 = vmatpush3.bf16.msra.mxu1 %v6818_v43 }
 0x3f2   :  { %6307 = vmatprep.subr.bf16.mxu1 %v7592_v29  ;;  %v6832_v29 = vld [vmem:[#allocation14 + $0x30] ss:$8 sps:$4 sm:$0xff]  }
 0x3f5   :  { %6308 = vmatpush3.bf16.msra.mxu1 %v6819_v44 }
 0x3f6   :  { %3528 = vmatprep.subr.bf16.mxu1 %v6846_v8  ;;  %v6921_v8 = vld [vmem:[#allocation16 + $0x16c] ss:$16 sps:$4 sm:$0xff]  }
 0x498   :  { %v2725_v30 = vpop.f32.mrf.mxu1 }
 0x499   :  { %v2726_v32 = vadd.f32 %v5829_v51, %v2725_v30  ;;  %v6906_v30 = vld [vmem:[#allocation16 + $0x1a4] ss:$16 sps:$4 sm:$0xff]  }
 0x49a   :  { %v6271_v31 = vpop.f32.mrf.mxu1 }
 0x49b   :  { %v2732_v39 = vmax.f32 %v2726_v32, 0.0  ;;  %v6904_v31 = vld [vmem:[#allocation16 + $0x1a0] ss:$16 sps:$4 sm:$0xff]   ;;  %v6912_v32 = vld [vmem:[#allocation16 + $0x184] ss:$16 sps:$4 sm:$0xff]  }
 0x49c   :  { %v2728_v34 = vpop.f32.mrf.mxu1 }
 0x49d   :  { %v2729_v36 = vadd.f32 %v5829_v51, %v2728_v34  ;;  %v6898_v51 = vld [vmem:[#allocation16 + $0x1c0] ss:$16 sps:$4 sm:$0xff]  }
 0x49e   :  { %v6272_v37 = vpop.f32.mrf.mxu1  ;;  %v6910_v34 = vld [vmem:[#allocation16 + $0x180] ss:$16 sps:$4 sm:$0xff]  }
 0x49f   :  { %v2733_v40 = vmax.f32 %v2729_v36, 0.0  ;;  %v6918_v36 = vld [vmem:[#allocation16 + $0x164] ss:$16 sps:$4 sm:$0xff]   ;;  %v6916_v37 = vld [vmem:[#allocation16 + $0x160] ss:$16 sps:$4 sm:$0xff]  }
 0x4a1   :  { %v2734_v41 = vpack.c.bf16 %v2733_v40, %v2732_v39  ;;  %v5847_v39 = vld [vmem:[#allocation19 + $0x9] ss:$0 sm:$0xff] }
 0x4a3   :  { %6290 = vmatmul.mubr.bf16.vlgmr.msra.gmra.mxu0 %v2734_v41 }
 0x4a4   :  { %3105 = vmatprep.mubr.bf16.mxu0 %v7591_v14  ;;  %3074 = vmatpush1.bf16.msra.mxu0 %v6820_v45  ;;  %v6826_v14 = vld [vmem:[#allocation14 + $0x50] ss:$8 sps:$4 sm:$0xff]  }
 0x4a5   :  { %3075 = vmatprep.subr.bf16.mxu0 %v6825_v47 }
 0x4a8   :  { %3076 = vmatpush1.bf16.msra.mxu0 %v6823_v48  ;;  %v6847_v48 = vld [vmem:[#allocation16 + $0xe8] ss:$16 sps:$4 sm:$0xff]  }
 0x4a9   :  { %3077 = vmatprep.subr.bf16.mxu0 %v6828_v50 }
 0x4ac   :  { %3078 = vmatpush1.bf16.msra.mxu0 %v6826_v14  ;;  %v6855_v14 = vld [vmem:[#allocation16 + $0xcc] ss:$16 sps:$4 sm:$0xff]  }
 0x4ad   :  { %3079 = vmatprep.subr.bf16.mxu0 %v6831_v54  ;;  %v6853_v54 = vld [vmem:[#allocation16 + $0xc8] ss:$16 sps:$4 sm:$0xff]  }
 0x4b0   :  { %3080 = vmatpush1.bf16.msra.mxu0 %v6829_v55  ;;  %v6861_v55 = vld [vmem:[#allocation16 + $0xac] ss:$16 sps:$4 sm:$0xff]  }
 0x4b1   :  { %3081 = vmatprep.subr.bf16.mxu0 %v6834_v58  ;;  %v6859_v58 = vld [vmem:[#allocation16 + $0xa8] ss:$16 sps:$4 sm:$0xff]  }
 0x4b4   :  { %3082 = vmatpush1.bf16.msra.mxu0 %v6832_v29  ;;  %v6867_v29 = vld [vmem:[#allocation16 + $0x8c] ss:$16 sps:$4 sm:$0xff]  }
 0x4b5   :  { %3083 = vmatprep.subr.bf16.mxu0 %v6837_v59  ;;  %v6865_v59 = vld [vmem:[#allocation16 + $0x88] ss:$16 sps:$4 sm:$0xff]  }
 0x4b8   :  { %3084 = vmatpush1.bf16.msra.mxu0 %v6835_v4  ;;  %v6873_v4 = vld [vmem:[#allocation16 + $0x6c] ss:$16 sps:$4 sm:$0xff]  }
 0x4b9   :  { %3085 = vmatprep.subr.bf16.mxu0 %v6840_v2  ;;  %v6901_v2 = vld [vmem:[#allocation16 + $0x1c8] ss:$16 sps:$4 sm:$0xff]  }
 0x4bc   :  { %3086 = vmatpush1.bf16.msra.mxu0 %v6838_v3  ;;  %v6909_v3 = vld [vmem:[#allocation16 + $0x1ac] ss:$16 sps:$4 sm:$0xff]  }
 0x4bd   :  { %3087 = vmatprep.subr.bf16.mxu0 %v6843_v5  ;;  %v6907_v5 = vld [vmem:[#allocation16 + $0x1a8] ss:$16 sps:$4 sm:$0xff]  }
 0x4c0   :  { %3088 = vmatpush1.bf16.msra.mxu0 %v6841_v6  ;;  %v6915_v6 = vld [vmem:[#allocation16 + $0x18c] ss:$16 sps:$4 sm:$0xff]  }
 0x4c1   :  { %3571 = vmatprep.subr.bf16.mxu0 %v6849_v9  ;;  %v6919_v9 = vld [vmem:[#allocation16 + $0x168] ss:$16 sps:$4 sm:$0xff]  }
 0x563   :  { %v2840_v60 = vpop.f32.mrf.mxu0 }
 0x564   :  { %v2841_v61 = vadd.f32 %v5838_v49, %v2840_v60  ;;  %v6879_v60 = vld [vmem:[#allocation16 + $0x4c] ss:$16 sps:$4 sm:$0xff]  }
 0x565   :  { %v6291_v11 = vpop.f32.mrf.mxu0 }
 0x566   :  { %v2847_v0 = vmax.f32 %v2841_v61, 0.0  ;;  %v6877_v11 = vld [vmem:[#allocation16 + $0x48] ss:$16 sps:$4 sm:$0xff]   ;;  %v6885_v61 = vld [vmem:[#allocation16 + $0x2c] ss:$16 sps:$4 sm:$0xff]  }
 0x567   :  { %v2843_v62 = vpop.f32.mrf.mxu0 }
 0x568   :  { %v2844_v63 = vadd.f32 %v5838_v49, %v2843_v62  ;;  %v6871_v49 = vld [vmem:[#allocation16 + $0x68] ss:$16 sps:$4 sm:$0xff]  }
 0x569   :  { %v6292_v53 = vpop.f32.mrf.mxu0  ;;  %v6883_v62 = vld [vmem:[#allocation16 + $0x28] ss:$16 sps:$4 sm:$0xff]  }
 0x56a   :  { %v2848_v35 = vmax.f32 %v2844_v63, 0.0  ;;  %v6891_v63 = vld [vmem:[#allocation16 + $0xc] ss:$16 sps:$4 sm:$0xff]   ;;  %v6889_v53 = vld [vmem:[#allocation16 + $0x8] ss:$16 sps:$4 sm:$0xff]  }
 0x56c   :  { %v2849_v1 = vpack.c.bf16 %v2848_v35, %v2847_v0  ;;  %v6897_v0 = vld [vmem:[#allocation16 + $0x1ec] ss:$16 sps:$4 sm:$0xff]   ;;  %v6895_v35 = vld [vmem:[#allocation16 + $0x1e8] ss:$16 sps:$4 sm:$0xff]  }
 0x56e   :  { %6310 = vmatmul.mubr.bf16.vlgmr.msra.gmra.mxu1 %v2849_v1  ;;  %v6903_v1 = vld [vmem:[#allocation16 + $0x1cc] ss:$16 sps:$4 sm:$0xff]  }
 0x56f   :  { %3529 = vmatpush1.bf16.msra.mxu1 %v6844_v7  ;;  %v6913_v7 = vld [vmem:[#allocation16 + $0x188] ss:$16 sps:$4 sm:$0xff]  }
 0x570   :  { %3530 = vmatprep.subr.bf16.mxu1 %v6852_v10  ;;  %v6924_v10 = vld [vmem:[#allocation16 + $0x144] ss:$16 sps:$4 sm:$0xff]  }
 0x573   :  { %3531 = vmatpush1.bf16.msra.mxu1 %v6850_v12  ;;  %v6927_v12 = vld [vmem:[#allocation16 + $0x14c] ss:$16 sps:$4 sm:$0xff]  }
 0x574   :  { %3532 = vmatprep.subr.bf16.mxu1 %v6858_v13  ;;  %v6922_v13 = vld [vmem:[#allocation16 + $0x140] ss:$16 sps:$4 sm:$0xff]  }
 0x577   :  { %3533 = vmatpush1.bf16.msra.mxu1 %v6856_v15  ;;  %v6925_v15 = vld [vmem:[#allocation16 + $0x148] ss:$16 sps:$4 sm:$0xff]  }
 0x578   :  { %3534 = vmatprep.subr.bf16.mxu1 %v6864_v16  ;;  %v6930_v16 = vld [vmem:[#allocation16 + $0x124] ss:$16 sps:$4 sm:$0xff]  }
 0x57b   :  { %3535 = vmatpush1.bf16.msra.mxu1 %v6862_v17  ;;  %v6933_v17 = vld [vmem:[#allocation16 + $0x12c] ss:$16 sps:$4 sm:$0xff]  }
 0x57c   :  { %3536 = vmatprep.subr.bf16.mxu1 %v6870_v18  ;;  %v6928_v18 = vld [vmem:[#allocation16 + $0x120] ss:$16 sps:$4 sm:$0xff]  }
 0x57f   :  { %3537 = vmatpush1.bf16.msra.mxu1 %v6868_v19  ;;  %v6931_v19 = vld [vmem:[#allocation16 + $0x128] ss:$16 sps:$4 sm:$0xff]  }
 0x580   :  { %3538 = vmatprep.subr.bf16.mxu1 %v6876_v20  ;;  %v6936_v20 = vld [vmem:[#allocation16 + $0x104] ss:$16 sps:$4 sm:$0xff]  }
 0x583   :  { %3539 = vmatpush1.bf16.msra.mxu1 %v6874_v21  ;;  %v6939_v21 = vld [vmem:[#allocation16 + $0x10c] ss:$16 sps:$4 sm:$0xff]  }
 0x584   :  { %3540 = vmatprep.subr.bf16.mxu1 %v6882_v22  ;;  %v6934_v22 = vld [vmem:[#allocation16 + $0x100] ss:$16 sps:$4 sm:$0xff]  }
 0x587   :  { %3541 = vmatpush1.bf16.msra.mxu1 %v6880_v23  ;;  %v6937_v23 = vld [vmem:[#allocation16 + $0x108] ss:$16 sps:$4 sm:$0xff]  }
 0x588   :  { %3542 = vmatprep.subr.bf16.mxu1 %v6888_v24  ;;  %v6942_v24 = vld [vmem:[#allocation17 + $0x18c] ss:$28 sps:$4 sm:$0xff]  }
 0x58b   :  { %3543 = vmatpush1.bf16.msra.mxu1 %v6886_v25  ;;  %v6945_v25 = vld [vmem:[#allocation17 + $0x50c] ss:$28 sps:$4 sm:$0xff]  }
 0x58c   :  { %3544 = vmatprep.subr.bf16.mxu1 %v6894_v26  ;;  %v2981_v26 = vld [vmem:[#allocation19 + $0xa] sm:$0x3] }
 0x58f   :  { %3545 = vmatpush2.bf16.msra.mxu1 %v6892_v27 }
 0x590   :  { %3546 = vmatprep.subr.bf16.mxu1 %v6900_v28  ;;  %v2990_v28 = vrot.slane %v2981_v26, %v7742_v57 }
 0x593   :  { %3547 = vmatpush2.bf16.msra.mxu1 %v6898_v51  ;;  %v2986_v51 = vrot.slane %v2981_v26, %v7739_v56  ;;  %v7008_v26 = vld [vmem:[#allocation17 + $0x2a4] ss:$28 sps:$4 sm:$0xff]  }
 0x594   :  { %3548 = vmatprep.subr.bf16.mxu1 %v6906_v30 }
 0x597   :  { %3549 = vmatpush2.bf16.msra.mxu1 %v6904_v31 }
 0x598   :  { %3550 = vmatprep.subr.bf16.mxu1 %v6912_v32 }
 0x59b   :  { %3551 = vmatpush2.bf16.msra.mxu1 %v6910_v34 }
 0x59c   :  { %3552 = vmatprep.subr.bf16.mxu1 %v6918_v36 }
 0x59f   :  { %3553 = vmatpush2.bf16.msra.mxu1 %v6916_v37 }
 0x5a0   :  { %3554 = vmatprep.subr.bf16.mxu1 %v6924_v10  ;;  %v6982_v10 = vld [vmem:[#allocation17] ss:$28 sps:$4 sm:$0xff]  }
 0x5a3   :  { %3555 = vmatpush2.bf16.msra.mxu1 %v6922_v13  ;;  %v6990_v13 = vld [vmem:[#allocation17 + $0x34c] ss:$28 sps:$4 sm:$0xff]  }
 0x5a4   :  { %3556 = vmatprep.subr.bf16.mxu1 %v6930_v16  ;;  %v6988_v16 = vld [vmem:[#allocation17 + $0x348] ss:$28 sps:$4 sm:$0xff]  }
 0x5a7   :  { %3557 = vmatpush2.bf16.msra.mxu1 %v6928_v18  ;;  %v6996_v18 = vld [vmem:[#allocation17 + $0x314] ss:$28 sps:$4 sm:$0xff]  }
 0x5a8   :  { %3558 = vmatprep.subr.bf16.mxu1 %v6936_v20  ;;  %v6994_v20 = vld [vmem:[#allocation17 + $0x310] ss:$28 sps:$4 sm:$0xff]  }
 0x5ab   :  { %3559 = vmatpush2.bf16.msra.mxu1 %v6934_v22  ;;  %v7002_v22 = vld [vmem:[#allocation17 + $0x2dc] ss:$28 sps:$4 sm:$0xff]  }
 0x5ac   :  { %5071 = vmatprep.subr.bf16.mxu1 %v6942_v24  ;;  %v7000_v24 = vld [vmem:[#allocation17 + $0x2d8] ss:$28 sps:$4 sm:$0xff]  }
 0x62e   :  { %v2955_v40 = vpop.f32.mrf.mxu1 }
 0x62f   :  { %v2956_v42 = vadd.f32 %v5847_v39, %v2955_v40 }
 0x630   :  { %v6311_v41 = vpop.f32.mrf.mxu1 }
 0x631   :  { %v2962_v46 = vmax.f32 %v2956_v42, 0.0 }
 0x632   :  { %v2958_v43 = vpop.f32.mrf.mxu1 }
 0x633   :  { %v2959_v44 = vadd.f32 %v5847_v39, %v2958_v43 }
 0x634   :  { %v6312_v45 = vpop.f32.mrf.mxu1 }
 0x635   :  { %v2963_v47 = vmax.f32 %v2959_v44, 0.0  ;;  %v6940_v45 = vld [vmem:[#allocation17 + $0x188] ss:$28 sps:$4 sm:$0xff]  }
 0x637   :  { %v2964_v50 = vpack.c.bf16 %v2963_v47, %v2962_v46  ;;  %v6943_v46 = vld [vmem:[#allocation17 + $0x508] ss:$28 sps:$4 sm:$0xff]  }
 0x639   :  { %3106 = vmatmul.mubr.bf16.vlgmr.msra.gmra.mxu0 %v2964_v50  ;;  %v6951_v50 = vld [vmem:[#allocation17 + $0x4d4] ss:$28 sps:$4 sm:$0xff]  }
 0x63a   :  { %3572 = vmatpush1.bf16.msra.mxu0 %v6847_v48  ;;  %v6948_v48 = vld [vmem:[#allocation17 + $0x154] ss:$28 sps:$4 sm:$0xff]  }
 0x63b   :  { %3573 = vmatprep.subr.bf16.mxu0 %v6855_v14  ;;  %v6946_v14 = vld [vmem:[#allocation17 + $0x150] ss:$28 sps:$4 sm:$0xff]  }
 0x63e   :  { %3574 = vmatpush1.bf16.msra.mxu0 %v6853_v54  ;;  %v6949_v54 = vld [vmem:[#allocation17 + $0x4d0] ss:$28 sps:$4 sm:$0xff]  }
 0x63f   :  { %3575 = vmatprep.subr.bf16.mxu0 %v6861_v55  ;;  %v6954_v55 = vld [vmem:[#allocation17 + $0x11c] ss:$28 sps:$4 sm:$0xff]  }
 0x642   :  { %3576 = vmatpush1.bf16.msra.mxu0 %v6859_v58  ;;  %v6957_v58 = vld [vmem:[#allocation17 + $0x49c] ss:$28 sps:$4 sm:$0xff]  }
 0x643   :  { %3577 = vmatprep.subr.bf16.mxu0 %v6867_v29  ;;  %v6952_v29 = vld [vmem:[#allocation17 + $0x118] ss:$28 sps:$4 sm:$0xff]  }
 0x646   :  { %3578 = vmatpush1.bf16.msra.mxu0 %v6865_v59  ;;  %v6955_v59 = vld [vmem:[#allocation17 + $0x498] ss:$28 sps:$4 sm:$0xff]  }
 0x647   :  { %3579 = vmatprep.subr.bf16.mxu0 %v6873_v4  ;;  %v6960_v4 = vld [vmem:[#allocation17 + $0xe4] ss:$28 sps:$4 sm:$0xff]  }
 0x64a   :  { %3580 = vmatpush1.bf16.msra.mxu0 %v6871_v49  ;;  %v6963_v49 = vld [vmem:[#allocation17 + $0x464] ss:$28 sps:$4 sm:$0xff]  }
 0x64b   :  { %3581 = vmatprep.subr.bf16.mxu0 %v6879_v60  ;;  %v6958_v60 = vld [vmem:[#allocation17 + $0xe0] ss:$28 sps:$4 sm:$0xff]  }
 0x64e   :  { %3582 = vmatpush1.bf16.msra.mxu0 %v6877_v11  ;;  %v6961_v11 = vld [vmem:[#allocation17 + $0x460] ss:$28 sps:$4 sm:$0xff]  }
 0x64f   :  { %3583 = vmatprep.subr.bf16.mxu0 %v6885_v61  ;;  %v6966_v61 = vld [vmem:[#allocation17 + $0xac] ss:$28 sps:$4 sm:$0xff]  }
 0x652   :  { %3584 = vmatpush1.bf16.msra.mxu0 %v6883_v62  ;;  %v6969_v62 = vld [vmem:[#allocation17 + $0x42c] ss:$28 sps:$4 sm:$0xff]  }
 0x653   :  { %3585 = vmatprep.subr.bf16.mxu0 %v6891_v63  ;;  %v6964_v63 = vld [vmem:[#allocation17 + $0xa8] ss:$28 sps:$4 sm:$0xff]  }
 0x656   :  { %3586 = vmatpush1.bf16.msra.mxu0 %v6889_v53  ;;  %v6967_v53 = vld [vmem:[#allocation17 + $0x428] ss:$28 sps:$4 sm:$0xff]  }
 0x657   :  { %3587 = vmatprep.subr.bf16.mxu0 %v6897_v0  ;;  %v6972_v0 = vld [vmem:[#allocation17 + $0x74] ss:$28 sps:$4 sm:$0xff]  }
 0x65a   :  { %3588 = vmatpush2.bf16.msra.mxu0 %v6895_v35  ;;  %v6975_v35 = vld [vmem:[#allocation17 + $0x3f4] ss:$28 sps:$4 sm:$0xff]  }
 0x65b   :  { %3589 = vmatprep.subr.bf16.mxu0 %v6903_v1  ;;  %v6970_v1 = vld [vmem:[#allocation17 + $0x70] ss:$28 sps:$4 sm:$0xff]  }
 0x65e   :  { %3590 = vmatpush2.bf16.msra.mxu0 %v6901_v2  ;;  %v6973_v2 = vld [vmem:[#allocation17 + $0x3f0] ss:$28 sps:$4 sm:$0xff]  }
 0x65f   :  { %3591 = vmatprep.subr.bf16.mxu0 %v6909_v3  ;;  %v6978_v3 = vld [vmem:[#allocation17 + $0x3c] ss:$28 sps:$4 sm:$0xff]  }
 0x662   :  { %3592 = vmatpush2.bf16.msra.mxu0 %v6907_v5  ;;  %v6981_v5 = vld [vmem:[#allocation17 + $0x3bc] ss:$28 sps:$4 sm:$0xff]  }
 0x663   :  { %3593 = vmatprep.subr.bf16.mxu0 %v6915_v6  ;;  %v6976_v6 = vld [vmem:[#allocation17 + $0x38] ss:$28 sps:$4 sm:$0xff]  }
 0x666   :  { %3594 = vmatpush2.bf16.msra.mxu0 %v6913_v7  ;;  %v6979_v7 = vld [vmem:[#allocation17 + $0x3b8] ss:$28 sps:$4 sm:$0xff]  }
 0x667   :  { %3595 = vmatprep.subr.bf16.mxu0 %v6921_v8  ;;  %v6984_v8 = vld [vmem:[#allocation17 + $0x4] ss:$28 sps:$4 sm:$0xff]  }
 0x66a   :  { %3596 = vmatpush2.bf16.msra.mxu0 %v6919_v9  ;;  %v6987_v9 = vld [vmem:[#allocation17 + $0x384] ss:$28 sps:$4 sm:$0xff]  }
 0x66b   :  { %3597 = vmatprep.subr.bf16.mxu0 %v6927_v12  ;;  %v6985_v12 = vld [vmem:[#allocation17 + $0x380] ss:$28 sps:$4 sm:$0xff]  }
 0x66e   :  { %3598 = vmatpush2.bf16.msra.mxu0 %v6925_v15  ;;  %v6993_v15 = vld [vmem:[#allocation17 + $0x6cc] ss:$28 sps:$4 sm:$0xff]  }
 0x66f   :  { %3599 = vmatprep.subr.bf16.mxu0 %v6933_v17  ;;  %v6991_v17 = vld [vmem:[#allocation17 + $0x6c8] ss:$28 sps:$4 sm:$0xff]  }
 0x672   :  { %3600 = vmatpush2.bf16.msra.mxu0 %v6931_v19  ;;  %v6999_v19 = vld [vmem:[#allocation17 + $0x694] ss:$28 sps:$4 sm:$0xff]  }
 0x673   :  { %3601 = vmatprep.subr.bf16.mxu0 %v6939_v21  ;;  %v6997_v21 = vld [vmem:[#allocation17 + $0x690] ss:$28 sps:$4 sm:$0xff]  }
 0x676   :  { %3602 = vmatpush2.bf16.msra.mxu0 %v6937_v23  ;;  %v7005_v23 = vld [vmem:[#allocation17 + $0x65c] ss:$28 sps:$4 sm:$0xff]  }
 0x677   :  { %5114 = vmatprep.subr.bf16.mxu0 %v6945_v25  ;;  %v7003_v25 = vld [vmem:[#allocation17 + $0x658] ss:$28 sps:$4 sm:$0xff]  }
 0x6f9   :  { %v3107_v27 = vpop.f32.mrf.mxu0 }
 0x6fa   :  { %v3108_v36 = vadd.f32 %v3107_v27, %v2986_v51  ;;  %v7011_v27 = vld [vmem:[#allocation17 + $0x624] ss:$28 sps:$4 sm:$0xff]  }
 0x6fb   :  { %v3109_v30 = vpop.f32.mrf.mxu0 }
 0x6fc   :  { %v3110_v32 = vadd.f32 %v3109_v30, %v2990_v28  ;;  %v3116_v43 = vmax.f32 %v3108_v36, 0.0  ;;  %v7014_v30 = vld [vmem:[#allocation17 + $0x26c] ss:$28 sps:$4 sm:$0xff]   ;;  %v7020_v36 = vld [vmem:[#allocation17 + $0x234] ss:$28 sps:$4 sm:$0xff]  }
 0x6fd   :  { %v3111_v31 = vpop.f32.mrf.mxu0 }
 0x6fe   :  { %v3112_v34 = vadd.f32 %v3111_v31, %v2986_v51  ;;  %v3117_v41 = vmax.f32 %v3110_v32, 0.0  ;;  %v7009_v51 = vld [vmem:[#allocation17 + $0x620] ss:$28 sps:$4 sm:$0xff]   ;;  %v7017_v31 = vld [vmem:[#allocation17 + $0x5ec] ss:$28 sps:$4 sm:$0xff]  }
 0x6ff   :  { %v3113_v37 = vpop.f32.mrf.mxu0  ;;  %v7012_v32 = vld [vmem:[#allocation17 + $0x268] ss:$28 sps:$4 sm:$0xff]  }
 0x700   :  { %v3114_v39 = vadd.f32 %v3113_v37, %v2990_v28  ;;  %v3118_v40 = vmax.f32 %v3112_v34, 0.0  ;;  %v7006_v28 = vld [vmem:[#allocation17 + $0x2a0] ss:$28 sps:$4 sm:$0xff]   ;;  %v7015_v34 = vld [vmem:[#allocation17 + $0x5e8] ss:$28 sps:$4 sm:$0xff]  }
 0x701   :  { %v7023_v37 = vld [vmem:[#allocation17 + $0x5b4] ss:$28 sps:$4 sm:$0xff]  }
 0x702   :  { %v3119_v42 = vmax.f32 %v3114_v39, 0.0  ;;  %v3120_v47 = vpack.c.bf16 %v3118_v40, %v3116_v43  ;;  %v7018_v39 = vld [vmem:[#allocation17 + $0x230] ss:$28 sps:$4 sm:$0xff]   ;;  %v7024_v43 = vld [vmem:[#allocation17 + $0x1f8] ss:$28 sps:$4 sm:$0xff]  }
 0x703   :  { %v7021_v40 = vld [vmem:[#allocation17 + $0x5b0] ss:$28 sps:$4 sm:$0xff]  }
 0x704   :  { %v3121_v44 = vpack.c.bf16 %v3119_v42, %v3117_v41  ;;  %v7026_v41 = vld [vmem:[#allocation17 + $0x1fc] ss:$28 sps:$4 sm:$0xff]  }
 0x705   :  { %v7029_v42 = vld [vmem:[#allocation17 + $0x57c] ss:$28 sps:$4 sm:$0xff]  }
 0x706   :  { %3560 = vmatprep.mubr.bf16.mxu1 %v3121_v44  ;;  %3603 = vmatprep.mubr.bf16.mxu0 %v3121_v44  ;;  %v7027_v44 = vld [vmem:[#allocation17 + $0x578] ss:$28 sps:$4 sm:$0xff]  }
 0x707   :  { %3561 = vmatmul.mubr.bf16.vlgmr.msra.gmra.mxu1 %v3120_v47  ;;  %3604 = vmatmul.mubr.bf16.vlgmr.msra.gmra.mxu0 %v3120_v47  ;;  %v7030_v47 = vld [vmem:[#allocation17 + $0x1c0] ss:$28 sps:$4 sm:$0xff]  }
 0x708   :  { %5072 = vmatpush1.bf16.msra.mxu1 %v6940_v45  ;;  %5115 = vmatpush1.bf16.msra.mxu0 %v6943_v46  ;;  %v7032_v45 = vld [vmem:[#allocation17 + $0x1c4] ss:$28 sps:$4 sm:$0xff]  }
 0x709   :  { %5073 = vmatprep.subr.bf16.mxu1 %v6948_v48  ;;  %5116 = vmatprep.subr.bf16.mxu0 %v6951_v50  ;;  %v7035_v46 = vld [vmem:[#allocation17 + $0x544] ss:$28 sps:$4 sm:$0xff]   ;;  %v7038_v50 = vld [vmem:[#allocation17 + $0x194] ss:$28 sps:$4 sm:$0xff]  }
 0x70a   :  { %v7033_v48 = vld [vmem:[#allocation17 + $0x540] ss:$28 sps:$4 sm:$0xff]  }
 0x70c   :  { %5074 = vmatpush1.bf16.msra.mxu1 %v6946_v14  ;;  %5117 = vmatpush1.bf16.msra.mxu0 %v6949_v54  ;;  %v7041_v14 = vld [vmem:[#allocation17 + $0x514] ss:$28 sps:$4 sm:$0xff]   ;;  %v3186_v54 = vld [vmem:[#allocation19 + $0xc] sm:$0xf] }
 0x70d   :  { %5075 = vmatprep.subr.bf16.mxu1 %v6954_v55  ;;  %5118 = vmatprep.subr.bf16.mxu0 %v6957_v58 }
 0x710   :  { %5076 = vmatpush1.bf16.msra.mxu1 %v6952_v29  ;;  %5119 = vmatpush1.bf16.msra.mxu0 %v6955_v59  ;;  %v3195_v29 = vrot.slane %v3186_v54, %v7742_v57  ;;  %v3203_v59 = vrot.slane %v3186_v54, %v7747_v33 }
 0x711   :  { %5077 = vmatprep.subr.bf16.mxu1 %v6960_v4  ;;  %5120 = vmatprep.subr.bf16.mxu0 %v6963_v49  ;;  %v3191_v4 = vrot.slane %v3186_v54, %v7739_v56  ;;  %v3199_v49 = vrot.slane %v3186_v54, %v7750_v38  ;;  %v7080_v54 = vld [vmem:[#allocation17 + $0xc] ss:$28 sps:$4 sm:$0xff]  }
 0x714   :  { %5078 = vmatpush1.bf16.msra.mxu1 %v6958_v60  ;;  %5121 = vmatpush1.bf16.msra.mxu0 %v6961_v11 }
 0x715   :  { %5079 = vmatprep.subr.bf16.mxu1 %v6966_v61  ;;  %5122 = vmatprep.subr.bf16.mxu0 %v6969_v62 }
 0x718   :  { %5080 = vmatpush1.bf16.msra.mxu1 %v6964_v63  ;;  %5123 = vmatpush1.bf16.msra.mxu0 %v6967_v53 }
 0x719   :  { %5081 = vmatprep.subr.bf16.mxu1 %v6972_v0  ;;  %5124 = vmatprep.subr.bf16.mxu0 %v6975_v35 }
 0x71c   :  { %5082 = vmatpush1.bf16.msra.mxu1 %v6970_v1  ;;  %5125 = vmatpush1.bf16.msra.mxu0 %v6973_v2 }
 0x71d   :  { %5083 = vmatprep.subr.bf16.mxu1 %v6978_v3  ;;  %5126 = vmatprep.subr.bf16.mxu0 %v6981_v5 }
 0x720   :  { %5084 = vmatpush1.bf16.msra.mxu1 %v6976_v6  ;;  %5127 = vmatpush1.bf16.msra.mxu0 %v6979_v7 }
 0x721   :  { %5085 = vmatprep.subr.bf16.mxu1 %v6984_v8  ;;  %5128 = vmatprep.subr.bf16.mxu0 %v6987_v9 }
 0x724   :  { %5086 = vmatpush1.bf16.msra.mxu1 %v6982_v10  ;;  %5129 = vmatpush1.bf16.msra.mxu0 %v6985_v12 }
 0x725   :  { %5087 = vmatprep.subr.bf16.mxu1 %v6990_v13  ;;  %5130 = vmatprep.subr.bf16.mxu0 %v6993_v15 }
 0x728   :  { %5088 = vmatpush2.bf16.msra.mxu1 %v6988_v16  ;;  %5131 = vmatpush2.bf16.msra.mxu0 %v6991_v17 }
 0x729   :  { %5089 = vmatprep.subr.bf16.mxu1 %v6996_v18  ;;  %5132 = vmatprep.subr.bf16.mxu0 %v6999_v19 }
 0x72c   :  { %5090 = vmatpush2.bf16.msra.mxu1 %v6994_v20  ;;  %5133 = vmatpush2.bf16.msra.mxu0 %v6997_v21  ;;  %v7036_v20 = vld [vmem:[#allocation17 + $0x190] ss:$28 sps:$4 sm:$0xff]  }
 0x72d   :  { %5091 = vmatprep.subr.bf16.mxu1 %v7002_v22  ;;  %5134 = vmatprep.subr.bf16.mxu0 %v7005_v23  ;;  %v7039_v21 = vld [vmem:[#allocation17 + $0x510] ss:$28 sps:$4 sm:$0xff]  }
 0x730   :  { %5092 = vmatpush2.bf16.msra.mxu1 %v7000_v24  ;;  %5135 = vmatpush2.bf16.msra.mxu0 %v7003_v25  ;;  %v7044_v24 = vld [vmem:[#allocation17 + $0x15c] ss:$28 sps:$4 sm:$0xff]  }
 0x731   :  { %5093 = vmatprep.subr.bf16.mxu1 %v7008_v26  ;;  %5136 = vmatprep.subr.bf16.mxu0 %v7011_v27  ;;  %v7047_v25 = vld [vmem:[#allocation17 + $0x4dc] ss:$28 sps:$4 sm:$0xff]  }
 0x732   :  { %v7042_v26 = vld [vmem:[#allocation17 + $0x158] ss:$28 sps:$4 sm:$0xff]  }
 0x733   :  { %v7045_v27 = vld [vmem:[#allocation17 + $0x4d8] ss:$28 sps:$4 sm:$0xff]  }
 0x734   :  { %5094 = vmatpush2.bf16.msra.mxu1 %v7006_v28  ;;  %5137 = vmatpush2.bf16.msra.mxu0 %v7009_v51  ;;  %v7050_v28 = vld [vmem:[#allocation17 + $0x124] ss:$28 sps:$4 sm:$0xff]  }
 0x735   :  { %5095 = vmatprep.subr.bf16.mxu1 %v7014_v30  ;;  %5138 = vmatprep.subr.bf16.mxu0 %v7017_v31  ;;  %v7053_v51 = vld [vmem:[#allocation17 + $0x4a4] ss:$28 sps:$4 sm:$0xff]  }
 0x736   :  { %v7048_v30 = vld [vmem:[#allocation17 + $0x120] ss:$28 sps:$4 sm:$0xff]  }
 0x737   :  { %v7051_v31 = vld [vmem:[#allocation17 + $0x4a0] ss:$28 sps:$4 sm:$0xff]  }
 0x738   :  { %5096 = vmatpush2.bf16.msra.mxu1 %v7012_v32  ;;  %5139 = vmatpush2.bf16.msra.mxu0 %v7015_v34  ;;  %v7056_v32 = vld [vmem:[#allocation17 + $0xec] ss:$28 sps:$4 sm:$0xff]  }
 0x739   :  { %5097 = vmatprep.subr.bf16.mxu1 %v7020_v36  ;;  %5140 = vmatprep.subr.bf16.mxu0 %v7023_v37  ;;  %v7059_v34 = vld [vmem:[#allocation17 + $0x46c] ss:$28 sps:$4 sm:$0xff]  }
 0x73a   :  { %v7054_v36 = vld [vmem:[#allocation17 + $0xe8] ss:$28 sps:$4 sm:$0xff]  }
 0x73b   :  { %v7057_v37 = vld [vmem:[#allocation17 + $0x468] ss:$28 sps:$4 sm:$0xff]  }
 0x73c   :  { %5098 = vmatpush2.bf16.msra.mxu1 %v7018_v39  ;;  %5141 = vmatpush2.bf16.msra.mxu0 %v7021_v40  ;;  %v7062_v39 = vld [vmem:[#allocation17 + $0xb4] ss:$28 sps:$4 sm:$0xff]  }
 0x73d   :  { %5099 = vmatprep.subr.bf16.mxu1 %v7026_v41  ;;  %5142 = vmatprep.subr.bf16.mxu0 %v7029_v42  ;;  %v7065_v40 = vld [vmem:[#allocation17 + $0x434] ss:$28 sps:$4 sm:$0xff]  }
 0x73e   :  { %v7060_v41 = vld [vmem:[#allocation17 + $0xb0] ss:$28 sps:$4 sm:$0xff]  }
 0x73f   :  { %v7063_v42 = vld [vmem:[#allocation17 + $0x430] ss:$28 sps:$4 sm:$0xff]  }
 0x740   :  { %5100 = vmatpush2.bf16.msra.mxu1 %v7024_v43  ;;  %5143 = vmatpush2.bf16.msra.mxu0 %v7027_v44  ;;  %v7068_v43 = vld [vmem:[#allocation17 + $0x7c] ss:$28 sps:$4 sm:$0xff]  }
 0x741   :  { %5101 = vmatprep.subr.bf16.mxu1 %v7032_v45  ;;  %5144 = vmatprep.subr.bf16.mxu0 %v7035_v46  ;;  %v7071_v44 = vld [vmem:[#allocation17 + $0x3fc] ss:$28 sps:$4 sm:$0xff]  }
 0x742   :  { %v7066_v45 = vld [vmem:[#allocation17 + $0x78] ss:$28 sps:$4 sm:$0xff]  }
 0x743   :  { %v7069_v46 = vld [vmem:[#allocation17 + $0x3f8] ss:$28 sps:$4 sm:$0xff]  }
 0x744   :  { %5102 = vmatpush2.bf16.msra.mxu1 %v7030_v47  ;;  %5145 = vmatpush2.bf16.msra.mxu0 %v7033_v48  ;;  %v7074_v47 = vld [vmem:[#allocation17 + $0x44] ss:$28 sps:$4 sm:$0xff]  }
 0x745   :  { %5157 = vmatprep.subr.bf16.mxu1 %v7038_v50  ;;  %5200 = vmatprep.subr.bf16.mxu0 %v7041_v14  ;;  %v7077_v48 = vld [vmem:[#allocation17 + $0x3c4] ss:$28 sps:$4 sm:$0xff]  }
 0x746   :  { %v7072_v50 = vld [vmem:[#allocation17 + $0x40] ss:$28 sps:$4 sm:$0xff]  }
 0x747   :  { %v7075_v14 = vld [vmem:[#allocation17 + $0x3c0] ss:$28 sps:$4 sm:$0xff]  }
 0x7c7   :  { %v3562_v55 = vpop.f32.mrf.mxu1  ;;  %v3605_v58 = vpop.f32.mrf.mxu0 }
 0x7c8   :  { %v3563_v1 = vadd.f32 %v3562_v55, %v3191_v4  ;;  %v3606_v2 = vadd.f32 %v3605_v58, %v3199_v49  ;;  %v7083_v55 = vld [vmem:[#allocation17 + $0x38c] ss:$28 sps:$4 sm:$0xff]  }
 0x7c9   :  { %v3564_v60 = vpop.f32.mrf.mxu1  ;;  %v3607_v11 = vpop.f32.mrf.mxu0  ;;  %v7078_v58 = vld [vmem:[#allocation17 + $0x8] ss:$28 sps:$4 sm:$0xff]  }
 0x7ca   :  { %v3565_v63 = vadd.f32 %v3564_v60, %v3195_v29  ;;  %v3608_v53 = vadd.f32 %v3607_v11, %v3203_v59  ;;  %v3614_v16 = vmax.f32 %v3563_v1, 0.0  ;;  %v3616_v17 = vmax.f32 %v3606_v2, 0.0  ;;  %v7087_v60 = vld [vmem:[#allocation17 + $0x6d0] ss:$28 sps:$4 sm:$0xff]   ;;  %v7092_v11 = vld [vmem:[#allocation17 + $0x31c] ss:$28 sps:$4 sm:$0xff]  }
 0x7cb   :  { %v3566_v61 = vpop.f32.mrf.mxu1  ;;  %v3609_v62 = vpop.f32.mrf.mxu0  ;;  %v7099_v1 = vld [vmem:[#allocation17 + $0x660] ss:$28 sps:$4 sm:$0xff]   ;;  %v7104_v2 = vld [vmem:[#allocation17 + $0x2ac] ss:$28 sps:$4 sm:$0xff]  }
 0x7cc   :  { %v3567_v0 = vadd.f32 %v3566_v61, %v3191_v4  ;;  %v3610_v35 = vadd.f32 %v3609_v62, %v3199_v49  ;;  %v3615_v10 = vmax.f32 %v3565_v63, 0.0  ;;  %v3617_v12 = vmax.f32 %v3608_v53, 0.0  ;;  %v7089_v4 = vld [vmem:[#allocation17 + $0x6d4] ss:$28 sps:$4 sm:$0xff]   ;;  %v7095_v61 = vld [vmem:[#allocation17 + $0x69c] ss:$28 sps:$4 sm:$0xff]  }
 0x7cd   :  { %v3568_v3 = vpop.f32.mrf.mxu1  ;;  %v3611_v5 = vpop.f32.mrf.mxu0  ;;  %v7084_v49 = vld [vmem:[#allocation17 + $0x350] ss:$28 sps:$4 sm:$0xff]   ;;  %v7090_v62 = vld [vmem:[#allocation17 + $0x318] ss:$28 sps:$4 sm:$0xff]   ;;  %v7098_v53 = vld [vmem:[#allocation17 + $0x2e4] ss:$28 sps:$4 sm:$0xff]  }
 0x7ce   :  { %v3569_v6 = vadd.f32 %v3568_v3, %v3195_v29  ;;  %v3612_v7 = vadd.f32 %v3611_v5, %v3203_v59  ;;  %v3618_v8 = vmax.f32 %v3567_v0, 0.0  ;;  %v3620_v9 = vmax.f32 %v3610_v35, 0.0  ;;  %v7081_v29 = vld [vmem:[#allocation17 + $0x388] ss:$28 sps:$4 sm:$0xff]   ;;  %v7086_v59 = vld [vmem:[#allocation17 + $0x354] ss:$28 sps:$4 sm:$0xff]  }
 0x7cf   :  { %v7093_v63 = vld [vmem:[#allocation17 + $0x698] ss:$28 sps:$4 sm:$0xff]   ;;  %v7101_v0 = vld [vmem:[#allocation17 + $0x664] ss:$28 sps:$4 sm:$0xff]   ;;  %v7107_v3 = vld [vmem:[#allocation17 + $0x62c] ss:$28 sps:$4 sm:$0xff]  }
 0x7d0   :  { %v3619_v13 = vmax.f32 %v3569_v6, 0.0  ;;  %v3621_v15 = vmax.f32 %v3612_v7, 0.0  ;;  %v7797_v22 = vpack.c.bf16 %v3618_v8, %v3614_v16  ;;  %v7799_v23 = vpack.c.bf16 %v3620_v9, %v3616_v17  ;;  %v7096_v35 = vld [vmem:[#allocation17 + $0x2e0] ss:$28 sps:$4 sm:$0xff]   ;;  %v7102_v5 = vld [vmem:[#allocation17 + $0x2a8] ss:$28 sps:$4 sm:$0xff]  }
 0x7d1   :  { %v7105_v6 = vld [vmem:[#allocation17 + $0x628] ss:$28 sps:$4 sm:$0xff]   ;;  %v7110_v7 = vld [vmem:[#allocation17 + $0x274] ss:$28 sps:$4 sm:$0xff]  }
 0x7d2   :  { %v7793_v18 = vpack.c.bf16 %v3619_v13, %v3615_v10  ;;  %v7795_v19 = vpack.c.bf16 %v3621_v15, %v3617_v12  ;;  %v7113_v8 = vld [vmem:[#allocation17 + $0x5f4] ss:$28 sps:$4 sm:$0xff]   ;;  %v7116_v12 = vld [vmem:[#allocation17 + $0x23c] ss:$28 sps:$4 sm:$0xff]   ;;  %v7122_v17 = vld [vmem:[#allocation17 + $0x204] ss:$28 sps:$4 sm:$0xff]  }
 0x7d3   :  { %v7108_v9 = vld [vmem:[#allocation17 + $0x270] ss:$28 sps:$4 sm:$0xff]   ;;  %v7119_v13 = vld [vmem:[#allocation17 + $0x5bc] ss:$28 sps:$4 sm:$0xff]  }
 0x7d4   :  { %5103 = vmatprep.mubr.bf16.mxu1 %v7793_v18  ;;  %5146 = vmatprep.mubr.bf16.mxu0 %v7795_v19  ;;  %v7111_v10 = vld [vmem:[#allocation17 + $0x5f0] ss:$28 sps:$4 sm:$0xff]   ;;  %v7114_v15 = vld [vmem:[#allocation17 + $0x238] ss:$28 sps:$4 sm:$0xff]  }
 0x7d5   :  { %5104 = vmatmul.mubr.bf16.vlgmr.msra.gmra.mxu1 %v7797_v22  ;;  %5147 = vmatmul.mubr.bf16.vlgmr.msra.gmra.mxu0 %v7799_v23  ;;  %v7117_v16 = vld [vmem:[#allocation17 + $0x5b8] ss:$28 sps:$4 sm:$0xff]  }
 0x7d6   :  { %5158 = vmatpush1.bf16.msra.mxu1 %v7036_v20  ;;  %5201 = vmatpush1.bf16.msra.mxu0 %v7039_v21  ;;  %v7125_v20 = vld [vmem:[#allocation17 + $0x584] ss:$28 sps:$4 sm:$0xff]  }
 0x7d7   :  { %5189 = vmatprep.mubr.bf16.mxu1 %v7793_v18  ;;  %5232 = vmatprep.mubr.bf16.mxu0 %v7795_v19  ;;  %v7120_v21 = vld [vmem:[#allocation17 + $0x200] ss:$28 sps:$4 sm:$0xff]  }
 0x7d8   :  { %5159 = vmatprep.subr.bf16.mxu1 %v7044_v24  ;;  %5202 = vmatprep.subr.bf16.mxu0 %v7047_v25  ;;  %v7123_v24 = vld [vmem:[#allocation17 + $0x580] ss:$28 sps:$4 sm:$0xff]   ;;  %v7128_v25 = vld [vmem:[#allocation17 + $0x1cc] ss:$28 sps:$4 sm:$0xff]  }
 0x7da   :  { %5160 = vmatpush1.bf16.msra.mxu1 %v7042_v26  ;;  %5203 = vmatpush1.bf16.msra.mxu0 %v7045_v27  ;;  %v7131_v26 = vld [vmem:[#allocation17 + $0x54c] ss:$28 sps:$4 sm:$0xff]  }
 0x7db   :  { %5161 = vmatprep.subr.bf16.mxu1 %v7050_v28  ;;  %5204 = vmatprep.subr.bf16.mxu0 %v7053_v51  ;;  %v7126_v27 = vld [vmem:[#allocation17 + $0x1c8] ss:$28 sps:$4 sm:$0xff]   ;;  %v7134_v51 = vld [vmem:[#allocation17 + $0x19c] ss:$28 sps:$4 sm:$0xff]  }
 0x7dc   :  { %v7129_v28 = vld [vmem:[#allocation17 + $0x548] ss:$28 sps:$4 sm:$0xff]  }
 0x7de   :  { %5162 = vmatpush1.bf16.msra.mxu1 %v7048_v30  ;;  %5205 = vmatpush1.bf16.msra.mxu0 %v7051_v31  ;;  %v7137_v30 = vld [vmem:[#allocation17 + $0x51c] ss:$28 sps:$4 sm:$0xff]  }
 0x7df   :  { %5163 = vmatprep.subr.bf16.mxu1 %v7056_v32  ;;  %5206 = vmatprep.subr.bf16.mxu0 %v7059_v34  ;;  %v7132_v31 = vld [vmem:[#allocation17 + $0x198] ss:$28 sps:$4 sm:$0xff]   ;;  %v7140_v34 = vld [vmem:[#allocation17 + $0x164] ss:$28 sps:$4 sm:$0xff]  }
 0x7e0   :  { %v7135_v32 = vld [vmem:[#allocation17 + $0x518] ss:$28 sps:$4 sm:$0xff]  }
 0x7e2   :  { %5164 = vmatpush1.bf16.msra.mxu1 %v7054_v36  ;;  %5207 = vmatpush1.bf16.msra.mxu0 %v7057_v37  ;;  %v7143_v36 = vld [vmem:[#allocation17 + $0x4e4] ss:$28 sps:$4 sm:$0xff]  }
 0x7e3   :  { %5165 = vmatprep.subr.bf16.mxu1 %v7062_v39  ;;  %5208 = vmatprep.subr.bf16.mxu0 %v7065_v40  ;;  %v7138_v37 = vld [vmem:[#allocation17 + $0x160] ss:$28 sps:$4 sm:$0xff]   ;;  %v7146_v40 = vld [vmem:[#allocation17 + $0x12c] ss:$28 sps:$4 sm:$0xff]  }
 0x7e4   :  { %v7141_v39 = vld [vmem:[#allocation17 + $0x4e0] ss:$28 sps:$4 sm:$0xff]  }
 0x7e6   :  { %5166 = vmatpush1.bf16.msra.mxu1 %v7060_v41  ;;  %5209 = vmatpush1.bf16.msra.mxu0 %v7063_v42  ;;  %v7149_v41 = vld [vmem:[#allocation17 + $0x4ac] ss:$28 sps:$4 sm:$0xff]  }
 0x7e7   :  { %5167 = vmatprep.subr.bf16.mxu1 %v7068_v43  ;;  %5210 = vmatprep.subr.bf16.mxu0 %v7071_v44  ;;  %v7144_v42 = vld [vmem:[#allocation17 + $0x128] ss:$28 sps:$4 sm:$0xff]   ;;  %v7152_v44 = vld [vmem:[#allocation17 + $0xf4] ss:$28 sps:$4 sm:$0xff]  }
 0x7e8   :  { %v7147_v43 = vld [vmem:[#allocation17 + $0x4a8] ss:$28 sps:$4 sm:$0xff]  }
 0x7ea   :  { %5168 = vmatpush1.bf16.msra.mxu1 %v7066_v45  ;;  %5211 = vmatpush1.bf16.msra.mxu0 %v7069_v46  ;;  %v7155_v45 = vld [vmem:[#allocation17 + $0x474] ss:$28 sps:$4 sm:$0xff]  }
 0x7eb   :  { %5169 = vmatprep.subr.bf16.mxu1 %v7074_v47  ;;  %5212 = vmatprep.subr.bf16.mxu0 %v7077_v48  ;;  %v7150_v46 = vld [vmem:[#allocation17 + $0xf0] ss:$28 sps:$4 sm:$0xff]   ;;  %v7158_v48 = vld [vmem:[#allocation17 + $0xbc] ss:$28 sps:$4 sm:$0xff]  }
 0x7ec   :  { %v7153_v47 = vld [vmem:[#allocation17 + $0x470] ss:$28 sps:$4 sm:$0xff]  }
 0x7ee   :  { %5170 = vmatpush1.bf16.msra.mxu1 %v7072_v50  ;;  %5213 = vmatpush1.bf16.msra.mxu0 %v7075_v14  ;;  %v7161_v50 = vld [vmem:[#allocation17 + $0x43c] ss:$28 sps:$4 sm:$0xff]  }
 0x7ef   :  { %5171 = vmatprep.subr.bf16.mxu1 %v7080_v54  ;;  %5214 = vmatprep.subr.bf16.mxu0 %v7083_v55  ;;  %v7156_v14 = vld [vmem:[#allocation17 + $0xb8] ss:$28 sps:$4 sm:$0xff]   ;;  %v7164_v55 = vld [vmem:[#allocation17 + $0x84] ss:$28 sps:$4 sm:$0xff]  }
 0x7f0   :  { %v7159_v54 = vld [vmem:[#allocation17 + $0x438] ss:$28 sps:$4 sm:$0xff]  }
 0x7f2   :  { %5172 = vmatpush1.bf16.msra.mxu1 %v7078_v58  ;;  %5215 = vmatpush1.bf16.msra.mxu0 %v7081_v29  ;;  %v7167_v58 = vld [vmem:[#allocation17 + $0x404] ss:$28 sps:$4 sm:$0xff]  }
 0x7f3   :  { %5173 = vmatprep.subr.bf16.mxu1 %v7086_v59  ;;  %5216 = vmatprep.subr.bf16.mxu0 %v7089_v4  ;;  %v7162_v29 = vld [vmem:[#allocation17 + $0x80] ss:$28 sps:$4 sm:$0xff]   ;;  %v7170_v4 = vld [vmem:[#allocation17 + $0x4c] ss:$28 sps:$4 sm:$0xff]  }
 0x7f4   :  { %v7165_v59 = vld [vmem:[#allocation17 + $0x400] ss:$28 sps:$4 sm:$0xff]  }
 0x7f6   :  { %5174 = vmatpush2.bf16.msra.mxu1 %v7084_v49  ;;  %5217 = vmatpush2.bf16.msra.mxu0 %v7087_v60  ;;  %v7173_v49 = vld [vmem:[#allocation17 + $0x3cc] ss:$28 sps:$4 sm:$0xff]  }
 0x7f7   :  { %5175 = vmatprep.subr.bf16.mxu1 %v7092_v11  ;;  %5218 = vmatprep.subr.bf16.mxu0 %v7095_v61  ;;  %v7168_v60 = vld [vmem:[#allocation17 + $0x48] ss:$28 sps:$4 sm:$0xff]   ;;  %v7176_v61 = vld [vmem:[#allocation17 + $0x14] ss:$28 sps:$4 sm:$0xff]  }
 0x7f8   :  { %v7171_v11 = vld [vmem:[#allocation17 + $0x3c8] ss:$28 sps:$4 sm:$0xff]  }
 0x7fa   :  { %5176 = vmatpush2.bf16.msra.mxu1 %v7090_v62  ;;  %5219 = vmatpush2.bf16.msra.mxu0 %v7093_v63  ;;  %v7179_v62 = vld [vmem:[#allocation17 + $0x394] ss:$28 sps:$4 sm:$0xff]  }
 0x7fb   :  { %5177 = vmatprep.subr.bf16.mxu1 %v7098_v53  ;;  %5220 = vmatprep.subr.bf16.mxu0 %v7101_v0  ;;  %v7174_v63 = vld [vmem:[#allocation17 + $0x10] ss:$28 sps:$4 sm:$0xff]   ;;  %v7182_v0 = vld [vmem:[#allocation17 + $0x35c] ss:$28 sps:$4 sm:$0xff]  }
 0x7fc   :  { %v7177_v53 = vld [vmem:[#allocation17 + $0x390] ss:$28 sps:$4 sm:$0xff]  }
 0x7fe   :  { %5178 = vmatpush2.bf16.msra.mxu1 %v7096_v35  ;;  %5221 = vmatpush2.bf16.msra.mxu0 %v7099_v1  ;;  %v7185_v35 = vld [vmem:[#allocation17 + $0x6dc] ss:$28 sps:$4 sm:$0xff]  }
 0x7ff   :  { %5179 = vmatprep.subr.bf16.mxu1 %v7104_v2  ;;  %5222 = vmatprep.subr.bf16.mxu0 %v7107_v3  ;;  %v7180_v1 = vld [vmem:[#allocation17 + $0x358] ss:$28 sps:$4 sm:$0xff]   ;;  %v7188_v3 = vld [vmem:[#allocation17 + $0x324] ss:$28 sps:$4 sm:$0xff]  }
 0x800   :  { %v7183_v2 = vld [vmem:[#allocation17 + $0x6d8] ss:$28 sps:$4 sm:$0xff]  }
 0x802   :  { %5180 = vmatpush2.bf16.msra.mxu1 %v7102_v5  ;;  %5223 = vmatpush2.bf16.msra.mxu0 %v7105_v6  ;;  %v7191_v5 = vld [vmem:[#allocation17 + $0x6a4] ss:$28 sps:$4 sm:$0xff]  }
 0x803   :  { %5181 = vmatprep.subr.bf16.mxu1 %v7110_v7  ;;  %5224 = vmatprep.subr.bf16.mxu0 %v7113_v8  ;;  %v7186_v6 = vld [vmem:[#allocation17 + $0x320] ss:$28 sps:$4 sm:$0xff]   ;;  %v7194_v8 = vld [vmem:[#allocation17 + $0x2ec] ss:$28 sps:$4 sm:$0xff]  }
 0x804   :  { %v7189_v7 = vld [vmem:[#allocation17 + $0x6a0] ss:$28 sps:$4 sm:$0xff]  }
 0x806   :  { %5182 = vmatpush2.bf16.msra.mxu1 %v7108_v9  ;;  %5225 = vmatpush2.bf16.msra.mxu0 %v7111_v10  ;;  %v7197_v9 = vld [vmem:[#allocation17 + $0x66c] ss:$28 sps:$4 sm:$0xff]  }
 0x807   :  { %5183 = vmatprep.subr.bf16.mxu1 %v7116_v12  ;;  %5226 = vmatprep.subr.bf16.mxu0 %v7119_v13  ;;  %v7192_v10 = vld [vmem:[#allocation17 + $0x2e8] ss:$28 sps:$4 sm:$0xff]   ;;  %v7200_v13 = vld [vmem:[#allocation17 + $0x2b4] ss:$28 sps:$4 sm:$0xff]  }
 0x808   :  { %v7195_v12 = vld [vmem:[#allocation17 + $0x668] ss:$28 sps:$4 sm:$0xff]  }
 0x80a   :  { %5184 = vmatpush2.bf16.msra.mxu1 %v7114_v15  ;;  %5227 = vmatpush2.bf16.msra.mxu0 %v7117_v16  ;;  %v7203_v15 = vld [vmem:[#allocation17 + $0x634] ss:$28 sps:$4 sm:$0xff]  }
 0x80b   :  { %5185 = vmatprep.subr.bf16.mxu1 %v7122_v17  ;;  %5228 = vmatprep.subr.bf16.mxu0 %v7125_v20  ;;  %v7198_v16 = vld [vmem:[#allocation17 + $0x2b0] ss:$28 sps:$4 sm:$0xff]   ;;  %v7206_v20 = vld [vmem:[#allocation17 + $0x27c] ss:$28 sps:$4 sm:$0xff]  }
 0x80c   :  { %v7201_v17 = vld [vmem:[#allocation17 + $0x630] ss:$28 sps:$4 sm:$0xff]  }
 0x80e   :  { %5186 = vmatpush2.bf16.msra.mxu1 %v7120_v21  ;;  %5229 = vmatpush2.bf16.msra.mxu0 %v7123_v24  ;;  %v7209_v21 = vld [vmem:[#allocation17 + $0x5fc] ss:$28 sps:$4 sm:$0xff]  }
 0x80f   :  { %5187 = vmatprep.subr.bf16.mxu1 %v7128_v25  ;;  %5230 = vmatprep.subr.bf16.mxu0 %v7131_v26  ;;  %v7204_v24 = vld [vmem:[#allocation17 + $0x278] ss:$28 sps:$4 sm:$0xff]   ;;  %v7212_v26 = vld [vmem:[#allocation17 + $0x244] ss:$28 sps:$4 sm:$0xff]  }
 0x810   :  { %v7207_v25 = vld [vmem:[#allocation17 + $0x5f8] ss:$28 sps:$4 sm:$0xff]  }
 0x812   :  { %5188 = vmatpush2.bf16.msra.mxu1 %v7126_v27  ;;  %5231 = vmatpush2.bf16.msra.mxu0 %v7129_v28  ;;  %v7215_v27 = vld [vmem:[#allocation17 + $0x5c4] ss:$28 sps:$4 sm:$0xff]  }
 0x813   :  { %5243 = vmatprep.subr.bf16.mxu1 %v7134_v51  ;;  %5286 = vmatprep.subr.bf16.mxu0 %v7137_v30  ;;  %v7210_v28 = vld [vmem:[#allocation17 + $0x240] ss:$28 sps:$4 sm:$0xff]   ;;  %v7218_v30 = vld [vmem:[#allocation17 + $0x20c] ss:$28 sps:$4 sm:$0xff]  }
 0x814   :  { %v7213_v51 = vld [vmem:[#allocation17 + $0x5c0] ss:$28 sps:$4 sm:$0xff]  }
 0x815   :  { %5190 = vmatmul.mubr.bf16.vlgmr.msra.gmra.mxu1 %v7797_v22  ;;  %5233 = vmatmul.mubr.bf16.vlgmr.msra.gmra.mxu0 %v7799_v23 }
 0x816   :  { %5244 = vmatpush1.bf16.msra.mxu1 %v7132_v31  ;;  %5275 = vmatprep.mubr.bf16.mxu1 %v7793_v18  ;;  %v7221_v31 = vld [vmem:[#allocation17 + $0x58c] ss:$28 sps:$4 sm:$0xff]  }
 0x817   :  { %5287 = vmatpush1.bf16.msra.mxu0 %v7135_v32  ;;  %5318 = vmatprep.mubr.bf16.mxu0 %v7795_v19  ;;  %v7216_v32 = vld [vmem:[#allocation17 + $0x208] ss:$28 sps:$4 sm:$0xff]  }
 0x818   :  { %5245 = vmatprep.subr.bf16.mxu1 %v7140_v34  ;;  %5288 = vmatprep.subr.bf16.mxu0 %v7143_v36  ;;  %v7219_v34 = vld [vmem:[#allocation17 + $0x588] ss:$28 sps:$4 sm:$0xff]   ;;  %v7224_v36 = vld [vmem:[#allocation17 + $0x1d4] ss:$28 sps:$4 sm:$0xff]  }
 0x81a   :  { %5246 = vmatpush1.bf16.msra.mxu1 %v7138_v37  ;;  %v7227_v37 = vld [vmem:[#allocation17 + $0x554] ss:$28 sps:$4 sm:$0xff]  }
 0x81b   :  { %5289 = vmatpush1.bf16.msra.mxu0 %v7141_v39  ;;  %5247 = vmatprep.subr.bf16.mxu1 %v7146_v40  ;;  %v7222_v39 = vld [vmem:[#allocation17 + $0x1d0] ss:$28 sps:$4 sm:$0xff]  }
 0x81c   :  { %5290 = vmatprep.subr.bf16.mxu0 %v7149_v41  ;;  %v7225_v40 = vld [vmem:[#allocation17 + $0x550] ss:$28 sps:$4 sm:$0xff]   ;;  %v7228_v41 = vld [vmem:[#allocation17 + $0x360] ss:$28 sps:$4 sm:$0xff]  }
 0x81e   :  { %5248 = vmatpush1.bf16.msra.mxu1 %v7144_v42  ;;  %v7229_v42 = vld [vmem:[#allocation17 + $0x6e0] ss:$28 sps:$4 sm:$0xff]  }
 0x81f   :  { %5291 = vmatpush1.bf16.msra.mxu0 %v7147_v43  ;;  %5249 = vmatprep.subr.bf16.mxu1 %v7152_v44  ;;  %v7230_v43 = vld [vmem:[#allocation17 + $0x1a0] ss:$28 sps:$4 sm:$0xff]  }
 0x820   :  { %5292 = vmatprep.subr.bf16.mxu0 %v7155_v45  ;;  %v7231_v44 = vld [vmem:[#allocation17 + $0x520] ss:$28 sps:$4 sm:$0xff]   ;;  %v7232_v45 = vld [vmem:[#allocation17 + $0x328] ss:$28 sps:$4 sm:$0xff]  }
 0x822   :  { %5250 = vmatpush1.bf16.msra.mxu1 %v7150_v46  ;;  %v7233_v46 = vld [vmem:[#allocation17 + $0x6a8] ss:$28 sps:$4 sm:$0xff]  }
 0x823   :  { %5293 = vmatpush1.bf16.msra.mxu0 %v7153_v47  ;;  %5251 = vmatprep.subr.bf16.mxu1 %v7158_v48  ;;  %v7234_v47 = vld [vmem:[#allocation17 + $0x168] ss:$28 sps:$4 sm:$0xff]  }
 0x824   :  { %5294 = vmatprep.subr.bf16.mxu0 %v7161_v50  ;;  %v7235_v48 = vld [vmem:[#allocation17 + $0x4e8] ss:$28 sps:$4 sm:$0xff]   ;;  %v7236_v50 = vld [vmem:[#allocation17 + $0x2f0] ss:$28 sps:$4 sm:$0xff]  }
 0x826   :  { %5252 = vmatpush1.bf16.msra.mxu1 %v7156_v14  ;;  %v7237_v14 = vld [vmem:[#allocation17 + $0x670] ss:$28 sps:$4 sm:$0xff]  }
 0x827   :  { %5295 = vmatpush1.bf16.msra.mxu0 %v7159_v54  ;;  %5253 = vmatprep.subr.bf16.mxu1 %v7164_v55  ;;  %v7238_v54 = vld [vmem:[#allocation17 + $0x130] ss:$28 sps:$4 sm:$0xff]  }
 0x828   :  { %5296 = vmatprep.subr.bf16.mxu0 %v7167_v58  ;;  %v7239_v55 = vld [vmem:[#allocation17 + $0x4b0] ss:$28 sps:$4 sm:$0xff]   ;;  %v7240_v58 = vld [vmem:[#allocation17 + $0x2b8] ss:$28 sps:$4 sm:$0xff]  }
 0x82a   :  { %5254 = vmatpush1.bf16.msra.mxu1 %v7162_v29  ;;  %v7241_v29 = vld [vmem:[#allocation17 + $0x638] ss:$28 sps:$4 sm:$0xff]  }
 0x82b   :  { %5297 = vmatpush1.bf16.msra.mxu0 %v7165_v59  ;;  %5255 = vmatprep.subr.bf16.mxu1 %v7170_v4  ;;  %v7242_v59 = vld [vmem:[#allocation17 + $0xf8] ss:$28 sps:$4 sm:$0xff]   ;;  %v7244_v4 = vld [vmem:[#allocation17 + $0x280] ss:$28 sps:$4 sm:$0xff]  }
 0x82c   :  { %5298 = vmatprep.subr.bf16.mxu0 %v7173_v49  ;;  %v7245_v49 = vld [vmem:[#allocation17 + $0x600] ss:$28 sps:$4 sm:$0xff]  }
 0x82e   :  { %5256 = vmatpush1.bf16.msra.mxu1 %v7168_v60  ;;  %v7247_v60 = vld [vmem:[#allocation17 + $0x440] ss:$28 sps:$4 sm:$0xff]  }
 0x82f   :  { %5299 = vmatpush1.bf16.msra.mxu0 %v7171_v11  ;;  %5257 = vmatprep.subr.bf16.mxu1 %v7176_v61  ;;  %v7248_v11 = vld [vmem:[#allocation17 + $0x248] ss:$28 sps:$4 sm:$0xff]  }
 0x830   :  { %5300 = vmatprep.subr.bf16.mxu0 %v7179_v62  ;;  %v7249_v61 = vld [vmem:[#allocation17 + $0x5c8] ss:$28 sps:$4 sm:$0xff]  }
 0x831   :  { %v7250_v62 = vld [vmem:[#allocation17 + $0x88] ss:$28 sps:$4 sm:$0xff]  }
 0x832   :  { %5258 = vmatpush1.bf16.msra.mxu1 %v7174_v63  ;;  %v7251_v63 = vld [vmem:[#allocation17 + $0x408] ss:$28 sps:$4 sm:$0xff]  }
 0x833   :  { %5301 = vmatpush1.bf16.msra.mxu0 %v7177_v53  ;;  %5259 = vmatprep.subr.bf16.mxu1 %v7182_v0  ;;  %v7252_v53 = vld [vmem:[#allocation17 + $0x210] ss:$28 sps:$4 sm:$0xff]  }
 0x834   :  { %5302 = vmatprep.subr.bf16.mxu0 %v7185_v35  ;;  %v7253_v0 = vld [vmem:[#allocation17 + $0x590] ss:$28 sps:$4 sm:$0xff]  }
 0x835   :  { %v7254_v35 = vld [vmem:[#allocation17 + $0x50] ss:$28 sps:$4 sm:$0xff]  }
 0x836   :  { %5260 = vmatpush2.bf16.msra.mxu1 %v7180_v1  ;;  %v7255_v1 = vld [vmem:[#allocation17 + $0x3d0] ss:$28 sps:$4 sm:$0xff]  }
 0x837   :  { %5303 = vmatpush2.bf16.msra.mxu0 %v7183_v2  ;;  %5261 = vmatprep.subr.bf16.mxu1 %v7188_v3  ;;  %v7256_v2 = vld [vmem:[#allocation17 + $0x1d8] ss:$28 sps:$4 sm:$0xff]  }
 0x838   :  { %5304 = vmatprep.subr.bf16.mxu0 %v7191_v5  ;;  %v7257_v3 = vld [vmem:[#allocation17 + $0x558] ss:$28 sps:$4 sm:$0xff]  }
 0x839   :  { %v7258_v5 = vld [vmem:[#allocation17 + $0x18] ss:$28 sps:$4 sm:$0xff]  }
 0x83a   :  { %5262 = vmatpush2.bf16.msra.mxu1 %v7186_v6  ;;  %v7259_v6 = vld [vmem:[#allocation17 + $0x398] ss:$28 sps:$4 sm:$0xff]  }
 0x83b   :  { %5305 = vmatpush2.bf16.msra.mxu0 %v7189_v7  ;;  %5263 = vmatprep.subr.bf16.mxu1 %v7194_v8  ;;  %v7817_v7 = vld [vmem:[#allocation19 + $0x10] sm:$0xff] }
 0x83c   :  { %5306 = vmatprep.subr.bf16.mxu0 %v7197_v9  ;;  %v3887_v8 = vrot.slane %v7817_v7, %v7739_v56  ;;  %v3891_v9 = vrot.slane %v7817_v7, %v7742_v57 }
 0x83e   :  { %5264 = vmatpush2.bf16.msra.mxu1 %v7192_v10 }
 0x83f   :  { %5307 = vmatpush2.bf16.msra.mxu0 %v7195_v12  ;;  %5265 = vmatprep.subr.bf16.mxu1 %v7200_v13 }
 0x840   :  { %5308 = vmatprep.subr.bf16.mxu0 %v7203_v15 }
 0x842   :  { %5266 = vmatpush2.bf16.msra.mxu1 %v7198_v16 }
 0x843   :  { %5309 = vmatpush2.bf16.msra.mxu0 %v7201_v17  ;;  %5267 = vmatprep.subr.bf16.mxu1 %v7206_v20 }
 0x844   :  { %5310 = vmatprep.subr.bf16.mxu0 %v7209_v21 }
 0x846   :  { %5268 = vmatpush2.bf16.msra.mxu1 %v7204_v24 }
 0x847   :  { %5311 = vmatpush2.bf16.msra.mxu0 %v7207_v25  ;;  %5269 = vmatprep.subr.bf16.mxu1 %v7212_v26 }
 0x848   :  { %5312 = vmatprep.subr.bf16.mxu0 %v7215_v27 }
 0x84a   :  { %5270 = vmatpush2.bf16.msra.mxu1 %v7210_v28 }
 0x84b   :  { %5313 = vmatpush2.bf16.msra.mxu0 %v7213_v51  ;;  %5271 = vmatprep.subr.bf16.mxu1 %v7218_v30 }
 0x84c   :  { %5314 = vmatprep.subr.bf16.mxu0 %v7221_v31 }
 0x84e   :  { %5272 = vmatpush2.bf16.msra.mxu1 %v7216_v32 }
 0x84f   :  { %5315 = vmatpush2.bf16.msra.mxu0 %v7219_v34  ;;  %5273 = vmatprep.subr.bf16.mxu1 %v7224_v36 }
 0x850   :  { %5316 = vmatprep.subr.bf16.mxu0 %v7227_v37 }
 0x852   :  { %5274 = vmatpush2.bf16.msra.mxu1 %v7222_v39 }
 0x853   :  { %5317 = vmatpush2.bf16.msra.mxu0 %v7225_v40  ;;  %6209 = vmatprep.subr.bf16.mxu1 %v7228_v41 }
 0x854   :  { %6231 = vmatprep.subr.bf16.mxu0 %v7229_v42 }
 0x855   :  { %5276 = vmatmul.mubr.bf16.vlgmr.msra.gmra.mxu1 %v7797_v22 }
 0x856   :  { %5319 = vmatmul.mubr.bf16.vlgmr.msra.gmra.mxu0 %v7799_v23  ;;  %6210 = vmatpush3.bf16.msra.mxu1 %v7230_v43 }
 0x857   :  { %5361 = vmatprep.mubr.bf16.mxu1 %v7793_v18  ;;  %6232 = vmatpush3.bf16.msra.mxu0 %v7231_v44  ;;  %v7243_v18 = vld [vmem:[#allocation17 + $0x478] ss:$28 sps:$4 sm:$0xff]  }
 0x858   :  { %5402 = vmatprep.mubr.bf16.mxu0 %v7795_v19  ;;  %6211 = vmatprep.subr.bf16.mxu1 %v7232_v45  ;;  %v7246_v19 = vld [vmem:[#allocation17 + $0xc0] ss:$28 sps:$4 sm:$0xff]  }
 0x859   :  { %6233 = vmatprep.subr.bf16.mxu0 %v7233_v46 }
 0x85a   :  { %6212 = vmatpush3.bf16.msra.mxu1 %v7234_v47 }
 0x85b   :  { %6234 = vmatpush3.bf16.msra.mxu0 %v7235_v48  ;;  %6213 = vmatprep.subr.bf16.mxu1 %v7236_v50 }
 0x85c   :  { %6235 = vmatprep.subr.bf16.mxu0 %v7237_v14 }
 0x85e   :  { %6214 = vmatpush3.bf16.msra.mxu1 %v7238_v54  ;;  %v3895_v54 = vrot.slane %v7817_v7, %v7750_v38 }
 0x85f   :  { %6236 = vmatpush3.bf16.msra.mxu0 %v7239_v55  ;;  %6215 = vmatprep.subr.bf16.mxu1 %v7240_v58  ;;  %v3899_v55 = vrot.slane %v7817_v7, %v7747_v33 }
 0x860   :  { %6237 = vmatprep.subr.bf16.mxu0 %v7241_v29 }
 0x862   :  { %6216 = vmatpush3.bf16.msra.mxu1 %v7242_v59 }
 0x863   :  { %6238 = vmatpush3.bf16.msra.mxu0 %v7243_v18  ;;  %6217 = vmatprep.subr.bf16.mxu1 %v7244_v4 }
 0x864   :  { %6239 = vmatprep.subr.bf16.mxu0 %v7245_v49 }
 0x866   :  { %6218 = vmatpush3.bf16.msra.mxu1 %v7246_v19 }
 0x867   :  { %6240 = vmatpush3.bf16.msra.mxu0 %v7247_v60  ;;  %6219 = vmatprep.subr.bf16.mxu1 %v7248_v11 }
 0x868   :  { %6241 = vmatprep.subr.bf16.mxu0 %v7249_v61 }
 0x86a   :  { %6220 = vmatpush3.bf16.msra.mxu1 %v7250_v62 }
 0x86b   :  { %6242 = vmatpush3.bf16.msra.mxu0 %v7251_v63  ;;  %6221 = vmatprep.subr.bf16.mxu1 %v7252_v53 }
 0x86c   :  { %6243 = vmatprep.subr.bf16.mxu0 %v7253_v0 }
 0x86e   :  { %6222 = vmatpush3.bf16.msra.mxu1 %v7254_v35 }
 0x86f   :  { %6244 = vmatpush3.bf16.msra.mxu0 %v7255_v1  ;;  %6223 = vmatprep.subr.bf16.mxu1 %v7256_v2 }
 0x870   :  { %6245 = vmatprep.subr.bf16.mxu0 %v7257_v3 }
 0x872   :  { %6224 = vmatpush3.bf16.msra.mxu1 %v7258_v5 }
 0x873   :  { %6246 = vmatpush3.bf16.msra.mxu0 %v7259_v6 }
 0x875   :  { %5362 = vmatmul.mubr.bf16.vlgmr.msra.gmra.mxu1 %v7797_v22 }
 0x876   :  { %5403 = vmatmul.mubr.bf16.vlgmr.msra.gmra.mxu0 %v7799_v23 }
 0x895   :  { %v5105_v10 = vpop.f32.mrf.mxu1  ;;  %v5148_v12 = vpop.f32.mrf.mxu0 }
 0x896   :  { %v5106_v13 = vadd.f32 %v5105_v10, %v3887_v8 }
 0x897   :  { %v5107_v15 = vpop.f32.mrf.mxu1  ;;  %v5150_v16 = vpop.f32.mrf.mxu0 }
 0x898   :  { %v5149_v17 = vadd.f32 %v5148_v12, %v5106_v13  ;;  %v5108_v20 = vadd.f32 %v5107_v15, %v3891_v9 }
 0x899   :  { %v5109_v21 = vpop.f32.mrf.mxu1  ;;  %v5152_v24 = vpop.f32.mrf.mxu0 }
 0x89a   :  { %v5411_v22 = vsub.f32 0.0, %v5149_v17  ;;  %v5151_v25 = vadd.f32 %v5150_v16, %v5108_v20  ;;  %v5110_v23 = vadd.f32 %v5109_v21, %v3887_v8 }
 0x89b   :  { %v5111_v26 = vpop.f32.mrf.mxu1  ;;  %v5154_v30 = vpop.f32.mrf.mxu0 }
 0x89c   :  { %v5425_v27 = vmul.f32 1.442695, %v5411_v22  ;;  %v5412_v28 = vsub.f32 0.0, %v5151_v25  ;;  %v5153_v51 = vadd.f32 %v5152_v24, %v5110_v23  ;;  %v5112_v56 = vadd.f32 %v5111_v26, %v3891_v9 }
 0x89d   :  { %v3902_v26 = vsub.s32 4, %v7736_v52 }
 0x89e   :  { %7260 = vpow2.f32 %v5425_v27  ;;  %v5427_v57 = vmul.f32 1.442695, %v5412_v28  ;;  %v5418_v31 = vsub.f32 0.0, %v5153_v51  ;;  %v5155_v32 = vadd.f32 %v5154_v30, %v5112_v56 }
 0x89f   :  { %v3906_v27 = vsub.s32 5, %v7736_v52  ;;  %v3903_v28 = vrot.slane %v7817_v7, %v3902_v26 }
 0x8a0   :  { %7262 = vpow2.f32 %v5427_v57  ;;  %v5439_v34 = vmul.f32 1.442695, %v5418_v31  ;;  %v5419_v36 = vsub.f32 0.0, %v5155_v32 }
 0x8a1   :  { %v3907_v51 = vrot.slane %v7817_v7, %v3906_v27 }
 0x8a2   :  { %7264 = vpow2.f32 %v5439_v34  ;;  %v5441_v37 = vmul.f32 1.442695, %v5419_v36 }
 0x8a4   :  { %7266 = vpow2.f32 %v5441_v37 }
 0x8ab   :  { %v7261_v39 = vpop.eup %7260 }
 0x8ac   :  { %v5453_v40 = vadd.f32 1.0, %v7261_v39 }
 0x8ad   :  { %v7263_v41 = vpop.eup %7262 }
 0x8ae   :  { %7268 = vrcp.f32 %v5453_v40  ;;  %v5454_v42 = vadd.f32 1.0, %v7263_v41 }
 0x8af   :  { %v7265_v43 = vpop.eup %7264 }
 0x8b0   :  { %7270 = vrcp.f32 %v5454_v42  ;;  %v5460_v44 = vadd.f32 1.0, %v7265_v43 }
 0x8b1   :  { %v7267_v45 = vpop.eup %7266 }
 0x8b2   :  { %7272 = vrcp.f32 %v5460_v44  ;;  %v5461_v46 = vadd.f32 1.0, %v7267_v45 }
 0x8b4   :  { %7274 = vrcp.f32 %v5461_v46 }
 0x8bb   :  { %v7269_v47 = vpop.eup %7268 }
 0x8bc   :  { %5481 = vst [vmem:[#allocation20] sm:$0xff] %v7269_v47 }
 0x8bd   :  { %v7271_v48 = vpop.eup %7270 }
 0x8be   :  { %5482 = vst [vmem:[#allocation20 + $0x8] sm:$0xff] %v7271_v48 }
 0x8bf   :  { %v7273_v50 = vpop.eup %7272 }
 0x8c0   :  { %5488 = vst [vmem:[#allocation20 + $0x38] sm:$0xff] %v7273_v50 }
 0x8c1   :  { %v7275_v14 = vpop.eup %7274 }
 0x8c2   :  { %5489 = vst [vmem:[#allocation20 + $0x40] sm:$0xff] %v7275_v14 }
 0x8d5   :  { %v5191_v58 = vpop.f32.mrf.mxu1  ;;  %v5234_v29 = vpop.f32.mrf.mxu0 }
 0x8d6   :  { %v5192_v59 = vadd.f32 %v5191_v58, %v3895_v54 }
 0x8d7   :  { %v5193_v18 = vpop.f32.mrf.mxu1  ;;  %v5236_v4 = vpop.f32.mrf.mxu0 }
 0x8d8   :  { %v5235_v49 = vadd.f32 %v5234_v29, %v5192_v59  ;;  %v5194_v19 = vadd.f32 %v5193_v18, %v3899_v55 }
 0x8d9   :  { %v5195_v60 = vpop.f32.mrf.mxu1  ;;  %v5238_v11 = vpop.f32.mrf.mxu0 }
 0x8da   :  { %v5413_v61 = vsub.f32 0.0, %v5235_v49  ;;  %v5237_v62 = vadd.f32 %v5236_v4, %v5194_v19  ;;  %v5196_v63 = vadd.f32 %v5195_v60, %v3895_v54 }
 0x8db   :  { %v5197_v53 = vpop.f32.mrf.mxu1  ;;  %v5240_v2 = vpop.f32.mrf.mxu0 }
 0x8dc   :  { %v5429_v0 = vmul.f32 1.442695, %v5413_v61  ;;  %v5414_v35 = vsub.f32 0.0, %v5237_v62  ;;  %v5239_v1 = vadd.f32 %v5238_v11, %v5196_v63  ;;  %v5198_v38 = vadd.f32 %v5197_v53, %v3899_v55 }
 0x8dd   :  { %v3910_v62 = vsub.s32 6, %v7736_v52 }
 0x8de   :  { %7276 = vpow2.f32 %v5429_v0  ;;  %v5431_v33 = vmul.f32 1.442695, %v5414_v35  ;;  %v5420_v3 = vsub.f32 0.0, %v5239_v1  ;;  %v5241_v5 = vadd.f32 %v5240_v2, %v5198_v38 }
 0x8df   :  { %v3911_v0 = vrot.slane %v7817_v7, %v3910_v62 }
 0x8e0   :  { %7278 = vpow2.f32 %v5431_v33  ;;  %v5443_v6 = vmul.f32 1.442695, %v5420_v3  ;;  %v5421_v8 = vsub.f32 0.0, %v5241_v5 }
 0x8e2   :  { %7280 = vpow2.f32 %v5443_v6  ;;  %v5445_v9 = vmul.f32 1.442695, %v5421_v8 }
 0x8e4   :  { %7282 = vpow2.f32 %v5445_v9 }
 0x8eb   :  { %v7277_v10 = vpop.eup %7276 }
 0x8ec   :  { %v5455_v12 = vadd.f32 1.0, %v7277_v10 }
 0x8ed   :  { %v7279_v13 = vpop.eup %7278 }
 0x8ee   :  { %7284 = vrcp.f32 %v5455_v12  ;;  %v5456_v15 = vadd.f32 1.0, %v7279_v13 }
 0x8ef   :  { %v7281_v16 = vpop.eup %7280 }
 0x8f0   :  { %7286 = vrcp.f32 %v5456_v15  ;;  %v5462_v17 = vadd.f32 1.0, %v7281_v16 }
 0x8f1   :  { %v7283_v20 = vpop.eup %7282 }
 0x8f2   :  { %7288 = vrcp.f32 %v5462_v17  ;;  %v5463_v21 = vadd.f32 1.0, %v7283_v20 }
 0x8f4   :  { %7290 = vrcp.f32 %v5463_v21 }
 0x8fb   :  { %v7285_v24 = vpop.eup %7284 }
 0x8fc   :  { %5483 = vst [vmem:[#allocation20 + $0x10] sm:$0xff] %v7285_v24 }
 0x8fd   :  { %v7287_v22 = vpop.eup %7286 }
 0x8fe   :  { %5484 = vst [vmem:[#allocation20 + $0x18] sm:$0xff] %v7287_v22 }
 0x8ff   :  { %v7289_v25 = vpop.eup %7288 }
 0x900   :  { %5490 = vst [vmem:[#allocation20 + $0x48] sm:$0xff] %v7289_v25 }
 0x901   :  { %v7291_v23 = vpop.eup %7290 }
 0x902   :  { %5491 = vst [vmem:[#allocation20 + $0x50] sm:$0xff] %v7291_v23 }
 0x915   :  { %v5277_v56 = vpop.f32.mrf.mxu1 }
 0x916   :  { %v5278_v30 = vadd.f32 %v5277_v56, %v3903_v28  ;;  %v5320_v57 = vpop.f32.mrf.mxu0 }
 0x917   :  { %v5279_v31 = vpop.f32.mrf.mxu1 }
 0x918   :  { %v5321_v32 = vadd.f32 %v5320_v57, %v5278_v30  ;;  %v5280_v34 = vadd.f32 %v5279_v31, %v3907_v51  ;;  %v5322_v36 = vpop.f32.mrf.mxu0 }
 0x919   :  { %v5281_v37 = vpop.f32.mrf.mxu1 }
 0x91a   :  { %v5415_v39 = vsub.f32 0.0, %v5321_v32  ;;  %v5323_v40 = vadd.f32 %v5322_v36, %v5280_v34  ;;  %v5282_v41 = vadd.f32 %v5281_v37, %v3903_v28  ;;  %v5324_v42 = vpop.f32.mrf.mxu0 }
 0x91b   :  { %v5283_v43 = vpop.f32.mrf.mxu1 }
 0x91c   :  { %v5433_v44 = vmul.f32 1.442695, %v5415_v39  ;;  %v5416_v45 = vsub.f32 0.0, %v5323_v40  ;;  %v5325_v46 = vadd.f32 %v5324_v42, %v5282_v41  ;;  %v5284_v47 = vadd.f32 %v5283_v43, %v3907_v51  ;;  %v5326_v48 = vpop.f32.mrf.mxu0 }
 0x91e   :  { %7292 = vpow2.f32 %v5433_v44  ;;  %v5435_v50 = vmul.f32 1.442695, %v5416_v45  ;;  %v5422_v14 = vsub.f32 0.0, %v5325_v46  ;;  %v5327_v54 = vadd.f32 %v5326_v48, %v5284_v47 }
 0x920   :  { %7294 = vpow2.f32 %v5435_v50  ;;  %v5447_v55 = vmul.f32 1.442695, %v5422_v14  ;;  %v5423_v58 = vsub.f32 0.0, %v5327_v54 }
 0x922   :  { %7296 = vpow2.f32 %v5447_v55  ;;  %v5449_v29 = vmul.f32 1.442695, %v5423_v58 }
 0x924   :  { %7298 = vpow2.f32 %v5449_v29 }
 0x92b   :  { %v7293_v59 = vpop.eup %7292 }
 0x92c   :  { %v5457_v18 = vadd.f32 1.0, %v7293_v59 }
 0x92d   :  { %v7295_v4 = vpop.eup %7294 }
 0x92e   :  { %7300 = vrcp.f32 %v5457_v18  ;;  %v5458_v49 = vadd.f32 1.0, %v7295_v4 }
 0x92f   :  { %v7297_v19 = vpop.eup %7296 }
 0x930   :  { %7302 = vrcp.f32 %v5458_v49  ;;  %v5464_v60 = vadd.f32 1.0, %v7297_v19 }
 0x931   :  { %v7299_v11 = vpop.eup %7298 }
 0x932   :  { %7304 = vrcp.f32 %v5464_v60  ;;  %v5465_v61 = vadd.f32 1.0, %v7299_v11 }
 0x934   :  { %7306 = vrcp.f32 %v5465_v61 }
 0x935   :  { %v6225_v63 = vpop.f32.mrf.mxu1 }
 0x936   :  { %v6247_v53 = vpop.f32.mrf.mxu0 }
 0x937   :  { %v6226_v35 = vpop.f32.mrf.mxu1 }
 0x938   :  { %v6227_v1 = vadd.f32 %v6226_v35, %v6225_v63  ;;  %v6248_v38 = vpop.f32.mrf.mxu0 }
 0x939   :  { %v6228_v2 = vpop.f32.mrf.mxu1  ;;  %v6249_v3 = vadd.f32 %v6248_v38, %v6247_v53 }
 0x93a   :  { %v5364_v33 = vadd.f32 %v6227_v1, %v3911_v0  ;;  %v6250_v5 = vpop.f32.mrf.mxu0 }
 0x93b   :  { %v7301_v6 = vpop.eup %7300  ;;  %v6229_v8 = vpop.f32.mrf.mxu1 }
 0x93c   :  { %5485 = vst [vmem:[#allocation20 + $0x20] sm:$0xff] %v7301_v6  ;;  %v5405_v9 = vadd.f32 %v6249_v3, %v5364_v33  ;;  %v6230_v10 = vadd.f32 %v6229_v8, %v6228_v2  ;;  %v6251_v12 = vpop.f32.mrf.mxu0 }
 0x93d   :  { %v7303_v13 = vpop.eup %7302  ;;  %v6252_v16 = vadd.f32 %v6251_v12, %v6250_v5 }
 0x93e   :  { %5486 = vst [vmem:[#allocation20 + $0x28] sm:$0xff] %v7303_v13  ;;  %v5417_v52 = vsub.f32 0.0, %v5405_v9  ;;  %v5367_v15 = vadd.f32 %v6230_v10, %v3911_v0 }
 0x93f   :  { %v7305_v17 = vpop.eup %7304 }
 0x940   :  { %5492 = vst [vmem:[#allocation20 + $0x58] sm:$0xff] %v7305_v17  ;;  %v5437_v7 = vmul.f32 1.442695, %v5417_v52  ;;  %v5408_v20 = vadd.f32 %v6252_v16, %v5367_v15 }
 0x941   :  { %v7307_v21 = vpop.eup %7306 }
 0x942   :  { %5493 = vst [vmem:[#allocation20 + $0x60] sm:$0xff] %v7307_v21  ;;  %7308 = vpow2.f32 %v5437_v7  ;;  %v5424_v24 = vsub.f32 0.0, %v5408_v20 }
 0x944   :  { %v5451_v22 = vmul.f32 1.442695, %v5424_v24 }
 0x946   :  { %7310 = vpow2.f32 %v5451_v22 }
 0x94f   :  { %v7309_v25 = vpop.eup %7308 }
 0x950   :  { %v5459_v23 = vadd.f32 1.0, %v7309_v25 }
 0x952   :  { %7312 = vrcp.f32 %v5459_v23 }
 0x953   :  { %v7311_v26 = vpop.eup %7310 }
 0x954   :  { %v5466_v27 = vadd.f32 1.0, %v7311_v26 }
 0x956   :  { %7314 = vrcp.f32 %v5466_v27 }
 0x95f   :  { %v7313_v28 = vpop.eup %7312 }
 0x960   :  { %5487 = vst [vmem:[#allocation20 + $0x30] sm:$0xff] %v7313_v28 }
 0x963   :  { %v7315_v51 = vpop.eup %7314 }
 0x964   :  { %5494 = vst [vmem:[#allocation20 + $0x68] sm:$0xff] %v7315_v51 }
 0x965   :  { %7549 = shalt.err (!%p7546_p3)
}
 0x966   :  { %s7595_s21 = smov 896   ;;  %s7596_s16 = smov 56  }
 0x967   :  { %5506 = dma.vmem_to_hbm [thread:$0]  %s5501_s10, 1792, %s7847_s11, [#allocation4], %s7595_s21, %s7595_s21, %s7596_s16  }
 0x968   :  { %7570 = dma.done.wait [#allocation4], 1792  }
 0x969   :  { %7571 = vsyncadd [#allocation4], 4294965504 }
 0x96a   :  { %5510 = vsyncpa [#allocation3], 1 }
 0x96b   :  { %5511 = vsyncpa [#allocation6], 1 }
 0x96c   :  { %5512 = vsyncpa [#allocation9], 1 }
 0x96d   :  { %5513 = vsyncpa [#allocation12], 1 }
 0x96e   :  { %5514 = vsyncpa [#allocation15], 1 }
 0x96f   :  { %5515 = vsyncpa [#allocation18], 1 }
 0x970   :  { %5516 = vsyncpa [#allocation4], 1 }

</bundles_post_ra>
